<compile_context>
chip_gen: v7x
topology: tpu7x:2x2x1
jax: 0.10.0
libtpu: 0.0.40
codegen_flags: <defaults>
</compile_context>

<pallas_src>
import jax
import jax.numpy as jnp
from jax.experimental import pallas as pl
from jax.experimental.pallas import tpu as pltpu

EPS = 1e-5


def _model_kernel(x_ref,
                  w1_ref, g1_ref, be1_ref,
                  w2_ref, g2_ref, be2_ref,
                  rw1_ref, rg1_ref, rbe1_ref,
                  rw2_ref, rg2_ref, rbe2_ref,
                  wl_ref, bl_ref, out_ref):
    f32 = jnp.float32

    def bn_relu(y, gamma, beta):
        # Training-mode BatchNorm1d (batch stats, biased var) fused with ReLU.
        # Applied as a single scale/shift pass; gamma/beta are (C, 1).
        mu = jnp.mean(y, axis=1, keepdims=True)
        d = y - mu
        var = jnp.mean(d * d, axis=1, keepdims=True)
        scale = gamma * jax.lax.rsqrt(var + EPS)       # rsqrt -> EUP slot
        return jnp.maximum(d * scale + beta, 0.0)

    # Conv1d(80, 80, 1, groups=20) as a dense block-diagonal matmul.
    # Conv bias omitted: it is cancelled exactly by the following BN.
    h = jnp.dot(w1_ref[...], x_ref[...], preferred_element_type=f32)
    h = bn_relu(h, g1_ref[...], be1_ref[...])
    # Conv1d(80, 32, 1)
    h = jnp.dot(w2_ref[...], h, preferred_element_type=f32)
    h = bn_relu(h, g2_ref[...], be2_ref[...])

    def residue(h, i):          # _ResidueModule(32), i is a static Python index
        y = jnp.dot(rw1_ref[i], h, preferred_element_type=f32)
        y = bn_relu(y, rg1_ref[i], rbe1_ref[i])
        y = jnp.dot(rw2_ref[i], y, preferred_element_type=f32)
        y = bn_relu(y, rg2_ref[i], rbe2_ref[i])
        return h + y

    def avgpool2(h):
        # Host-side bit-reversal ordering of the position axis makes
        # AvgPool1d(2) a plain half-split add along the lane axis.
        nh = h.shape[1] // 2
        return (h[:, :nh] + h[:, nh:]) * 0.5

    h = residue(h, 0); h = residue(h, 1); h = avgpool2(h)
    h = residue(h, 2); h = residue(h, 3); h = avgpool2(h)
    h = residue(h, 4); h = residue(h, 5); h = avgpool2(h)
    h = residue(h, 6); h = residue(h, 7)

    # AdaptiveAvgPool1d(1): after the three pools the lane layout is q*B + b
    # (position-major, batch-minor); per-batch mean = sum of lf width-B slices.
    bsz = out_ref.shape[1]
    lf = h.shape[1] // bsz
    acc = h[:, 0:bsz]
    for q in range(1, lf):
        acc = acc + h[:, q * bsz:(q + 1) * bsz]
    h_mean = acc * (1.0 / lf)                          # (32, B)

    # Linear(32, 3) -> (3, B); transposed to (B, 3) on the host.
    out_ref[...] = (jnp.dot(wl_ref[...], h_mean, preferred_element_type=f32)
                    + bl_ref[...])


def init_params(key):
    ks = jax.random.split(key, 18)
    n = jax.random.normal
    p = {
        # Conv1d(80, 80, 1, groups=20): weight (80, 4), bias (80,)
        "w1g": 0.3 * n(ks[0], (80, 4), jnp.float32),
        "b1": 0.1 * n(ks[1], (80,), jnp.float32),
        "g1": 1.0 + 0.1 * n(ks[2], (80,), jnp.float32),
        "be1": 0.1 * n(ks[3], (80,), jnp.float32),
        # Conv1d(80, 32, 1)
        "w2": 0.2 * n(ks[4], (32, 80), jnp.float32),
        "b2": 0.1 * n(ks[5], (32,), jnp.float32),
        "g2": 1.0 + 0.1 * n(ks[6], (32,), jnp.float32),
        "be2": 0.1 * n(ks[7], (32,), jnp.float32),
        # 8 _ResidueModule(32), each: two Conv1d(32,32,1) + two BatchNorm1d(32)
        "rw1": 0.2 * n(ks[8], (8, 32, 32), jnp.float32),
        "rb1": 0.1 * n(ks[9], (8, 32), jnp.float32),
        "rg1": 1.0 + 0.1 * n(ks[10], (8, 32), jnp.float32),
        "rbe1": 0.1 * n(ks[11], (8, 32), jnp.float32),
        "rw2": 0.2 * n(ks[12], (8, 32, 32), jnp.float32),
        "rb2": 0.1 * n(ks[13], (8, 32), jnp.float32),
        "rg2": 1.0 + 0.1 * n(ks[14], (8, 32), jnp.float32),
        "rbe2": 0.1 * n(ks[15], (8, 32), jnp.float32),
        # Linear(32, 3)
        "wl": 0.2 * n(ks[16], (3, 32), jnp.float32),
        "bl": 0.1 * n(ks[17], (3,), jnp.float32),
    }
    return p


def _pool_perm(l):
    """Permutation of the position axis (length l, l % 8 == 0) so that each of
    the three AvgPool1d(2) stages becomes (first half + second half) on the
    flattened lane axis, recursively."""
    p = jnp.arange(l, dtype=jnp.int32)
    f3 = ((p // 8)
          + ((p // 4) % 2) * (l // 8)
          + ((p // 2) % 2) * (l // 4)
          + (p % 2) * (l // 2))
    # inv[j] = original position stored at lane-slot j (f3(inv[j]) == j)
    return jnp.argsort(f3)


def model_forward(x, p):
    b = x.shape[0]
    x = x.reshape(b, 80, -1)                       # == torch x.view(B, 80, -1)
    l = x.shape[-1]
    assert l % 8 == 0, "need L divisible by 8 for the three AvgPool1d(2)"
    n = b * l

    # host glue: lane-dense (C, N) layout, N ordered position-major
    # (bit-reversal permuted) / batch-minor -> pooling = half-split adds.
    inv = _pool_perm(l)
    xk = jnp.transpose(x, (1, 2, 0))[:, inv, :].reshape(80, n)

    # dense block-diagonal equivalent of the grouped 1x1 conv
    blocks = [p["w1g"][g * 4:(g + 1) * 4, :] for g in range(20)]
    w1_dense = jax.scipy.linalg.block_diag(*blocks)          # (Cout=80, Cin=80)

    args = (
        xk,
        w1_dense, p["g1"][:, None], p["be1"][:, None],
        p["w2"], p["g2"][:, None], p["be2"][:, None],
        p["rw1"], p["rg1"][:, :, None], p["rbe1"][:, :, None],
        p["rw2"], p["rg2"][:, :, None], p["rbe2"][:, :, None],
        p["wl"], p["bl"][:, None],
    )

    # advisory cost estimate + explicit VMEM limit (v7x has only 64 MiB phys)
    flops = 2 * n * (80 * 80 + 80 * 32) + 15 * n * 32 * 32 + 2 * 3 * 32 * b
    cost = pl.CostEstimate(flops=int(flops), transcendentals=18 * 80,
                           bytes_accessed=int(4 * (80 * n + 3 * b + 32 * 1024)))
    vmem_limit = int(min(64 * 2 ** 20, max(32 * 2 ** 20, 1200 * n)))

    # TODO(synk): for very large B*L, add a row grid with
    # dimension_semantics=("parallel",) and two-phase BatchNorm statistics so
    # the activation slab need not be VMEM-resident in a single invocation.
    outT = pl.pallas_call(
        _model_kernel,
        out_shape=jax.ShapeDtypeStruct((3, b), jnp.float32),
        in_specs=[pl.BlockSpec(memory_space=pltpu.MemorySpace.VMEM)] * len(args),
        out_specs=pl.BlockSpec(memory_space=pltpu.MemorySpace.VMEM),
        compiler_params=pltpu.CompilerParams(vmem_limit_bytes=vmem_limit),
        cost_estimate=cost,
    )(*args)
    return outT.T                                  # (B, 3)


def _reference(x, p):
    """Pure-JAX reference written in torch NCL layout for cross-checking."""
    b = x.shape[0]
    x = x.reshape(b, 80, -1)
    relu = lambda v: jnp.maximum(v, 0.0)

    def conv1x1(h, w, bias):
        return jnp.einsum("oi,bil->bol", w, h) + bias[None, :, None]

    def gconv(h, wg, bias, groups=20):
        cpg = h.shape[1] // groups
        outs = [jnp.einsum("oi,bil->bol", wg[g * cpg:(g + 1) * cpg, :],
                           h[:, g * cpg:(g + 1) * cpg, :]) for g in range(groups)]
        return jnp.concatenate(outs, axis=1) + bias[None, :, None]

    def bn(h, gamma, beta):
        mu = jnp.mean(h, axis=(0, 2), keepdims=True)
        var = jnp.mean(jnp.square(h - mu), axis=(0, 2), keepdims=True)
        return ((h - mu) * jax.lax.rsqrt(var + EPS)
                * gamma[None, :, None] + beta[None, :, None])

    h = relu(bn(gconv(x, p["w1g"], p["b1"]), p["g1"], p["be1"]))
    h = relu(bn(conv1x1(h, p["w2"], p["b2"]), p["g2"], p["be2"]))

    def residue(h, i):
        y = relu(bn(conv1x1(h, p["rw1"][i], p["rb1"][i]), p["rg1"][i], p["rbe1"][i]))
        y = relu(bn(conv1x1(y, p["rw2"][i], p["rb2"][i]), p["rg2"][i], p["rbe2"][i]))
        return h + y

    def avgpool2(h):
        bb, c, ll = h.shape
        return h.reshape(bb, c, ll // 2, 2).mean(axis=-1)

    h = residue(h, 0); h = residue(h, 1); h = avgpool2(h)
    h = residue(h, 2); h = residue(h, 3); h = avgpool2(h)
    h = residue(h, 4); h = residue(h, 5); h = avgpool2(h)
    h = residue(h, 6); h = residue(h, 7)
    h = h.mean(axis=-1)                               # AdaptiveAvgPool1d(1) + squeeze
    return h @ p["wl"].T + p["bl"][None, :]


if __name__ == "__main__":
    key = jax.random.PRNGKey(0)
    kx, kp = jax.random.split(key)
    B, L = 2, 16                                     # x.view(B, 80, -1) -> (2, 80, 16)
    x = jax.random.normal(kx, (B, 80, L), jnp.float32)
    params = init_params(kp)

    out = jax.block_until_ready(model_forward(x, params))
    assert out.shape == (B, 3)

    ref = _reference(x, params)
    if not jnp.allclose(out, ref, rtol=1e-2, atol=1e-2):
        raise AssertionError(
            f"kernel/reference mismatch, max abs diff={jnp.max(jnp.abs(out - ref))}")

    print("KERNEL_OK")
</pallas_src>

<mosaic_0001>
module attributes {stable_mosaic.version = 11 : i64} {
  func.func @_model_kernel(%arg0: memref<80x32xf32, #tpu.memory_space<vmem>>, %arg1: memref<80x80xf32, #tpu.memory_space<vmem>>, %arg2: memref<80x1xf32, #tpu.memory_space<vmem>>, %arg3: memref<80x1xf32, #tpu.memory_space<vmem>>, %arg4: memref<32x80xf32, #tpu.memory_space<vmem>>, %arg5: memref<32x1xf32, #tpu.memory_space<vmem>>, %arg6: memref<32x1xf32, #tpu.memory_space<vmem>>, %arg7: memref<8x32x32xf32, #tpu.memory_space<vmem>>, %arg8: memref<8x32x1xf32, #tpu.memory_space<vmem>>, %arg9: memref<8x32x1xf32, #tpu.memory_space<vmem>>, %arg10: memref<8x32x32xf32, #tpu.memory_space<vmem>>, %arg11: memref<8x32x1xf32, #tpu.memory_space<vmem>>, %arg12: memref<8x32x1xf32, #tpu.memory_space<vmem>>, %arg13: memref<3x32xf32, #tpu.memory_space<vmem>>, %arg14: memref<3x1xf32, #tpu.memory_space<vmem>>, %arg15: memref<3x2xf32, #tpu.memory_space<vmem>>) attributes {dimension_semantics = [], scalar_prefetch = 0 : i64, scratch_operands = 0 : i64, tpu.core_type = #tpu.core_type<tc>} {
    %c0 = arith.constant 0 : index
    %c0_0 = arith.constant 0 : index
    %0 = vector.load %arg1[%c0, %c0_0] : memref<80x80xf32, #tpu.memory_space<vmem>>, vector<80x80xf32>
    %c0_1 = arith.constant 0 : index
    %c0_2 = arith.constant 0 : index
    %1 = vector.load %arg0[%c0_1, %c0_2] : memref<80x32xf32, #tpu.memory_space<vmem>>, vector<80x32xf32>
    %cst = arith.constant dense<0.000000e+00> : vector<80x32xf32>
    %2 = tpu.matmul %0, %1, %cst {dimension_numbers = #tpu.dot_dimension_numbers<[1], [0], [0], [1], [0, 0, 1, 1], [], []>} : vector<80x80xf32>, vector<80x32xf32>, vector<80x32xf32> -> vector<80x32xf32>
    %c0_3 = arith.constant 0 : index
    %c0_4 = arith.constant 0 : index
    %3 = vector.load %arg2[%c0_3, %c0_4] : memref<80x1xf32, #tpu.memory_space<vmem>>, vector<80x1xf32>
    %c0_5 = arith.constant 0 : index
    %c0_6 = arith.constant 0 : index
    %4 = vector.load %arg3[%c0_5, %c0_6] : memref<80x1xf32, #tpu.memory_space<vmem>>, vector<80x1xf32>
    %cst_7 = arith.constant dense<0.000000e+00> : vector<80xf32>
    %5 = vector.multi_reduction <add>, %2, %cst_7 [1] : vector<80x32xf32> to vector<80xf32>
    %6 = vector.shape_cast %5 : vector<80xf32> to vector<80x1xf32>
    %cst_8 = arith.constant 3.200000e+01 : f32
    %7 = vector.broadcast %cst_8 : f32 to vector<80x1xf32>
    %8 = arith.divf %6, %7 : vector<80x1xf32>
    %9 = vector.broadcast %8 : vector<80x1xf32> to vector<80x32xf32>
    %10 = arith.subf %2, %9 : vector<80x32xf32>
    %11 = arith.mulf %10, %10 : vector<80x32xf32>
    %cst_9 = arith.constant dense<0.000000e+00> : vector<80xf32>
    %12 = vector.multi_reduction <add>, %11, %cst_9 [1] : vector<80x32xf32> to vector<80xf32>
    %13 = vector.shape_cast %12 : vector<80xf32> to vector<80x1xf32>
    %cst_10 = arith.constant 3.200000e+01 : f32
    %14 = vector.broadcast %cst_10 : f32 to vector<80x1xf32>
    %15 = arith.divf %13, %14 : vector<80x1xf32>
    %cst_11 = arith.constant 9.99999974E-6 : f32
    %16 = vector.broadcast %cst_11 : f32 to vector<80x1xf32>
    %17 = arith.addf %15, %16 : vector<80x1xf32>
    %18 = math.rsqrt %17 : vector<80x1xf32>
    %19 = arith.mulf %3, %18 : vector<80x1xf32>
    %20 = vector.broadcast %19 : vector<80x1xf32> to vector<80x32xf32>
    %21 = arith.mulf %10, %20 : vector<80x32xf32>
    %22 = vector.broadcast %4 : vector<80x1xf32> to vector<80x32xf32>
    %23 = arith.addf %21, %22 : vector<80x32xf32>
    %cst_12 = arith.constant 0.000000e+00 : f32
    %24 = vector.broadcast %cst_12 : f32 to vector<80x32xf32>
    %25 = arith.maximumf %23, %24 : vector<80x32xf32>
    %c0_13 = arith.constant 0 : index
    %c0_14 = arith.constant 0 : index
    %26 = vector.load %arg4[%c0_13, %c0_14] : memref<32x80xf32, #tpu.memory_space<vmem>>, vector<32x80xf32>
    %cst_15 = arith.constant dense<0.000000e+00> : vector<32x32xf32>
    %27 = tpu.matmul %26, %25, %cst_15 {dimension_numbers = #tpu.dot_dimension_numbers<[1], [0], [0], [1], [0, 0, 1, 1], [], []>} : vector<32x80xf32>, vector<80x32xf32>, vector<32x32xf32> -> vector<32x32xf32>
    %c0_16 = arith.constant 0 : index
    %c0_17 = arith.constant 0 : index
    %28 = vector.load %arg5[%c0_16, %c0_17] : memref<32x1xf32, #tpu.memory_space<vmem>>, vector<32x1xf32>
    %c0_18 = arith.constant 0 : index
    %c0_19 = arith.constant 0 : index
    %29 = vector.load %arg6[%c0_18, %c0_19] : memref<32x1xf32, #tpu.memory_space<vmem>>, vector<32x1xf32>
    %cst_20 = arith.constant dense<0.000000e+00> : vector<32xf32>
    %30 = vector.multi_reduction <add>, %27, %cst_20 [1] : vector<32x32xf32> to vector<32xf32>
    %31 = vector.shape_cast %30 : vector<32xf32> to vector<32x1xf32>
    %cst_21 = arith.constant 3.200000e+01 : f32
    %32 = vector.broadcast %cst_21 : f32 to vector<32x1xf32>
    %33 = arith.divf %31, %32 : vector<32x1xf32>
    %34 = vector.broadcast %33 : vector<32x1xf32> to vector<32x32xf32>
    %35 = arith.subf %27, %34 : vector<32x32xf32>
    %36 = arith.mulf %35, %35 : vector<32x32xf32>
    %cst_22 = arith.constant dense<0.000000e+00> : vector<32xf32>
    %37 = vector.multi_reduction <add>, %36, %cst_22 [1] : vector<32x32xf32> to vector<32xf32>
    %38 = vector.shape_cast %37 : vector<32xf32> to vector<32x1xf32>
    %cst_23 = arith.constant 3.200000e+01 : f32
    %39 = vector.broadcast %cst_23 : f32 to vector<32x1xf32>
    %40 = arith.divf %38, %39 : vector<32x1xf32>
    %cst_24 = arith.constant 9.99999974E-6 : f32
    %41 = vector.broadcast %cst_24 : f32 to vector<32x1xf32>
    %42 = arith.addf %40, %41 : vector<32x1xf32>
    %43 = math.rsqrt %42 : vector<32x1xf32>
    %44 = arith.mulf %28, %43 : vector<32x1xf32>
    %45 = vector.broadcast %44 : vector<32x1xf32> to vector<32x32xf32>
    %46 = arith.mulf %35, %45 : vector<32x32xf32>
    %47 = vector.broadcast %29 : vector<32x1xf32> to vector<32x32xf32>
    %48 = arith.addf %46, %47 : vector<32x32xf32>
    %cst_25 = arith.constant 0.000000e+00 : f32
    %49 = vector.broadcast %cst_25 : f32 to vector<32x32xf32>
    %50 = arith.maximumf %48, %49 : vector<32x32xf32>
    %c0_26 = arith.constant 0 : index
    %c0_27 = arith.constant 0 : index
    %c0_28 = arith.constant 0 : index
    %51 = vector.load %arg7[%c0_26, %c0_27, %c0_28] : memref<8x32x32xf32, #tpu.memory_space<vmem>>, vector<1x32x32xf32>
    %52 = vector.shape_cast %51 : vector<1x32x32xf32> to vector<32x32xf32>
    %cst_29 = arith.constant dense<0.000000e+00> : vector<32x32xf32>
    %53 = tpu.matmul %52, %50, %cst_29 {dimension_numbers = #tpu.dot_dimension_numbers<[1], [0], [0], [1], [0, 0, 1, 1], [], []>} : vector<32x32xf32>, vector<32x32xf32>, vector<32x32xf32> -> vector<32x32xf32>
    %c0_30 = arith.constant 0 : index
    %c0_31 = arith.constant 0 : index
    %c0_32 = arith.constant 0 : index
    %54 = vector.load %arg8[%c0_30, %c0_31, %c0_32] : memref<8x32x1xf32, #tpu.memory_space<vmem>>, vector<1x32x1xf32>
    %55 = vector.shape_cast %54 : vector<1x32x1xf32> to vector<32x1xf32>
    %c0_33 = arith.constant 0 : index
    %c0_34 = arith.constant 0 : index
    %c0_35 = arith.constant 0 : index
    %56 = vector.load %arg9[%c0_33, %c0_34, %c0_35] : memref<8x32x1xf32, #tpu.memory_space<vmem>>, vector<1x32x1xf32>
    %57 = vector.shape_cast %56 : vector<1x32x1xf32> to vector<32x1xf32>
    %cst_36 = arith.constant dense<0.000000e+00> : vector<32xf32>
    %58 = vector.multi_reduction <add>, %53, %cst_36 [1] : vector<32x32xf32> to vector<32xf32>
    %59 = vector.shape_cast %58 : vector<32xf32> to vector<32x1xf32>
    %cst_37 = arith.constant 3.200000e+01 : f32
    %60 = vector.broadcast %cst_37 : f32 to vector<32x1xf32>
    %61 = arith.divf %59, %60 : vector<32x1xf32>
    %62 = vector.broadcast %61 : vector<32x1xf32> to vector<32x32xf32>
    %63 = arith.subf %53, %62 : vector<32x32xf32>
    %64 = arith.mulf %63, %63 : vector<32x32xf32>
    %cst_38 = arith.constant dense<0.000000e+00> : vector<32xf32>
    %65 = vector.multi_reduction <add>, %64, %cst_38 [1] : vector<32x32xf32> to vector<32xf32>
    %66 = vector.shape_cast %65 : vector<32xf32> to vector<32x1xf32>
    %cst_39 = arith.constant 3.200000e+01 : f32
    %67 = vector.broadcast %cst_39 : f32 to vector<32x1xf32>
    %68 = arith.divf %66, %67 : vector<32x1xf32>
    %cst_40 = arith.constant 9.99999974E-6 : f32
    %69 = vector.broadcast %cst_40 : f32 to vector<32x1xf32>
    %70 = arith.addf %68, %69 : vector<32x1xf32>
    %71 = math.rsqrt %70 : vector<32x1xf32>
    %72 = arith.mulf %55, %71 : vector<32x1xf32>
    %73 = vector.broadcast %72 : vector<32x1xf32> to vector<32x32xf32>
    %74 = arith.mulf %63, %73 : vector<32x32xf32>
    %75 = vector.broadcast %57 : vector<32x1xf32> to vector<32x32xf32>
    %76 = arith.addf %74, %75 : vector<32x32xf32>
    %cst_41 = arith.constant 0.000000e+00 : f32
    %77 = vector.broadcast %cst_41 : f32 to vector<32x32xf32>
    %78 = arith.maximumf %76, %77 : vector<32x32xf32>
    %c0_42 = arith.constant 0 : index
    %c0_43 = arith.constant 0 : index
    %c0_44 = arith.constant 0 : index
    %79 = vector.load %arg10[%c0_42, %c0_43, %c0_44] : memref<8x32x32xf32, #tpu.memory_space<vmem>>, vector<1x32x32xf32>
    %80 = vector.shape_cast %79 : vector<1x32x32xf32> to vector<32x32xf32>
    %cst_45 = arith.constant dense<0.000000e+00> : vector<32x32xf32>
    %81 = tpu.matmul %80, %78, %cst_45 {dimension_numbers = #tpu.dot_dimension_numbers<[1], [0], [0], [1], [0, 0, 1, 1], [], []>} : vector<32x32xf32>, vector<32x32xf32>, vector<32x32xf32> -> vector<32x32xf32>
    %c0_46 = arith.constant 0 : index
    %c0_47 = arith.constant 0 : index
    %c0_48 = arith.constant 0 : index
    %82 = vector.load %arg11[%c0_46, %c0_47, %c0_48] : memref<8x32x1xf32, #tpu.memory_space<vmem>>, vector<1x32x1xf32>
    %83 = vector.shape_cast %82 : vector<1x32x1xf32> to vector<32x1xf32>
    %c0_49 = arith.constant 0 : index
    %c0_50 = arith.constant 0 : index
    %c0_51 = arith.constant 0 : index
    %84 = vector.load %arg12[%c0_49, %c0_50, %c0_51] : memref<8x32x1xf32, #tpu.memory_space<vmem>>, vector<1x32x1xf32>
    %85 = vector.shape_cast %84 : vector<1x32x1xf32> to vector<32x1xf32>
    %cst_52 = arith.constant dense<0.000000e+00> : vector<32xf32>
    %86 = vector.multi_reduction <add>, %81, %cst_52 [1] : vector<32x32xf32> to vector<32xf32>
    %87 = vector.shape_cast %86 : vector<32xf32> to vector<32x1xf32>
    %cst_53 = arith.constant 3.200000e+01 : f32
    %88 = vector.broadcast %cst_53 : f32 to vector<32x1xf32>
    %89 = arith.divf %87, %88 : vector<32x1xf32>
    %90 = vector.broadcast %89 : vector<32x1xf32> to vector<32x32xf32>
    %91 = arith.subf %81, %90 : vector<32x32xf32>
    %92 = arith.mulf %91, %91 : vector<32x32xf32>
    %cst_54 = arith.constant dense<0.000000e+00> : vector<32xf32>
    %93 = vector.multi_reduction <add>, %92, %cst_54 [1] : vector<32x32xf32> to vector<32xf32>
    %94 = vector.shape_cast %93 : vector<32xf32> to vector<32x1xf32>
    %cst_55 = arith.constant 3.200000e+01 : f32
    %95 = vector.broadcast %cst_55 : f32 to vector<32x1xf32>
    %96 = arith.divf %94, %95 : vector<32x1xf32>
    %cst_56 = arith.constant 9.99999974E-6 : f32
    %97 = vector.broadcast %cst_56 : f32 to vector<32x1xf32>
    %98 = arith.addf %96, %97 : vector<32x1xf32>
    %99 = math.rsqrt %98 : vector<32x1xf32>
    %100 = arith.mulf %83, %99 : vector<32x1xf32>
    %101 = vector.broadcast %100 : vector<32x1xf32> to vector<32x32xf32>
    %102 = arith.mulf %91, %101 : vector<32x32xf32>
    %103 = vector.broadcast %85 : vector<32x1xf32> to vector<32x32xf32>
    %104 = arith.addf %102, %103 : vector<32x32xf32>
    %cst_57 = arith.constant 0.000000e+00 : f32
    %105 = vector.broadcast %cst_57 : f32 to vector<32x32xf32>
    %106 = arith.maximumf %104, %105 : vector<32x32xf32>
    %107 = arith.addf %50, %106 : vector<32x32xf32>
    %c1 = arith.constant 1 : index
    %c0_58 = arith.constant 0 : index
    %c0_59 = arith.constant 0 : index
    %108 = vector.load %arg7[%c1, %c0_58, %c0_59] : memref<8x32x32xf32, #tpu.memory_space<vmem>>, vector<1x32x32xf32>
    %109 = vector.shape_cast %108 : vector<1x32x32xf32> to vector<32x32xf32>
    %cst_60 = arith.constant dense<0.000000e+00> : vector<32x32xf32>
    %110 = tpu.matmul %109, %107, %cst_60 {dimension_numbers = #tpu.dot_dimension_numbers<[1], [0], [0], [1], [0, 0, 1, 1], [], []>} : vector<32x32xf32>, vector<32x32xf32>, vector<32x32xf32> -> vector<32x32xf32>
    %c1_61 = arith.constant 1 : index
    %c0_62 = arith.constant 0 : index
    %c0_63 = arith.constant 0 : index
    %111 = vector.load %arg8[%c1_61, %c0_62, %c0_63] : memref<8x32x1xf32, #tpu.memory_space<vmem>>, vector<1x32x1xf32>
    %112 = vector.shape_cast %111 : vector<1x32x1xf32> to vector<32x1xf32>
    %c1_64 = arith.constant 1 : index
    %c0_65 = arith.constant 0 : index
    %c0_66 = arith.constant 0 : index
    %113 = vector.load %arg9[%c1_64, %c0_65, %c0_66] : memref<8x32x1xf32, #tpu.memory_space<vmem>>, vector<1x32x1xf32>
    %114 = vector.shape_cast %113 : vector<1x32x1xf32> to vector<32x1xf32>
    %cst_67 = arith.constant dense<0.000000e+00> : vector<32xf32>
    %115 = vector.multi_reduction <add>, %110, %cst_67 [1] : vector<32x32xf32> to vector<32xf32>
    %116 = vector.shape_cast %115 : vector<32xf32> to vector<32x1xf32>
    %cst_68 = arith.constant 3.200000e+01 : f32
    %117 = vector.broadcast %cst_68 : f32 to vector<32x1xf32>
    %118 = arith.divf %116, %117 : vector<32x1xf32>
    %119 = vector.broadcast %118 : vector<32x1xf32> to vector<32x32xf32>
    %120 = arith.subf %110, %119 : vector<32x32xf32>
    %121 = arith.mulf %120, %120 : vector<32x32xf32>
    %cst_69 = arith.constant dense<0.000000e+00> : vector<32xf32>
    %122 = vector.multi_reduction <add>, %121, %cst_69 [1] : vector<32x32xf32> to vector<32xf32>
    %123 = vector.shape_cast %122 : vector<32xf32> to vector<32x1xf32>
    %cst_70 = arith.constant 3.200000e+01 : f32
    %124 = vector.broadcast %cst_70 : f32 to vector<32x1xf32>
    %125 = arith.divf %123, %124 : vector<32x1xf32>
    %cst_71 = arith.constant 9.99999974E-6 : f32
    %126 = vector.broadcast %cst_71 : f32 to vector<32x1xf32>
    %127 = arith.addf %125, %126 : vector<32x1xf32>
    %128 = math.rsqrt %127 : vector<32x1xf32>
    %129 = arith.mulf %112, %128 : vector<32x1xf32>
    %130 = vector.broadcast %129 : vector<32x1xf32> to vector<32x32xf32>
    %131 = arith.mulf %120, %130 : vector<32x32xf32>
    %132 = vector.broadcast %114 : vector<32x1xf32> to vector<32x32xf32>
    %133 = arith.addf %131, %132 : vector<32x32xf32>
    %cst_72 = arith.constant 0.000000e+00 : f32
    %134 = vector.broadcast %cst_72 : f32 to vector<32x32xf32>
    %135 = arith.maximumf %133, %134 : vector<32x32xf32>
    %c1_73 = arith.constant 1 : index
    %c0_74 = arith.constant 0 : index
    %c0_75 = arith.constant 0 : index
    %136 = vector.load %arg10[%c1_73, %c0_74, %c0_75] : memref<8x32x32xf32, #tpu.memory_space<vmem>>, vector<1x32x32xf32>
    %137 = vector.shape_cast %136 : vector<1x32x32xf32> to vector<32x32xf32>
    %cst_76 = arith.constant dense<0.000000e+00> : vector<32x32xf32>
    %138 = tpu.matmul %137, %135, %cst_76 {dimension_numbers = #tpu.dot_dimension_numbers<[1], [0], [0], [1], [0, 0, 1, 1], [], []>} : vector<32x32xf32>, vector<32x32xf32>, vector<32x32xf32> -> vector<32x32xf32>
    %c1_77 = arith.constant 1 : index
    %c0_78 = arith.constant 0 : index
    %c0_79 = arith.constant 0 : index
    %139 = vector.load %arg11[%c1_77, %c0_78, %c0_79] : memref<8x32x1xf32, #tpu.memory_space<vmem>>, vector<1x32x1xf32>
    %140 = vector.shape_cast %139 : vector<1x32x1xf32> to vector<32x1xf32>
    %c1_80 = arith.constant 1 : index
    %c0_81 = arith.constant 0 : index
    %c0_82 = arith.constant 0 : index
    %141 = vector.load %arg12[%c1_80, %c0_81, %c0_82] : memref<8x32x1xf32, #tpu.memory_space<vmem>>, vector<1x32x1xf32>
    %142 = vector.shape_cast %141 : vector<1x32x1xf32> to vector<32x1xf32>
    %cst_83 = arith.constant dense<0.000000e+00> : vector<32xf32>
    %143 = vector.multi_reduction <add>, %138, %cst_83 [1] : vector<32x32xf32> to vector<32xf32>
    %144 = vector.shape_cast %143 : vector<32xf32> to vector<32x1xf32>
    %cst_84 = arith.constant 3.200000e+01 : f32
    %145 = vector.broadcast %cst_84 : f32 to vector<32x1xf32>
    %146 = arith.divf %144, %145 : vector<32x1xf32>
    %147 = vector.broadcast %146 : vector<32x1xf32> to vector<32x32xf32>
    %148 = arith.subf %138, %147 : vector<32x32xf32>
    %149 = arith.mulf %148, %148 : vector<32x32xf32>
    %cst_85 = arith.constant dense<0.000000e+00> : vector<32xf32>
    %150 = vector.multi_reduction <add>, %149, %cst_85 [1] : vector<32x32xf32> to vector<32xf32>
    %151 = vector.shape_cast %150 : vector<32xf32> to vector<32x1xf32>
    %cst_86 = arith.constant 3.200000e+01 : f32
    %152 = vector.broadcast %cst_86 : f32 to vector<32x1xf32>
    %153 = arith.divf %151, %152 : vector<32x1xf32>
    %cst_87 = arith.constant 9.99999974E-6 : f32
    %154 = vector.broadcast %cst_87 : f32 to vector<32x1xf32>
    %155 = arith.addf %153, %154 : vector<32x1xf32>
    %156 = math.rsqrt %155 : vector<32x1xf32>
    %157 = arith.mulf %140, %156 : vector<32x1xf32>
    %158 = vector.broadcast %157 : vector<32x1xf32> to vector<32x32xf32>
    %159 = arith.mulf %148, %158 : vector<32x32xf32>
    %160 = vector.broadcast %142 : vector<32x1xf32> to vector<32x32xf32>
    %161 = arith.addf %159, %160 : vector<32x32xf32>
    %cst_88 = arith.constant 0.000000e+00 : f32
    %162 = vector.broadcast %cst_88 : f32 to vector<32x32xf32>
    %163 = arith.maximumf %161, %162 : vector<32x32xf32>
    %164 = arith.addf %107, %163 : vector<32x32xf32>
    %165 = vector.extract_strided_slice %164 {offsets = [0, 0], sizes = [32, 16], strides = [1, 1]} : vector<32x32xf32> to vector<32x16xf32>
    %166 = vector.extract_strided_slice %164 {offsets = [0, 16], sizes = [32, 16], strides = [1, 1]} : vector<32x32xf32> to vector<32x16xf32>
    %167 = arith.addf %165, %166 : vector<32x16xf32>
    %cst_89 = arith.constant 5.000000e-01 : f32
    %168 = vector.broadcast %cst_89 : f32 to vector<32x16xf32>
    %169 = arith.mulf %167, %168 : vector<32x16xf32>
    %c2 = arith.constant 2 : index
    %c0_90 = arith.constant 0 : index
    %c0_91 = arith.constant 0 : index
    %170 = vector.load %arg7[%c2, %c0_90, %c0_91] : memref<8x32x32xf32, #tpu.memory_space<vmem>>, vector<1x32x32xf32>
    %171 = vector.shape_cast %170 : vector<1x32x32xf32> to vector<32x32xf32>
    %cst_92 = arith.constant dense<0.000000e+00> : vector<32x16xf32>
    %172 = tpu.matmul %171, %169, %cst_92 {dimension_numbers = #tpu.dot_dimension_numbers<[1], [0], [0], [1], [0, 0, 1, 1], [], []>} : vector<32x32xf32>, vector<32x16xf32>, vector<32x16xf32> -> vector<32x16xf32>
    %c2_93 = arith.constant 2 : index
    %c0_94 = arith.constant 0 : index
    %c0_95 = arith.constant 0 : index
    %173 = vector.load %arg8[%c2_93, %c0_94, %c0_95] : memref<8x32x1xf32, #tpu.memory_space<vmem>>, vector<1x32x1xf32>
    %174 = vector.shape_cast %173 : vector<1x32x1xf32> to vector<32x1xf32>
    %c2_96 = arith.constant 2 : index
    %c0_97 = arith.constant 0 : index
    %c0_98 = arith.constant 0 : index
    %175 = vector.load %arg9[%c2_96, %c0_97, %c0_98] : memref<8x32x1xf32, #tpu.memory_space<vmem>>, vector<1x32x1xf32>
    %176 = vector.shape_cast %175 : vector<1x32x1xf32> to vector<32x1xf32>
    %cst_99 = arith.constant dense<0.000000e+00> : vector<32xf32>
    %177 = vector.multi_reduction <add>, %172, %cst_99 [1] : vector<32x16xf32> to vector<32xf32>
    %178 = vector.shape_cast %177 : vector<32xf32> to vector<32x1xf32>
    %cst_100 = arith.constant 1.600000e+01 : f32
    %179 = vector.broadcast %cst_100 : f32 to vector<32x1xf32>
    %180 = arith.divf %178, %179 : vector<32x1xf32>
    %181 = vector.broadcast %180 : vector<32x1xf32> to vector<32x16xf32>
    %182 = arith.subf %172, %181 : vector<32x16xf32>
    %183 = arith.mulf %182, %182 : vector<32x16xf32>
    %cst_101 = arith.constant dense<0.000000e+00> : vector<32xf32>
    %184 = vector.multi_reduction <add>, %183, %cst_101 [1] : vector<32x16xf32> to vector<32xf32>
    %185 = vector.shape_cast %184 : vector<32xf32> to vector<32x1xf32>
    %cst_102 = arith.constant 1.600000e+01 : f32
    %186 = vector.broadcast %cst_102 : f32 to vector<32x1xf32>
    %187 = arith.divf %185, %186 : vector<32x1xf32>
    %cst_103 = arith.constant 9.99999974E-6 : f32
    %188 = vector.broadcast %cst_103 : f32 to vector<32x1xf32>
    %189 = arith.addf %187, %188 : vector<32x1xf32>
    %190 = math.rsqrt %189 : vector<32x1xf32>
    %191 = arith.mulf %174, %190 : vector<32x1xf32>
    %192 = vector.broadcast %191 : vector<32x1xf32> to vector<32x16xf32>
    %193 = arith.mulf %182, %192 : vector<32x16xf32>
    %194 = vector.broadcast %176 : vector<32x1xf32> to vector<32x16xf32>
    %195 = arith.addf %193, %194 : vector<32x16xf32>
    %cst_104 = arith.constant 0.000000e+00 : f32
    %196 = vector.broadcast %cst_104 : f32 to vector<32x16xf32>
    %197 = arith.maximumf %195, %196 : vector<32x16xf32>
    %c2_105 = arith.constant 2 : index
    %c0_106 = arith.constant 0 : index
    %c0_107 = arith.constant 0 : index
    %198 = vector.load %arg10[%c2_105, %c0_106, %c0_107] : memref<8x32x32xf32, #tpu.memory_space<vmem>>, vector<1x32x32xf32>
    %199 = vector.shape_cast %198 : vector<1x32x32xf32> to vector<32x32xf32>
    %cst_108 = arith.constant dense<0.000000e+00> : vector<32x16xf32>
    %200 = tpu.matmul %199, %197, %cst_108 {dimension_numbers = #tpu.dot_dimension_numbers<[1], [0], [0], [1], [0, 0, 1, 1], [], []>} : vector<32x32xf32>, vector<32x16xf32>, vector<32x16xf32> -> vector<32x16xf32>
    %c2_109 = arith.constant 2 : index
    %c0_110 = arith.constant 0 : index
    %c0_111 = arith.constant 0 : index
    %201 = vector.load %arg11[%c2_109, %c0_110, %c0_111] : memref<8x32x1xf32, #tpu.memory_space<vmem>>, vector<1x32x1xf32>
    %202 = vector.shape_cast %201 : vector<1x32x1xf32> to vector<32x1xf32>
    %c2_112 = arith.constant 2 : index
    %c0_113 = arith.constant 0 : index
    %c0_114 = arith.constant 0 : index
    %203 = vector.load %arg12[%c2_112, %c0_113, %c0_114] : memref<8x32x1xf32, #tpu.memory_space<vmem>>, vector<1x32x1xf32>
    %204 = vector.shape_cast %203 : vector<1x32x1xf32> to vector<32x1xf32>
    %cst_115 = arith.constant dense<0.000000e+00> : vector<32xf32>
    %205 = vector.multi_reduction <add>, %200, %cst_115 [1] : vector<32x16xf32> to vector<32xf32>
    %206 = vector.shape_cast %205 : vector<32xf32> to vector<32x1xf32>
    %cst_116 = arith.constant 1.600000e+01 : f32
    %207 = vector.broadcast %cst_116 : f32 to vector<32x1xf32>
    %208 = arith.divf %206, %207 : vector<32x1xf32>
    %209 = vector.broadcast %208 : vector<32x1xf32> to vector<32x16xf32>
    %210 = arith.subf %200, %209 : vector<32x16xf32>
    %211 = arith.mulf %210, %210 : vector<32x16xf32>
    %cst_117 = arith.constant dense<0.000000e+00> : vector<32xf32>
    %212 = vector.multi_reduction <add>, %211, %cst_117 [1] : vector<32x16xf32> to vector<32xf32>
    %213 = vector.shape_cast %212 : vector<32xf32> to vector<32x1xf32>
    %cst_118 = arith.constant 1.600000e+01 : f32
    %214 = vector.broadcast %cst_118 : f32 to vector<32x1xf32>
    %215 = arith.divf %213, %214 : vector<32x1xf32>
    %cst_119 = arith.constant 9.99999974E-6 : f32
    %216 = vector.broadcast %cst_119 : f32 to vector<32x1xf32>
    %217 = arith.addf %215, %216 : vector<32x1xf32>
    %218 = math.rsqrt %217 : vector<32x1xf32>
    %219 = arith.mulf %202, %218 : vector<32x1xf32>
    %220 = vector.broadcast %219 : vector<32x1xf32> to vector<32x16xf32>
    %221 = arith.mulf %210, %220 : vector<32x16xf32>
    %222 = vector.broadcast %204 : vector<32x1xf32> to vector<32x16xf32>
    %223 = arith.addf %221, %222 : vector<32x16xf32>
    %cst_120 = arith.constant 0.000000e+00 : f32
    %224 = vector.broadcast %cst_120 : f32 to vector<32x16xf32>
    %225 = arith.maximumf %223, %224 : vector<32x16xf32>
    %226 = arith.addf %169, %225 : vector<32x16xf32>
    %c3 = arith.constant 3 : index
    %c0_121 = arith.constant 0 : index
    %c0_122 = arith.constant 0 : index
    %227 = vector.load %arg7[%c3, %c0_121, %c0_122] : memref<8x32x32xf32, #tpu.memory_space<vmem>>, vector<1x32x32xf32>
    %228 = vector.shape_cast %227 : vector<1x32x32xf32> to vector<32x32xf32>
    %cst_123 = arith.constant dense<0.000000e+00> : vector<32x16xf32>
    %229 = tpu.matmul %228, %226, %cst_123 {dimension_numbers = #tpu.dot_dimension_numbers<[1], [0], [0], [1], [0, 0, 1, 1], [], []>} : vector<32x32xf32>, vector<32x16xf32>, vector<32x16xf32> -> vector<32x16xf32>
    %c3_124 = arith.constant 3 : index
    %c0_125 = arith.constant 0 : index
    %c0_126 = arith.constant 0 : index
    %230 = vector.load %arg8[%c3_124, %c0_125, %c0_126] : memref<8x32x1xf32, #tpu.memory_space<vmem>>, vector<1x32x1xf32>
    %231 = vector.shape_cast %230 : vector<1x32x1xf32> to vector<32x1xf32>
    %c3_127 = arith.constant 3 : index
    %c0_128 = arith.constant 0 : index
    %c0_129 = arith.constant 0 : index
    %232 = vector.load %arg9[%c3_127, %c0_128, %c0_129] : memref<8x32x1xf32, #tpu.memory_space<vmem>>, vector<1x32x1xf32>
    %233 = vector.shape_cast %232 : vector<1x32x1xf32> to vector<32x1xf32>
    %cst_130 = arith.constant dense<0.000000e+00> : vector<32xf32>
    %234 = vector.multi_reduction <add>, %229, %cst_130 [1] : vector<32x16xf32> to vector<32xf32>
    %235 = vector.shape_cast %234 : vector<32xf32> to vector<32x1xf32>
    %cst_131 = arith.constant 1.600000e+01 : f32
    %236 = vector.broadcast %cst_131 : f32 to vector<32x1xf32>
    %237 = arith.divf %235, %236 : vector<32x1xf32>
    %238 = vector.broadcast %237 : vector<32x1xf32> to vector<32x16xf32>
    %239 = arith.subf %229, %238 : vector<32x16xf32>
    %240 = arith.mulf %239, %239 : vector<32x16xf32>
    %cst_132 = arith.constant dense<0.000000e+00> : vector<32xf32>
    %241 = vector.multi_reduction <add>, %240, %cst_132 [1] : vector<32x16xf32> to vector<32xf32>
    %242 = vector.shape_cast %241 : vector<32xf32> to vector<32x1xf32>
    %cst_133 = arith.constant 1.600000e+01 : f32
    %243 = vector.broadcast %cst_133 : f32 to vector<32x1xf32>
    %244 = arith.divf %242, %243 : vector<32x1xf32>
    %cst_134 = arith.constant 9.99999974E-6 : f32
    %245 = vector.broadcast %cst_134 : f32 to vector<32x1xf32>
    %246 = arith.addf %244, %245 : vector<32x1xf32>
    %247 = math.rsqrt %246 : vector<32x1xf32>
    %248 = arith.mulf %231, %247 : vector<32x1xf32>
    %249 = vector.broadcast %248 : vector<32x1xf32> to vector<32x16xf32>
    %250 = arith.mulf %239, %249 : vector<32x16xf32>
    %251 = vector.broadcast %233 : vector<32x1xf32> to vector<32x16xf32>
    %252 = arith.addf %250, %251 : vector<32x16xf32>
    %cst_135 = arith.constant 0.000000e+00 : f32
    %253 = vector.broadcast %cst_135 : f32 to vector<32x16xf32>
    %254 = arith.maximumf %252, %253 : vector<32x16xf32>
    %c3_136 = arith.constant 3 : index
    %c0_137 = arith.constant 0 : index
    %c0_138 = arith.constant 0 : index
    %255 = vector.load %arg10[%c3_136, %c0_137, %c0_138] : memref<8x32x32xf32, #tpu.memory_space<vmem>>, vector<1x32x32xf32>
    %256 = vector.shape_cast %255 : vector<1x32x32xf32> to vector<32x32xf32>
    %cst_139 = arith.constant dense<0.000000e+00> : vector<32x16xf32>
    %257 = tpu.matmul %256, %254, %cst_139 {dimension_numbers = #tpu.dot_dimension_numbers<[1], [0], [0], [1], [0, 0, 1, 1], [], []>} : vector<32x32xf32>, vector<32x16xf32>, vector<32x16xf32> -> vector<32x16xf32>
    %c3_140 = arith.constant 3 : index
    %c0_141 = arith.constant 0 : index
    %c0_142 = arith.constant 0 : index
    %258 = vector.load %arg11[%c3_140, %c0_141, %c0_142] : memref<8x32x1xf32, #tpu.memory_space<vmem>>, vector<1x32x1xf32>
    %259 = vector.shape_cast %258 : vector<1x32x1xf32> to vector<32x1xf32>
    %c3_143 = arith.constant 3 : index
    %c0_144 = arith.constant 0 : index
    %c0_145 = arith.constant 0 : index
    %260 = vector.load %arg12[%c3_143, %c0_144, %c0_145] : memref<8x32x1xf32, #tpu.memory_space<vmem>>, vector<1x32x1xf32>
    %261 = vector.shape_cast %260 : vector<1x32x1xf32> to vector<32x1xf32>
    %cst_146 = arith.constant dense<0.000000e+00> : vector<32xf32>
    %262 = vector.multi_reduction <add>, %257, %cst_146 [1] : vector<32x16xf32> to vector<32xf32>
    %263 = vector.shape_cast %262 : vector<32xf32> to vector<32x1xf32>
    %cst_147 = arith.constant 1.600000e+01 : f32
    %264 = vector.broadcast %cst_147 : f32 to vector<32x1xf32>
    %265 = arith.divf %263, %264 : vector<32x1xf32>
    %266 = vector.broadcast %265 : vector<32x1xf32> to vector<32x16xf32>
    %267 = arith.subf %257, %266 : vector<32x16xf32>
    %268 = arith.mulf %267, %267 : vector<32x16xf32>
    %cst_148 = arith.constant dense<0.000000e+00> : vector<32xf32>
    %269 = vector.multi_reduction <add>, %268, %cst_148 [1] : vector<32x16xf32> to vector<32xf32>
    %270 = vector.shape_cast %269 : vector<32xf32> to vector<32x1xf32>
    %cst_149 = arith.constant 1.600000e+01 : f32
    %271 = vector.broadcast %cst_149 : f32 to vector<32x1xf32>
    %272 = arith.divf %270, %271 : vector<32x1xf32>
    %cst_150 = arith.constant 9.99999974E-6 : f32
    %273 = vector.broadcast %cst_150 : f32 to vector<32x1xf32>
    %274 = arith.addf %272, %273 : vector<32x1xf32>
    %275 = math.rsqrt %274 : vector<32x1xf32>
    %276 = arith.mulf %259, %275 : vector<32x1xf32>
    %277 = vector.broadcast %276 : vector<32x1xf32> to vector<32x16xf32>
    %278 = arith.mulf %267, %277 : vector<32x16xf32>
    %279 = vector.broadcast %261 : vector<32x1xf32> to vector<32x16xf32>
    %280 = arith.addf %278, %279 : vector<32x16xf32>
    %cst_151 = arith.constant 0.000000e+00 : f32
    %281 = vector.broadcast %cst_151 : f32 to vector<32x16xf32>
    %282 = arith.maximumf %280, %281 : vector<32x16xf32>
    %283 = arith.addf %226, %282 : vector<32x16xf32>
    %284 = vector.extract_strided_slice %283 {offsets = [0, 0], sizes = [32, 8], strides = [1, 1]} : vector<32x16xf32> to vector<32x8xf32>
    %285 = vector.extract_strided_slice %283 {offsets = [0, 8], sizes = [32, 8], strides = [1, 1]} : vector<32x16xf32> to vector<32x8xf32>
    %286 = arith.addf %284, %285 : vector<32x8xf32>
    %cst_152 = arith.constant 5.000000e-01 : f32
    %287 = vector.broadcast %cst_152 : f32 to vector<32x8xf32>
    %288 = arith.mulf %286, %287 : vector<32x8xf32>
    %c4 = arith.constant 4 : index
    %c0_153 = arith.constant 0 : index
    %c0_154 = arith.constant 0 : index
    %289 = vector.load %arg7[%c4, %c0_153, %c0_154] : memref<8x32x32xf32, #tpu.memory_space<vmem>>, vector<1x32x32xf32>
    %290 = vector.shape_cast %289 : vector<1x32x32xf32> to vector<32x32xf32>
    %cst_155 = arith.constant dense<0.000000e+00> : vector<32x8xf32>
    %291 = tpu.matmul %290, %288, %cst_155 {dimension_numbers = #tpu.dot_dimension_numbers<[1], [0], [0], [1], [0, 0, 1, 1], [], []>} : vector<32x32xf32>, vector<32x8xf32>, vector<32x8xf32> -> vector<32x8xf32>
    %c4_156 = arith.constant 4 : index
    %c0_157 = arith.constant 0 : index
    %c0_158 = arith.constant 0 : index
    %292 = vector.load %arg8[%c4_156, %c0_157, %c0_158] : memref<8x32x1xf32, #tpu.memory_space<vmem>>, vector<1x32x1xf32>
    %293 = vector.shape_cast %292 : vector<1x32x1xf32> to vector<32x1xf32>
    %c4_159 = arith.constant 4 : index
    %c0_160 = arith.constant 0 : index
    %c0_161 = arith.constant 0 : index
    %294 = vector.load %arg9[%c4_159, %c0_160, %c0_161] : memref<8x32x1xf32, #tpu.memory_space<vmem>>, vector<1x32x1xf32>
    %295 = vector.shape_cast %294 : vector<1x32x1xf32> to vector<32x1xf32>
    %cst_162 = arith.constant dense<0.000000e+00> : vector<32xf32>
    %296 = vector.multi_reduction <add>, %291, %cst_162 [1] : vector<32x8xf32> to vector<32xf32>
    %297 = vector.shape_cast %296 : vector<32xf32> to vector<32x1xf32>
    %cst_163 = arith.constant 8.000000e+00 : f32
    %298 = vector.broadcast %cst_163 : f32 to vector<32x1xf32>
    %299 = arith.divf %297, %298 : vector<32x1xf32>
    %300 = vector.broadcast %299 : vector<32x1xf32> to vector<32x8xf32>
    %301 = arith.subf %291, %300 : vector<32x8xf32>
    %302 = arith.mulf %301, %301 : vector<32x8xf32>
    %cst_164 = arith.constant dense<0.000000e+00> : vector<32xf32>
    %303 = vector.multi_reduction <add>, %302, %cst_164 [1] : vector<32x8xf32> to vector<32xf32>
    %304 = vector.shape_cast %303 : vector<32xf32> to vector<32x1xf32>
    %cst_165 = arith.constant 8.000000e+00 : f32
    %305 = vector.broadcast %cst_165 : f32 to vector<32x1xf32>
    %306 = arith.divf %304, %305 : vector<32x1xf32>
    %cst_166 = arith.constant 9.99999974E-6 : f32
    %307 = vector.broadcast %cst_166 : f32 to vector<32x1xf32>
    %308 = arith.addf %306, %307 : vector<32x1xf32>
    %309 = math.rsqrt %308 : vector<32x1xf32>
    %310 = arith.mulf %293, %309 : vector<32x1xf32>
    %311 = vector.broadcast %310 : vector<32x1xf32> to vector<32x8xf32>
    %312 = arith.mulf %301, %311 : vector<32x8xf32>
    %313 = vector.broadcast %295 : vector<32x1xf32> to vector<32x8xf32>
    %314 = arith.addf %312, %313 : vector<32x8xf32>
    %cst_167 = arith.constant 0.000000e+00 : f32
    %315 = vector.broadcast %cst_167 : f32 to vector<32x8xf32>
    %316 = arith.maximumf %314, %315 : vector<32x8xf32>
    %c4_168 = arith.constant 4 : index
    %c0_169 = arith.constant 0 : index
    %c0_170 = arith.constant 0 : index
    %317 = vector.load %arg10[%c4_168, %c0_169, %c0_170] : memref<8x32x32xf32, #tpu.memory_space<vmem>>, vector<1x32x32xf32>
    %318 = vector.shape_cast %317 : vector<1x32x32xf32> to vector<32x32xf32>
    %cst_171 = arith.constant dense<0.000000e+00> : vector<32x8xf32>
    %319 = tpu.matmul %318, %316, %cst_171 {dimension_numbers = #tpu.dot_dimension_numbers<[1], [0], [0], [1], [0, 0, 1, 1], [], []>} : vector<32x32xf32>, vector<32x8xf32>, vector<32x8xf32> -> vector<32x8xf32>
    %c4_172 = arith.constant 4 : index
    %c0_173 = arith.constant 0 : index
    %c0_174 = arith.constant 0 : index
    %320 = vector.load %arg11[%c4_172, %c0_173, %c0_174] : memref<8x32x1xf32, #tpu.memory_space<vmem>>, vector<1x32x1xf32>
    %321 = vector.shape_cast %320 : vector<1x32x1xf32> to vector<32x1xf32>
    %c4_175 = arith.constant 4 : index
    %c0_176 = arith.constant 0 : index
    %c0_177 = arith.constant 0 : index
    %322 = vector.load %arg12[%c4_175, %c0_176, %c0_177] : memref<8x32x1xf32, #tpu.memory_space<vmem>>, vector<1x32x1xf32>
    %323 = vector.shape_cast %322 : vector<1x32x1xf32> to vector<32x1xf32>
    %cst_178 = arith.constant dense<0.000000e+00> : vector<32xf32>
    %324 = vector.multi_reduction <add>, %319, %cst_178 [1] : vector<32x8xf32> to vector<32xf32>
    %325 = vector.shape_cast %324 : vector<32xf32> to vector<32x1xf32>
    %cst_179 = arith.constant 8.000000e+00 : f32
    %326 = vector.broadcast %cst_179 : f32 to vector<32x1xf32>
    %327 = arith.divf %325, %326 : vector<32x1xf32>
    %328 = vector.broadcast %327 : vector<32x1xf32> to vector<32x8xf32>
    %329 = arith.subf %319, %328 : vector<32x8xf32>
    %330 = arith.mulf %329, %329 : vector<32x8xf32>
    %cst_180 = arith.constant dense<0.000000e+00> : vector<32xf32>
    %331 = vector.multi_reduction <add>, %330, %cst_180 [1] : vector<32x8xf32> to vector<32xf32>
    %332 = vector.shape_cast %331 : vector<32xf32> to vector<32x1xf32>
    %cst_181 = arith.constant 8.000000e+00 : f32
    %333 = vector.broadcast %cst_181 : f32 to vector<32x1xf32>
    %334 = arith.divf %332, %333 : vector<32x1xf32>
    %cst_182 = arith.constant 9.99999974E-6 : f32
    %335 = vector.broadcast %cst_182 : f32 to vector<32x1xf32>
    %336 = arith.addf %334, %335 : vector<32x1xf32>
    %337 = math.rsqrt %336 : vector<32x1xf32>
    %338 = arith.mulf %321, %337 : vector<32x1xf32>
    %339 = vector.broadcast %338 : vector<32x1xf32> to vector<32x8xf32>
    %340 = arith.mulf %329, %339 : vector<32x8xf32>
    %341 = vector.broadcast %323 : vector<32x1xf32> to vector<32x8xf32>
    %342 = arith.addf %340, %341 : vector<32x8xf32>
    %cst_183 = arith.constant 0.000000e+00 : f32
    %343 = vector.broadcast %cst_183 : f32 to vector<32x8xf32>
    %344 = arith.maximumf %342, %343 : vector<32x8xf32>
    %345 = arith.addf %288, %344 : vector<32x8xf32>
    %c5 = arith.constant 5 : index
    %c0_184 = arith.constant 0 : index
    %c0_185 = arith.constant 0 : index
    %346 = vector.load %arg7[%c5, %c0_184, %c0_185] : memref<8x32x32xf32, #tpu.memory_space<vmem>>, vector<1x32x32xf32>
    %347 = vector.shape_cast %346 : vector<1x32x32xf32> to vector<32x32xf32>
    %cst_186 = arith.constant dense<0.000000e+00> : vector<32x8xf32>
    %348 = tpu.matmul %347, %345, %cst_186 {dimension_numbers = #tpu.dot_dimension_numbers<[1], [0], [0], [1], [0, 0, 1, 1], [], []>} : vector<32x32xf32>, vector<32x8xf32>, vector<32x8xf32> -> vector<32x8xf32>
    %c5_187 = arith.constant 5 : index
    %c0_188 = arith.constant 0 : index
    %c0_189 = arith.constant 0 : index
    %349 = vector.load %arg8[%c5_187, %c0_188, %c0_189] : memref<8x32x1xf32, #tpu.memory_space<vmem>>, vector<1x32x1xf32>
    %350 = vector.shape_cast %349 : vector<1x32x1xf32> to vector<32x1xf32>
    %c5_190 = arith.constant 5 : index
    %c0_191 = arith.constant 0 : index
    %c0_192 = arith.constant 0 : index
    %351 = vector.load %arg9[%c5_190, %c0_191, %c0_192] : memref<8x32x1xf32, #tpu.memory_space<vmem>>, vector<1x32x1xf32>
    %352 = vector.shape_cast %351 : vector<1x32x1xf32> to vector<32x1xf32>
    %cst_193 = arith.constant dense<0.000000e+00> : vector<32xf32>
    %353 = vector.multi_reduction <add>, %348, %cst_193 [1] : vector<32x8xf32> to vector<32xf32>
    %354 = vector.shape_cast %353 : vector<32xf32> to vector<32x1xf32>
    %cst_194 = arith.constant 8.000000e+00 : f32
    %355 = vector.broadcast %cst_194 : f32 to vector<32x1xf32>
    %356 = arith.divf %354, %355 : vector<32x1xf32>
    %357 = vector.broadcast %356 : vector<32x1xf32> to vector<32x8xf32>
    %358 = arith.subf %348, %357 : vector<32x8xf32>
    %359 = arith.mulf %358, %358 : vector<32x8xf32>
    %cst_195 = arith.constant dense<0.000000e+00> : vector<32xf32>
    %360 = vector.multi_reduction <add>, %359, %cst_195 [1] : vector<32x8xf32> to vector<32xf32>
    %361 = vector.shape_cast %360 : vector<32xf32> to vector<32x1xf32>
    %cst_196 = arith.constant 8.000000e+00 : f32
    %362 = vector.broadcast %cst_196 : f32 to vector<32x1xf32>
    %363 = arith.divf %361, %362 : vector<32x1xf32>
    %cst_197 = arith.constant 9.99999974E-6 : f32
    %364 = vector.broadcast %cst_197 : f32 to vector<32x1xf32>
    %365 = arith.addf %363, %364 : vector<32x1xf32>
    %366 = math.rsqrt %365 : vector<32x1xf32>
    %367 = arith.mulf %350, %366 : vector<32x1xf32>
    %368 = vector.broadcast %367 : vector<32x1xf32> to vector<32x8xf32>
    %369 = arith.mulf %358, %368 : vector<32x8xf32>
    %370 = vector.broadcast %352 : vector<32x1xf32> to vector<32x8xf32>
    %371 = arith.addf %369, %370 : vector<32x8xf32>
    %cst_198 = arith.constant 0.000000e+00 : f32
    %372 = vector.broadcast %cst_198 : f32 to vector<32x8xf32>
    %373 = arith.maximumf %371, %372 : vector<32x8xf32>
    %c5_199 = arith.constant 5 : index
    %c0_200 = arith.constant 0 : index
    %c0_201 = arith.constant 0 : index
    %374 = vector.load %arg10[%c5_199, %c0_200, %c0_201] : memref<8x32x32xf32, #tpu.memory_space<vmem>>, vector<1x32x32xf32>
    %375 = vector.shape_cast %374 : vector<1x32x32xf32> to vector<32x32xf32>
    %cst_202 = arith.constant dense<0.000000e+00> : vector<32x8xf32>
    %376 = tpu.matmul %375, %373, %cst_202 {dimension_numbers = #tpu.dot_dimension_numbers<[1], [0], [0], [1], [0, 0, 1, 1], [], []>} : vector<32x32xf32>, vector<32x8xf32>, vector<32x8xf32> -> vector<32x8xf32>
    %c5_203 = arith.constant 5 : index
    %c0_204 = arith.constant 0 : index
    %c0_205 = arith.constant 0 : index
    %377 = vector.load %arg11[%c5_203, %c0_204, %c0_205] : memref<8x32x1xf32, #tpu.memory_space<vmem>>, vector<1x32x1xf32>
    %378 = vector.shape_cast %377 : vector<1x32x1xf32> to vector<32x1xf32>
    %c5_206 = arith.constant 5 : index
    %c0_207 = arith.constant 0 : index
    %c0_208 = arith.constant 0 : index
    %379 = vector.load %arg12[%c5_206, %c0_207, %c0_208] : memref<8x32x1xf32, #tpu.memory_space<vmem>>, vector<1x32x1xf32>
    %380 = vector.shape_cast %379 : vector<1x32x1xf32> to vector<32x1xf32>
    %cst_209 = arith.constant dense<0.000000e+00> : vector<32xf32>
    %381 = vector.multi_reduction <add>, %376, %cst_209 [1] : vector<32x8xf32> to vector<32xf32>
    %382 = vector.shape_cast %381 : vector<32xf32> to vector<32x1xf32>
    %cst_210 = arith.constant 8.000000e+00 : f32
    %383 = vector.broadcast %cst_210 : f32 to vector<32x1xf32>
    %384 = arith.divf %382, %383 : vector<32x1xf32>
    %385 = vector.broadcast %384 : vector<32x1xf32> to vector<32x8xf32>
    %386 = arith.subf %376, %385 : vector<32x8xf32>
    %387 = arith.mulf %386, %386 : vector<32x8xf32>
    %cst_211 = arith.constant dense<0.000000e+00> : vector<32xf32>
    %388 = vector.multi_reduction <add>, %387, %cst_211 [1] : vector<32x8xf32> to vector<32xf32>
    %389 = vector.shape_cast %388 : vector<32xf32> to vector<32x1xf32>
    %cst_212 = arith.constant 8.000000e+00 : f32
    %390 = vector.broadcast %cst_212 : f32 to vector<32x1xf32>
    %391 = arith.divf %389, %390 : vector<32x1xf32>
    %cst_213 = arith.constant 9.99999974E-6 : f32
    %392 = vector.broadcast %cst_213 : f32 to vector<32x1xf32>
    %393 = arith.addf %391, %392 : vector<32x1xf32>
    %394 = math.rsqrt %393 : vector<32x1xf32>
    %395 = arith.mulf %378, %394 : vector<32x1xf32>
    %396 = vector.broadcast %395 : vector<32x1xf32> to vector<32x8xf32>
    %397 = arith.mulf %386, %396 : vector<32x8xf32>
    %398 = vector.broadcast %380 : vector<32x1xf32> to vector<32x8xf32>
    %399 = arith.addf %397, %398 : vector<32x8xf32>
    %cst_214 = arith.constant 0.000000e+00 : f32
    %400 = vector.broadcast %cst_214 : f32 to vector<32x8xf32>
    %401 = arith.maximumf %399, %400 : vector<32x8xf32>
    %402 = arith.addf %345, %401 : vector<32x8xf32>
    %403 = vector.extract_strided_slice %402 {offsets = [0, 0], sizes = [32, 4], strides = [1, 1]} : vector<32x8xf32> to vector<32x4xf32>
    %404 = vector.extract_strided_slice %402 {offsets = [0, 4], sizes = [32, 4], strides = [1, 1]} : vector<32x8xf32> to vector<32x4xf32>
    %405 = arith.addf %403, %404 : vector<32x4xf32>
    %cst_215 = arith.constant 5.000000e-01 : f32
    %406 = vector.broadcast %cst_215 : f32 to vector<32x4xf32>
    %407 = arith.mulf %405, %406 : vector<32x4xf32>
    %c6 = arith.constant 6 : index
    %c0_216 = arith.constant 0 : index
    %c0_217 = arith.constant 0 : index
    %408 = vector.load %arg7[%c6, %c0_216, %c0_217] : memref<8x32x32xf32, #tpu.memory_space<vmem>>, vector<1x32x32xf32>
    %409 = vector.shape_cast %408 : vector<1x32x32xf32> to vector<32x32xf32>
    %cst_218 = arith.constant dense<0.000000e+00> : vector<32x4xf32>
    %410 = tpu.matmul %409, %407, %cst_218 {dimension_numbers = #tpu.dot_dimension_numbers<[1], [0], [0], [1], [0, 0, 1, 1], [], []>} : vector<32x32xf32>, vector<32x4xf32>, vector<32x4xf32> -> vector<32x4xf32>
    %c6_219 = arith.constant 6 : index
    %c0_220 = arith.constant 0 : index
    %c0_221 = arith.constant 0 : index
    %411 = vector.load %arg8[%c6_219, %c0_220, %c0_221] : memref<8x32x1xf32, #tpu.memory_space<vmem>>, vector<1x32x1xf32>
    %412 = vector.shape_cast %411 : vector<1x32x1xf32> to vector<32x1xf32>
    %c6_222 = arith.constant 6 : index
    %c0_223 = arith.constant 0 : index
    %c0_224 = arith.constant 0 : index
    %413 = vector.load %arg9[%c6_222, %c0_223, %c0_224] : memref<8x32x1xf32, #tpu.memory_space<vmem>>, vector<1x32x1xf32>
    %414 = vector.shape_cast %413 : vector<1x32x1xf32> to vector<32x1xf32>
    %cst_225 = arith.constant dense<0.000000e+00> : vector<32xf32>
    %415 = vector.multi_reduction <add>, %410, %cst_225 [1] : vector<32x4xf32> to vector<32xf32>
    %416 = vector.shape_cast %415 : vector<32xf32> to vector<32x1xf32>
    %cst_226 = arith.constant 4.000000e+00 : f32
    %417 = vector.broadcast %cst_226 : f32 to vector<32x1xf32>
    %418 = arith.divf %416, %417 : vector<32x1xf32>
    %419 = vector.broadcast %418 : vector<32x1xf32> to vector<32x4xf32>
    %420 = arith.subf %410, %419 : vector<32x4xf32>
    %421 = arith.mulf %420, %420 : vector<32x4xf32>
    %cst_227 = arith.constant dense<0.000000e+00> : vector<32xf32>
    %422 = vector.multi_reduction <add>, %421, %cst_227 [1] : vector<32x4xf32> to vector<32xf32>
    %423 = vector.shape_cast %422 : vector<32xf32> to vector<32x1xf32>
    %cst_228 = arith.constant 4.000000e+00 : f32
    %424 = vector.broadcast %cst_228 : f32 to vector<32x1xf32>
    %425 = arith.divf %423, %424 : vector<32x1xf32>
    %cst_229 = arith.constant 9.99999974E-6 : f32
    %426 = vector.broadcast %cst_229 : f32 to vector<32x1xf32>
    %427 = arith.addf %425, %426 : vector<32x1xf32>
    %428 = math.rsqrt %427 : vector<32x1xf32>
    %429 = arith.mulf %412, %428 : vector<32x1xf32>
    %430 = vector.broadcast %429 : vector<32x1xf32> to vector<32x4xf32>
    %431 = arith.mulf %420, %430 : vector<32x4xf32>
    %432 = vector.broadcast %414 : vector<32x1xf32> to vector<32x4xf32>
    %433 = arith.addf %431, %432 : vector<32x4xf32>
    %cst_230 = arith.constant 0.000000e+00 : f32
    %434 = vector.broadcast %cst_230 : f32 to vector<32x4xf32>
    %435 = arith.maximumf %433, %434 : vector<32x4xf32>
    %c6_231 = arith.constant 6 : index
    %c0_232 = arith.constant 0 : index
    %c0_233 = arith.constant 0 : index
    %436 = vector.load %arg10[%c6_231, %c0_232, %c0_233] : memref<8x32x32xf32, #tpu.memory_space<vmem>>, vector<1x32x32xf32>
    %437 = vector.shape_cast %436 : vector<1x32x32xf32> to vector<32x32xf32>
    %cst_234 = arith.constant dense<0.000000e+00> : vector<32x4xf32>
    %438 = tpu.matmul %437, %435, %cst_234 {dimension_numbers = #tpu.dot_dimension_numbers<[1], [0], [0], [1], [0, 0, 1, 1], [], []>} : vector<32x32xf32>, vector<32x4xf32>, vector<32x4xf32> -> vector<32x4xf32>
    %c6_235 = arith.constant 6 : index
    %c0_236 = arith.constant 0 : index
    %c0_237 = arith.constant 0 : index
    %439 = vector.load %arg11[%c6_235, %c0_236, %c0_237] : memref<8x32x1xf32, #tpu.memory_space<vmem>>, vector<1x32x1xf32>
    %440 = vector.shape_cast %439 : vector<1x32x1xf32> to vector<32x1xf32>
    %c6_238 = arith.constant 6 : index
    %c0_239 = arith.constant 0 : index
    %c0_240 = arith.constant 0 : index
    %441 = vector.load %arg12[%c6_238, %c0_239, %c0_240] : memref<8x32x1xf32, #tpu.memory_space<vmem>>, vector<1x32x1xf32>
    %442 = vector.shape_cast %441 : vector<1x32x1xf32> to vector<32x1xf32>
    %cst_241 = arith.constant dense<0.000000e+00> : vector<32xf32>
    %443 = vector.multi_reduction <add>, %438, %cst_241 [1] : vector<32x4xf32> to vector<32xf32>
    %444 = vector.shape_cast %443 : vector<32xf32> to vector<32x1xf32>
    %cst_242 = arith.constant 4.000000e+00 : f32
    %445 = vector.broadcast %cst_242 : f32 to vector<32x1xf32>
    %446 = arith.divf %444, %445 : vector<32x1xf32>
    %447 = vector.broadcast %446 : vector<32x1xf32> to vector<32x4xf32>
    %448 = arith.subf %438, %447 : vector<32x4xf32>
    %449 = arith.mulf %448, %448 : vector<32x4xf32>
    %cst_243 = arith.constant dense<0.000000e+00> : vector<32xf32>
    %450 = vector.multi_reduction <add>, %449, %cst_243 [1] : vector<32x4xf32> to vector<32xf32>
    %451 = vector.shape_cast %450 : vector<32xf32> to vector<32x1xf32>
    %cst_244 = arith.constant 4.000000e+00 : f32
    %452 = vector.broadcast %cst_244 : f32 to vector<32x1xf32>
    %453 = arith.divf %451, %452 : vector<32x1xf32>
    %cst_245 = arith.constant 9.99999974E-6 : f32
    %454 = vector.broadcast %cst_245 : f32 to vector<32x1xf32>
    %455 = arith.addf %453, %454 : vector<32x1xf32>
    %456 = math.rsqrt %455 : vector<32x1xf32>
    %457 = arith.mulf %440, %456 : vector<32x1xf32>
    %458 = vector.broadcast %457 : vector<32x1xf32> to vector<32x4xf32>
    %459 = arith.mulf %448, %458 : vector<32x4xf32>
    %460 = vector.broadcast %442 : vector<32x1xf32> to vector<32x4xf32>
    %461 = arith.addf %459, %460 : vector<32x4xf32>
    %cst_246 = arith.constant 0.000000e+00 : f32
    %462 = vector.broadcast %cst_246 : f32 to vector<32x4xf32>
    %463 = arith.maximumf %461, %462 : vector<32x4xf32>
    %464 = arith.addf %407, %463 : vector<32x4xf32>
    %c7 = arith.constant 7 : index
    %c0_247 = arith.constant 0 : index
    %c0_248 = arith.constant 0 : index
    %465 = vector.load %arg7[%c7, %c0_247, %c0_248] : memref<8x32x32xf32, #tpu.memory_space<vmem>>, vector<1x32x32xf32>
    %466 = vector.shape_cast %465 : vector<1x32x32xf32> to vector<32x32xf32>
    %cst_249 = arith.constant dense<0.000000e+00> : vector<32x4xf32>
    %467 = tpu.matmul %466, %464, %cst_249 {dimension_numbers = #tpu.dot_dimension_numbers<[1], [0], [0], [1], [0, 0, 1, 1], [], []>} : vector<32x32xf32>, vector<32x4xf32>, vector<32x4xf32> -> vector<32x4xf32>
    %c7_250 = arith.constant 7 : index
    %c0_251 = arith.constant 0 : index
    %c0_252 = arith.constant 0 : index
    %468 = vector.load %arg8[%c7_250, %c0_251, %c0_252] : memref<8x32x1xf32, #tpu.memory_space<vmem>>, vector<1x32x1xf32>
    %469 = vector.shape_cast %468 : vector<1x32x1xf32> to vector<32x1xf32>
    %c7_253 = arith.constant 7 : index
    %c0_254 = arith.constant 0 : index
    %c0_255 = arith.constant 0 : index
    %470 = vector.load %arg9[%c7_253, %c0_254, %c0_255] : memref<8x32x1xf32, #tpu.memory_space<vmem>>, vector<1x32x1xf32>
    %471 = vector.shape_cast %470 : vector<1x32x1xf32> to vector<32x1xf32>
    %cst_256 = arith.constant dense<0.000000e+00> : vector<32xf32>
    %472 = vector.multi_reduction <add>, %467, %cst_256 [1] : vector<32x4xf32> to vector<32xf32>
    %473 = vector.shape_cast %472 : vector<32xf32> to vector<32x1xf32>
    %cst_257 = arith.constant 4.000000e+00 : f32
    %474 = vector.broadcast %cst_257 : f32 to vector<32x1xf32>
    %475 = arith.divf %473, %474 : vector<32x1xf32>
    %476 = vector.broadcast %475 : vector<32x1xf32> to vector<32x4xf32>
    %477 = arith.subf %467, %476 : vector<32x4xf32>
    %478 = arith.mulf %477, %477 : vector<32x4xf32>
    %cst_258 = arith.constant dense<0.000000e+00> : vector<32xf32>
    %479 = vector.multi_reduction <add>, %478, %cst_258 [1] : vector<32x4xf32> to vector<32xf32>
    %480 = vector.shape_cast %479 : vector<32xf32> to vector<32x1xf32>
    %cst_259 = arith.constant 4.000000e+00 : f32
    %481 = vector.broadcast %cst_259 : f32 to vector<32x1xf32>
    %482 = arith.divf %480, %481 : vector<32x1xf32>
    %cst_260 = arith.constant 9.99999974E-6 : f32
    %483 = vector.broadcast %cst_260 : f32 to vector<32x1xf32>
    %484 = arith.addf %482, %483 : vector<32x1xf32>
    %485 = math.rsqrt %484 : vector<32x1xf32>
    %486 = arith.mulf %469, %485 : vector<32x1xf32>
    %487 = vector.broadcast %486 : vector<32x1xf32> to vector<32x4xf32>
    %488 = arith.mulf %477, %487 : vector<32x4xf32>
    %489 = vector.broadcast %471 : vector<32x1xf32> to vector<32x4xf32>
    %490 = arith.addf %488, %489 : vector<32x4xf32>
    %cst_261 = arith.constant 0.000000e+00 : f32
    %491 = vector.broadcast %cst_261 : f32 to vector<32x4xf32>
    %492 = arith.maximumf %490, %491 : vector<32x4xf32>
    %c7_262 = arith.constant 7 : index
    %c0_263 = arith.constant 0 : index
    %c0_264 = arith.constant 0 : index
    %493 = vector.load %arg10[%c7_262, %c0_263, %c0_264] : memref<8x32x32xf32, #tpu.memory_space<vmem>>, vector<1x32x32xf32>
    %494 = vector.shape_cast %493 : vector<1x32x32xf32> to vector<32x32xf32>
    %cst_265 = arith.constant dense<0.000000e+00> : vector<32x4xf32>
    %495 = tpu.matmul %494, %492, %cst_265 {dimension_numbers = #tpu.dot_dimension_numbers<[1], [0], [0], [1], [0, 0, 1, 1], [], []>} : vector<32x32xf32>, vector<32x4xf32>, vector<32x4xf32> -> vector<32x4xf32>
    %c7_266 = arith.constant 7 : index
    %c0_267 = arith.constant 0 : index
    %c0_268 = arith.constant 0 : index
    %496 = vector.load %arg11[%c7_266, %c0_267, %c0_268] : memref<8x32x1xf32, #tpu.memory_space<vmem>>, vector<1x32x1xf32>
    %497 = vector.shape_cast %496 : vector<1x32x1xf32> to vector<32x1xf32>
    %c7_269 = arith.constant 7 : index
    %c0_270 = arith.constant 0 : index
    %c0_271 = arith.constant 0 : index
    %498 = vector.load %arg12[%c7_269, %c0_270, %c0_271] : memref<8x32x1xf32, #tpu.memory_space<vmem>>, vector<1x32x1xf32>
    %499 = vector.shape_cast %498 : vector<1x32x1xf32> to vector<32x1xf32>
    %cst_272 = arith.constant dense<0.000000e+00> : vector<32xf32>
    %500 = vector.multi_reduction <add>, %495, %cst_272 [1] : vector<32x4xf32> to vector<32xf32>
    %501 = vector.shape_cast %500 : vector<32xf32> to vector<32x1xf32>
    %cst_273 = arith.constant 4.000000e+00 : f32
    %502 = vector.broadcast %cst_273 : f32 to vector<32x1xf32>
    %503 = arith.divf %501, %502 : vector<32x1xf32>
    %504 = vector.broadcast %503 : vector<32x1xf32> to vector<32x4xf32>
    %505 = arith.subf %495, %504 : vector<32x4xf32>
    %506 = arith.mulf %505, %505 : vector<32x4xf32>
    %cst_274 = arith.constant dense<0.000000e+00> : vector<32xf32>
    %507 = vector.multi_reduction <add>, %506, %cst_274 [1] : vector<32x4xf32> to vector<32xf32>
    %508 = vector.shape_cast %507 : vector<32xf32> to vector<32x1xf32>
    %cst_275 = arith.constant 4.000000e+00 : f32
    %509 = vector.broadcast %cst_275 : f32 to vector<32x1xf32>
    %510 = arith.divf %508, %509 : vector<32x1xf32>
    %cst_276 = arith.constant 9.99999974E-6 : f32
    %511 = vector.broadcast %cst_276 : f32 to vector<32x1xf32>
    %512 = arith.addf %510, %511 : vector<32x1xf32>
    %513 = math.rsqrt %512 : vector<32x1xf32>
    %514 = arith.mulf %497, %513 : vector<32x1xf32>
    %515 = vector.broadcast %514 : vector<32x1xf32> to vector<32x4xf32>
    %516 = arith.mulf %505, %515 : vector<32x4xf32>
    %517 = vector.broadcast %499 : vector<32x1xf32> to vector<32x4xf32>
    %518 = arith.addf %516, %517 : vector<32x4xf32>
    %cst_277 = arith.constant 0.000000e+00 : f32
    %519 = vector.broadcast %cst_277 : f32 to vector<32x4xf32>
    %520 = arith.maximumf %518, %519 : vector<32x4xf32>
    %521 = arith.addf %464, %520 : vector<32x4xf32>
    %522 = vector.extract_strided_slice %521 {offsets = [0, 0], sizes = [32, 2], strides = [1, 1]} : vector<32x4xf32> to vector<32x2xf32>
    %523 = vector.extract_strided_slice %521 {offsets = [0, 2], sizes = [32, 2], strides = [1, 1]} : vector<32x4xf32> to vector<32x2xf32>
    %524 = arith.addf %522, %523 : vector<32x2xf32>
    %cst_278 = arith.constant 5.000000e-01 : f32
    %525 = vector.broadcast %cst_278 : f32 to vector<32x2xf32>
    %526 = arith.mulf %524, %525 : vector<32x2xf32>
    %c0_279 = arith.constant 0 : index
    %c0_280 = arith.constant 0 : index
    %527 = vector.load %arg13[%c0_279, %c0_280] : memref<3x32xf32, #tpu.memory_space<vmem>>, vector<3x32xf32>
    %cst_281 = arith.constant dense<0.000000e+00> : vector<3x2xf32>
    %528 = tpu.matmul %527, %526, %cst_281 {dimension_numbers = #tpu.dot_dimension_numbers<[1], [0], [0], [1], [0, 0, 1, 1], [], []>} : vector<3x32xf32>, vector<32x2xf32>, vector<3x2xf32> -> vector<3x2xf32>
    %c0_282 = arith.constant 0 : index
    %c0_283 = arith.constant 0 : index
    %529 = vector.load %arg14[%c0_282, %c0_283] : memref<3x1xf32, #tpu.memory_space<vmem>>, vector<3x1xf32>
    %530 = vector.broadcast %529 : vector<3x1xf32> to vector<3x2xf32>
    %531 = arith.addf %528, %530 : vector<3x2xf32>
    %c0_284 = arith.constant 0 : index
    %c0_285 = arith.constant 0 : index
    %532 = vector.load %arg15[%c0_284, %c0_285] : memref<3x2xf32, #tpu.memory_space<vmem>>, vector<3x2xf32>
    tpu.vector_store %arg15[%c0_284, %c0_285], %531 {strides = array<i32>} : memref<3x2xf32, #tpu.memory_space<vmem>>, vector<3x2xf32>,
    return
  }
}

</mosaic_0001>

<bundles_post_ra>
// kernel: tpu_custom_call.1
= control target key start
LH: loop header
LB: loop body
LE: loop exit
PB: predicated region body
PF: predicated region fallthrough
CT: control target
= control target key end

     0   :  { %vm70_vm0 = vcmask 654336   ;;  %vm236_vm1 = vcmask 261120   ;;  %v5431_v45 = vmov 0   ;;  %s5432_s23 = smov 112   ;;  %vm1713_vm2 = vcmask 130048   ;;  %s5433_s30 = smov 120   ;;  %s7025_s0 = inlined_call_operand.vmem [shape: f32[80,32], index: 0, kind: input, shape index: {}]   ;;  %s7026_s1 = inlined_call_operand.vmem [shape: f32[80,80], index: 1, kind: input, shape index: {}]   ;;  %s7027_s3 = inlined_call_operand.vmem [shape: f32[80,1], index: 3, kind: input, shape index: {}]   ;;  %s7028_s2 = inlined_call_operand.vmem [shape: f32[80,1], index: 2, kind: input, shape index: {}]   ;;  %s7029_s4 = inlined_call_operand.vmem [shape: f32[32,80], index: 4, kind: input, shape index: {}]   ;;  %s7030_s6 = inlined_call_operand.vmem [shape: f32[32,1], index: 6, kind: input, shape index: {}]   ;;  %s7031_s5 = inlined_call_operand.vmem [shape: f32[32,1], index: 5, kind: input, shape index: {}]   ;;  %s7032_s7 = inlined_call_operand.vmem [shape: f32[8,32,32], index: 7, kind: input, shape index: {}]   ;;  %s7033_s9 = inlined_call_operand.vmem [shape: f32[8,32,1], index: 9, kind: input, shape index: {}]   ;;  %s7034_s8 = inlined_call_operand.vmem [shape: f32[8,32,1], index: 8, kind: input, shape index: {}]   ;;  %s7035_s10 = inlined_call_operand.vmem [shape: f32[8,32,32], index: 10, kind: input, shape index: {}]   ;;  %s7036_s12 = inlined_call_operand.vmem [shape: f32[8,32,1], index: 12, kind: input, shape index: {}]   ;;  %s7037_s11 = inlined_call_operand.vmem [shape: f32[8,32,1], index: 11, kind: input, shape index: {}]   ;;  %s7038_s14 = inlined_call_operand.vmem [shape: f32[3,1], index: 14, kind: input, shape index: {}]   ;;  %s7039_s13 = inlined_call_operand.vmem [shape: f32[3,32], index: 13, kind: input, shape index: {}]   ;;  %s7040_s15 = inlined_call_operand.vmem [shape: f32[3,2], index: 15, kind: output, shape index: {}]  }
   0x1   :  { %v60_v0 = vld [vmem:[%s7025_s0] sm:$0xff]  ;;  %v61_v1 = vld [vmem:[%s7025_s0 + $0x8] sm:$0xff]  ;;  %v62_v2 = vld [vmem:[%s7025_s0 + $0x10] sm:$0xff]  ;;  %5273 = vset.pattern.permute.xlu1 %v5431_v45  ;;  %5274 = vset.pattern.permute.xlu0 %v5431_v45  ;;  %vm2611_vm3 = vcmask 64512   ;;  %s5434_s20 = smov 124   ;;  %vm3509_vm4 = vcmask 31744  }
   0x2   :  { %v5091_v3 = vpack.c.bf16 %v61_v1, %v60_v0  ;;  %v63_v4 = vld [vmem:[%s7025_s0 + $0x18] sm:$0xff]  ;;  %v64_v6 = vld [vmem:[%s7025_s0 + $0x20] sm:$0xff]  ;;  %v65_v7 = vld [vmem:[%s7025_s0 + $0x28] sm:$0xff]  ;;  %vm5437_vm5 = vmmov 0   ;;  %vm4375_vm6 = vcmask 10240  }
   0x3   :  { %v5095_v5 = vpack.c.bf16 %v63_v4, %v62_v2  ;;  %v50_v8 = vld [vmem:[%s7026_s1] sm:$0xff]  ;;  %v5099_v9 = vpack.c.bf16 %v65_v7, %v64_v6  ;;  %v66_v10 = vld [vmem:[%s7025_s0 + $0x30] sm:$0xff]  ;;  %v67_v11 = vld [vmem:[%s7025_s0 + $0x38] sm:$0xff] }
   0x4   :  { %5092 = vmatprep.subr.bf16.mxu0 %v5091_v3  ;;  %4815 = vmatprep.mubr.msk.f32.mxu0 %vm70_vm0, %v50_v8  ;;  %v5103_v12 = vpack.c.bf16 %v67_v11, %v66_v10  ;;  %v68_v13 = vld [vmem:[%s7025_s0 + $0x40] sm:$0xff]  ;;  %v69_v14 = vld [vmem:[%s7025_s0 + $0x48] sm:$0xff]  ;;  %v52_v17 = vld [vmem:[%s7026_s1 + $0x10] sm:$0xff] }
   0x5   :  { %5094 = vmatpush3.bf16.msra.mxu0 %v5091_v3  ;;  %v5107_v15 = vpack.c.bf16 %v69_v14, %v68_v13  ;;  %v51_v16 = vld [vmem:[%s7026_s1 + $0x8] sm:$0xff]  ;;  %v53_v18 = vld [vmem:[%s7026_s1 + $0x18] sm:$0xff]  ;;  %v54_v19 = vld [vmem:[%s7026_s1 + $0x20] sm:$0xff] }
   0x6   :  { %5096 = vmatprep.subr.bf16.mxu0 %v5095_v5  ;;  %v55_v20 = vld [vmem:[%s7026_s1 + $0x28] sm:$0xff]  ;;  %v56_v21 = vld [vmem:[%s7026_s1 + $0x30] sm:$0xff]  ;;  %v57_v22 = vld [vmem:[%s7026_s1 + $0x38] sm:$0xff] }
   0x7   :  { %v58_v23 = vld [vmem:[%s7026_s1 + $0x40] sm:$0xff]  ;;  %v59_v24 = vld [vmem:[%s7026_s1 + $0x48] sm:$0xff] }
   0x9   :  { %5098 = vmatpush3.bf16.msra.mxu0 %v5095_v5 }
   0xa   :  { %5100 = vmatprep.subr.bf16.mxu0 %v5099_v9 }
   0xd   :  { %5102 = vmatpush3.bf16.msra.mxu0 %v5099_v9 }
   0xe   :  { %5104 = vmatprep.subr.bf16.mxu0 %v5103_v12 }
  0x11   :  { %5106 = vmatpush3.bf16.msra.mxu0 %v5103_v12 }
  0x12   :  { %5108 = vmatprep.subr.bf16.mxu0 %v5107_v15 }
  0x15   :  { %5110 = vmatpush3.bf16.msra.mxu0 %v5107_v15 }
  0x18   :  { %4816 = vmatmul.mubr.msk.f32.vlgmr.msra.gmra.mrb[0].mxu0 %vm70_vm0, %v51_v16 }
  0x19   :  { %4818 = vmatprep.mubr.msk.f32.mxu0 %vm70_vm0, %v52_v17 }
  0x1c   :  { %4819 = vmatmul.mubr.msk.f32.gmra.mrb[2].mxu0 %vm70_vm0, %v53_v18 }
  0x1d   :  { %4821 = vmatprep.mubr.msk.f32.mxu0 %vm70_vm0, %v54_v19 }
  0x20   :  { %4822 = vmatmul.mubr.msk.f32.gmra.mrb[4].mxu0 %vm70_vm0, %v55_v20 }
  0x21   :  { %4824 = vmatprep.mubr.msk.f32.mxu0 %vm70_vm0, %v56_v21 }
  0x24   :  { %4825 = vmatmul.mubr.msk.f32.gmra.mrb[6].mxu0 %vm70_vm0, %v57_v22 }
  0x25   :  { %4827 = vmatprep.mubr.msk.f32.mxu0 %vm70_vm0, %v58_v23 }
  0x28   :  { %4828 = vmatmul.mubr.msk.f32.gmra.mrb[8].mxu0 %vm70_vm0, %v59_v24 }
  0xeb   :  { %v4817_v25 = vpop.f32.mrb[0].mxu0 }
  0xec   :  { %v167_v26 = vpop.f32.mrb[1].mxu0  ;;  %v240_v31 = vsel %vm236_vm1, %v4817_v25, 0.0 }
  0xed   :  { %v237_v27 = vsel %vm236_vm1, %v167_v26, 0.0 }
  0xee   :  { %238 = vadd.xlane.f32.xlu0 %v237_v27 }
  0xef   :  { %v4820_v28 = vpop.f32.mrb[2].mxu0 }
  0xf0   :  { %v246_v29 = vsel %vm236_vm1, %v4820_v28, 0.0  ;;  %v177_v30 = vpop.f32.mrb[3].mxu0 }
  0xf1   :  { %247 = vadd.xlane.f32.xlu1 %v246_v29  ;;  %v243_v32 = vsel %vm236_vm1, %v177_v30, 0.0 }
  0xf2   :  { %241 = vadd.xlane.f32.xlu0 %v240_v31 }
  0xf3   :  { %v4823_v33 = vpop.f32.mrb[4].mxu0 }
  0xf4   :  { %v187_v34 = vpop.f32.mrb[5].mxu0  ;;  %v252_v36 = vsel %vm236_vm1, %v4823_v33, 0.0 }
  0xf5   :  { %244 = vadd.xlane.f32.xlu1 %v243_v32  ;;  %v249_v35 = vsel %vm236_vm1, %v187_v34, 0.0  ;;  %v226_v32 = vld [vmem:[%s7027_s3] sm:$0xff] }
  0xf6   :  { %250 = vadd.xlane.f32.xlu0 %v249_v35  ;;  %v228_v35 = vld [vmem:[%s7027_s3 + $0x10] sm:$0xff] }
  0xf7   :  { %v4826_v37 = vpop.f32.mrb[6].mxu0 }
  0xf8   :  { %v197_v38 = vpop.f32.mrb[7].mxu0  ;;  %v258_v40 = vsel %vm236_vm1, %v4826_v37, 0.0 }
  0xf9   :  { %253 = vadd.xlane.f32.xlu1 %v252_v36  ;;  %v255_v39 = vsel %vm236_vm1, %v197_v38, 0.0  ;;  %v229_v36 = vld [vmem:[%s7027_s3 + $0x18] sm:$0xff] }
  0xfa   :  { %256 = vadd.xlane.f32.xlu0 %v255_v39 }
  0xfb   :  { %v4829_v41 = vpop.f32.mrb[8].mxu0 }
  0xfc   :  { %v207_v42 = vpop.f32.mrb[9].mxu0  ;;  %v264_v44 = vsel %vm236_vm1, %v4829_v41, 0.0 }
  0xfd   :  { %259 = vadd.xlane.f32.xlu1 %v258_v40  ;;  %v261_v43 = vsel %vm236_vm1, %v207_v42, 0.0 }
  0xfe   :  { %262 = vadd.xlane.f32.xlu0 %v261_v43 }
 0x101   :  { %265 = vadd.xlane.f32.xlu1 %v264_v44 }
 0x17b   :  { %v239_v46 = vpop.xlane.xlu0 %238 }
 0x17c   :  { %v268_v47 = vmul.f32 0.03125, %v239_v46 }
 0x17e   :  { %v5599_v48 = vsub.f32 %v167_v26, %v268_v47  ;;  %v248_v49 = vpop.xlane.xlu1 %247 }
 0x17f   :  { %v271_v50 = vmul.f32 0.03125, %v248_v49  ;;  %v242_v51 = vpop.xlane.xlu0 %241 }
 0x180   :  { %v269_v52 = vmul.f32 0.03125, %v242_v51  ;;  %v288_v53 = vmul.f32 %v5599_v48, %v5599_v48 }
 0x181   :  { %v5603_v54 = vsub.f32 %v4820_v28, %v271_v50 }
 0x182   :  { %v5605_v55 = vsub.f32 %v4817_v25, %v269_v52  ;;  %v245_v56 = vpop.xlane.xlu1 %244  ;;  %v298_v57 = vsel %vm236_vm1, %v288_v53, 0.0 }
 0x183   :  { %v270_v58 = vmul.f32 0.03125, %v245_v56  ;;  %v251_v59 = vpop.xlane.xlu0 %250  ;;  %299 = vadd.xlane.f32.xlu0 %v298_v57  ;;  %v291_v2 = vmul.f32 %v5603_v54, %v5603_v54 }
 0x184   :  { %v272_v60 = vmul.f32 0.03125, %v251_v59  ;;  %v289_v61 = vmul.f32 %v5605_v55, %v5605_v55 }
 0x185   :  { %v5610_v62 = vsub.f32 %v177_v30, %v270_v58  ;;  %v307_v12 = vsel %vm236_vm1, %v291_v2, 0.0  ;;  %v216_v58 = vld [vmem:[%s7028_s2] sm:$0xff] }
 0x186   :  { %v5612_v63 = vsub.f32 %v187_v34, %v272_v60  ;;  %v254_v0 = vpop.xlane.xlu1 %253  ;;  %v301_v1 = vsel %vm236_vm1, %v289_v61, 0.0  ;;  %v231_v34 = vld [vmem:[%s7027_s3 + $0x28] sm:$0xff] }
 0x187   :  { %v273_v3 = vmul.f32 0.03125, %v254_v0  ;;  %v257_v4 = vpop.xlane.xlu0 %256  ;;  %302 = vadd.xlane.f32.xlu1 %v301_v1  ;;  %v290_v5 = vmul.f32 %v5610_v62, %v5610_v62 }
 0x188   :  { %v274_v6 = vmul.f32 0.03125, %v257_v4  ;;  %v292_v9 = vmul.f32 %v5612_v63, %v5612_v63 }
 0x189   :  { %v5619_v7 = vsub.f32 %v4823_v33, %v273_v3  ;;  %v304_v8 = vsel %vm236_vm1, %v290_v5, 0.0  ;;  %v227_v33 = vld [vmem:[%s7027_s3 + $0x8] sm:$0xff] }
 0x18a   :  { %v5624_v10 = vsub.f32 %v197_v38, %v274_v6  ;;  %v260_v11 = vpop.xlane.xlu1 %259  ;;  %305 = vadd.xlane.f32.xlu0 %v304_v8  ;;  %v310_v18 = vsel %vm236_vm1, %v292_v9, 0.0  ;;  %v232_v38 = vld [vmem:[%s7027_s3 + $0x30] sm:$0xff]  ;;  %v217_v5 = vld [vmem:[%s7028_s2 + $0x8] sm:$0xff] }
 0x18b   :  { %v275_v13 = vmul.f32 0.03125, %v260_v11  ;;  %308 = vadd.xlane.f32.xlu1 %v307_v12  ;;  %v263_v14 = vpop.xlane.xlu0 %262  ;;  %v293_v15 = vmul.f32 %v5619_v7, %v5619_v7  ;;  %v233_v12 = vld [vmem:[%s7027_s3 + $0x38] sm:$0xff] }
 0x18c   :  { %v276_v16 = vmul.f32 0.03125, %v263_v14  ;;  %v294_v20 = vmul.f32 %v5624_v10, %v5624_v10 }
 0x18d   :  { %v5629_v17 = vsub.f32 %v4826_v37, %v275_v13  ;;  %v313_v19 = vsel %vm236_vm1, %v293_v15, 0.0  ;;  %v230_v37 = vld [vmem:[%s7027_s3 + $0x20] sm:$0xff] }
 0x18e   :  { %v5635_v21 = vsub.f32 %v207_v42, %v276_v16  ;;  %v266_v22 = vpop.xlane.xlu1 %265  ;;  %311 = vadd.xlane.f32.xlu0 %v310_v18  ;;  %v316_v26 = vsel %vm236_vm1, %v294_v20, 0.0  ;;  %v219_v18 = vld [vmem:[%s7028_s2 + $0x18] sm:$0xff] }
 0x18f   :  { %v277_v23 = vmul.f32 0.03125, %v266_v22  ;;  %314 = vadd.xlane.f32.xlu1 %v313_v19  ;;  %v295_v24 = vmul.f32 %v5629_v17, %v5629_v17 }
 0x190   :  { %v296_v28 = vmul.f32 %v5635_v21, %v5635_v21 }
 0x191   :  { %v5639_v25 = vsub.f32 %v4829_v41, %v277_v23  ;;  %v319_v27 = vsel %vm236_vm1, %v295_v24, 0.0 }
 0x192   :  { %317 = vadd.xlane.f32.xlu0 %v316_v26  ;;  %v322_v30 = vsel %vm236_vm1, %v296_v28, 0.0  ;;  %v221_v26 = vld [vmem:[%s7028_s2 + $0x28] sm:$0xff] }
 0x193   :  { %320 = vadd.xlane.f32.xlu1 %v319_v27  ;;  %v297_v29 = vmul.f32 %v5639_v25, %v5639_v25  ;;  %v218_v27 = vld [vmem:[%s7028_s2 + $0x10] sm:$0xff] }
 0x195   :  { %v325_v31 = vsel %vm236_vm1, %v297_v29, 0.0 }
 0x196   :  { %323 = vadd.xlane.f32.xlu0 %v322_v30 }
 0x197   :  { %326 = vadd.xlane.f32.xlu1 %v325_v31 }
 0x1a8   :  { %430 = vperm.xlu1 %5273, %v226_v32   ;;  %v223_v32 = vld [vmem:[%s7028_s2 + $0x38] sm:$0xff] }
 0x1ac   :  { %435 = vperm.xlu1 %5273, %v227_v33   ;;  %455 = vperm.xlu0 %5274, %v231_v34   ;;  %v220_v33 = vld [vmem:[%s7028_s2 + $0x20] sm:$0xff] }
 0x1b0   :  { %440 = vperm.xlu1 %5273, %v228_v35  }
 0x1b4   :  { %445 = vperm.xlu1 %5273, %v229_v36  }
 0x1b8   :  { %450 = vperm.xlu1 %5273, %v230_v37  }
 0x1bc   :  { %460 = vperm.xlu1 %5273, %v232_v38   ;;  %v225_v38 = vld [vmem:[%s7028_s2 + $0x48] sm:$0xff] }
 0x210   :  { %v300_v39 = vpop.xlane.xlu0 %299 }
 0x211   :  { %v328_v40 = vmul.f32 0.03125, %v300_v39  ;;  %v222_v39 = vld [vmem:[%s7028_s2 + $0x30] sm:$0xff] }
 0x213   :  { %v338_v41 = vadd.f32 1e-05, %v328_v40 }
 0x214   :  { %v303_v42 = vpop.xlane.xlu1 %302 }
 0x215   :  { %5275 = vrsqrt.f32 %v338_v41  ;;  %v329_v43 = vmul.f32 0.03125, %v303_v42 }
 0x217   :  { %v339_v44 = vadd.f32 1e-05, %v329_v43  ;;  %v306_v45 = vpop.xlane.xlu0 %305 }
 0x218   :  { %v330_v46 = vmul.f32 0.03125, %v306_v45  ;;  %v309_v47 = vpop.xlane.xlu1 %308  ;;  %v235_v45 = vld [vmem:[%s7027_s3 + $0x48] sm:$0xff] }
 0x219   :  { %5277 = vrsqrt.f32 %v339_v44  ;;  %v331_v49 = vmul.f32 0.03125, %v309_v47  ;;  %v224_v44 = vld [vmem:[%s7028_s2 + $0x40] sm:$0xff] }
 0x21a   :  { %v340_v50 = vadd.f32 1e-05, %v330_v46  ;;  %v234_v47 = vld [vmem:[%s7027_s3 + $0x40] sm:$0xff] }
 0x21b   :  { %v341_v51 = vadd.f32 1e-05, %v331_v49  ;;  %v312_v52 = vpop.xlane.xlu0 %311  ;;  %v498_v49 = vld [vmem:[%s7029_s4] sm:$0xff] }
 0x21c   :  { %v332_v53 = vmul.f32 0.03125, %v312_v52  ;;  %v315_v56 = vpop.xlane.xlu1 %314  ;;  %4850 = vmatprep.mubr.msk.f32.mxu1 %vm70_vm0, %v498_v49 }
 0x21d   :  { %5279 = vrsqrt.f32 %v341_v51  ;;  %v333_v57 = vmul.f32 0.03125, %v315_v56 }
 0x21e   :  { %5281 = vrsqrt.f32 %v340_v50  ;;  %v342_v60 = vadd.f32 1e-05, %v332_v53 }
 0x21f   :  { %v5276_v59 = vpop.eup %5275  ;;  %v343_v61 = vadd.f32 1e-05, %v333_v57  ;;  %v318_v0 = vpop.xlane.xlu0 %317 }
 0x220   :  { %v334_v1 = vmul.f32 0.03125, %v318_v0  ;;  %v321_v2 = vpop.xlane.xlu1 %320  ;;  %v358_v3 = vmul.f32 %v5276_v59, %v216_v58 }
 0x221   :  { %5283 = vrsqrt.f32 %v343_v61  ;;  %v335_v4 = vmul.f32 0.03125, %v321_v2 }
 0x222   :  { %370 = vperm.xlu0 %5274, %v358_v3   ;;  %5285 = vrsqrt.f32 %v342_v60  ;;  %v344_v8 = vadd.f32 1e-05, %v334_v1 }
 0x223   :  { %v5278_v6 = vpop.eup %5277  ;;  %v345_v9 = vadd.f32 1e-05, %v335_v4  ;;  %v324_v11 = vpop.xlane.xlu0 %323 }
 0x224   :  { %v336_v13 = vmul.f32 0.03125, %v324_v11  ;;  %v327_v14 = vpop.xlane.xlu1 %326  ;;  %v359_v15 = vmul.f32 %v5278_v6, %v217_v5 }
 0x225   :  { %5287 = vrsqrt.f32 %v345_v9  ;;  %v337_v16 = vmul.f32 0.03125, %v327_v14 }
 0x226   :  { %375 = vperm.xlu1 %5273, %v359_v15   ;;  %465 = vperm.xlu0 %5274, %v233_v12   ;;  %5289 = vrsqrt.f32 %v344_v8  ;;  %v346_v20 = vadd.f32 1e-05, %v336_v13 }
 0x227   :  { %v5280_v19 = vpop.eup %5279  ;;  %v347_v22 = vadd.f32 1e-05, %v337_v16 }
 0x228   :  { %v361_v23 = vmul.f32 %v5280_v19, %v219_v18  ;;  %v5282_v24 = vpop.eup %5281  ;;  %v431_v50 = vpop.permute.xlu1 %430 }
 0x229   :  { %5291 = vrsqrt.f32 %v347_v22  ;;  %v360_v30 = vmul.f32 %v5282_v24, %v218_v27 }
 0x22a   :  { %385 = vperm.xlu1 %5273, %v361_v23   ;;  %5293 = vrsqrt.f32 %v346_v20 }
 0x22b   :  { %v5284_v28 = vpop.eup %5283  ;;  %v456_v57 = vpop.permute.xlu0 %455 }
 0x22c   :  { %v363_v29 = vmul.f32 %v5284_v28, %v221_v26  ;;  %v5286_v31 = vpop.eup %5285  ;;  %v436_v51 = vpop.permute.xlu1 %435 }
 0x22d   :  { %v362_v36 = vmul.f32 %v5286_v31, %v220_v33 }
 0x22e   :  { %395 = vperm.xlu0 %5274, %v363_v29   ;;  %380 = vperm.xlu1 %5273, %v360_v30  }
 0x22f   :  { %v5288_v34 = vpop.eup %5287 }
 0x230   :  { %v365_v35 = vmul.f32 %v5288_v34, %v223_v32  ;;  %v5290_v37 = vpop.eup %5289  ;;  %v441_v52 = vpop.permute.xlu1 %440 }
 0x231   :  { %v364_v42 = vmul.f32 %v5290_v37, %v222_v39 }
 0x232   :  { %405 = vperm.xlu0 %5274, %v365_v35   ;;  %390 = vperm.xlu1 %5273, %v362_v36  }
 0x233   :  { %v5292_v40 = vpop.eup %5291 }
 0x234   :  { %v367_v41 = vmul.f32 %v5292_v40, %v225_v38  ;;  %v5294_v43 = vpop.eup %5293  ;;  %v446_v53 = vpop.permute.xlu1 %445 }
 0x235   :  { %v366_v46 = vmul.f32 %v5294_v43, %v224_v44 }
 0x236   :  { %415 = vperm.xlu0 %5274, %v367_v41   ;;  %400 = vperm.xlu1 %5273, %v364_v42   ;;  %v499_v42 = vld [vmem:[%s7029_s4 + $0x8] sm:$0xff] }
 0x238   :  { %v451_v56 = vpop.permute.xlu1 %450 }
 0x23a   :  { %475 = vperm.xlu0 %5274, %v235_v45   ;;  %410 = vperm.xlu1 %5273, %v366_v46  }
 0x23c   :  { %v461_v58 = vpop.permute.xlu1 %460 }
 0x23e   :  { %470 = vperm.xlu1 %5273, %v234_v47  }
 0x2a1   :  { %v371_v59 = vpop.permute.xlu0 %370 }
 0x2a2   :  { %v418_v60 = vmul.f32 %v371_v59, %v5599_v48 }
 0x2a4   :  { %v478_v0 = vadd.f32 %v431_v50, %v418_v60 }
 0x2a5   :  { %v376_v61 = vpop.permute.xlu1 %375  ;;  %v466_v3 = vpop.permute.xlu0 %465 }
 0x2a6   :  { %v419_v1 = vmul.f32 %v376_v61, %v5605_v55  ;;  %v488_v6 = vmax.f32 %v478_v0, 0.0 }
 0x2a8   :  { %v479_v2 = vadd.f32 %v436_v51, %v419_v1 }
 0x2a9   :  { %v386_v4 = vpop.permute.xlu1 %385 }
 0x2aa   :  { %v421_v5 = vmul.f32 %v386_v4, %v5603_v54  ;;  %v489_v8 = vmax.f32 %v479_v2, 0.0 }
 0x2ac   :  { %v5111_v9 = vpack.c.bf16 %v489_v8, %v488_v6  ;;  %v481_v11 = vadd.f32 %v446_v53, %v421_v5 }
 0x2ad   :  { %v381_v12 = vpop.permute.xlu1 %380  ;;  %v396_v13 = vpop.permute.xlu0 %395 }
 0x2ae   :  { %v420_v14 = vmul.f32 %v381_v12, %v5610_v62  ;;  %v423_v15 = vmul.f32 %v396_v13, %v5619_v7  ;;  %5112 = vmatprep.subr.bf16.mxu1 %v5111_v9  ;;  %v491_v16 = vmax.f32 %v481_v11, 0.0 }
 0x2af   :  { %5114 = vmatpush3.bf16.msra.mxu1 %v5111_v9 }
 0x2b0   :  { %v480_v48 = vadd.f32 %v441_v52, %v420_v14  ;;  %v483_v20 = vadd.f32 %v456_v57, %v423_v15  ;;  %v603_v14 = vld [vmem:[%s7030_s6] sm:$0xff]  ;;  %v604_v15 = vld [vmem:[%s7030_s6 + $0x8] sm:$0xff] }
 0x2b1   :  { %v391_v55 = vpop.permute.xlu1 %390  ;;  %v406_v18 = vpop.permute.xlu0 %405 }
 0x2b2   :  { %v490_v19 = vmax.f32 %v480_v48, 0.0  ;;  %v422_v54 = vmul.f32 %v391_v55, %v5612_v63  ;;  %v425_v22 = vmul.f32 %v406_v18, %v5629_v17  ;;  %v493_v28 = vmax.f32 %v483_v20, 0.0 }
 0x2b4   :  { %v482_v23 = vadd.f32 %v451_v56, %v422_v54  ;;  %v5115_v24 = vpack.c.bf16 %v491_v16, %v490_v19  ;;  %v485_v29 = vadd.f32 %v466_v3, %v425_v22 }
 0x2b5   :  { %v401_v26 = vpop.permute.xlu1 %400  ;;  %v416_v27 = vpop.permute.xlu0 %415 }
 0x2b6   :  { %v492_v62 = vmax.f32 %v482_v23, 0.0  ;;  %v424_v7 = vmul.f32 %v401_v26, %v5624_v10  ;;  %5116 = vmatprep.subr.bf16.mxu1 %v5115_v24  ;;  %v495_v34 = vmax.f32 %v485_v29, 0.0  ;;  %v427_v63 = vmul.f32 %v416_v27, %v5639_v25  ;;  %v500_v25 = vld [vmem:[%s7029_s4 + $0x10] sm:$0xff] }
 0x2b7   :  { %5118 = vmatpush3.bf16.msra.mxu1 %v5115_v24 }
 0x2b8   :  { %v484_v30 = vadd.f32 %v461_v58, %v424_v7  ;;  %v5119_v31 = vpack.c.bf16 %v493_v28, %v492_v62  ;;  %v600_v28 = vld [vmem:[%s7031_s5 + $0x8] sm:$0xff]  ;;  %v599_v62 = vld [vmem:[%s7031_s5] sm:$0xff] }
 0x2b9   :  { %v411_v32 = vpop.permute.xlu1 %410  ;;  %v476_v33 = vpop.permute.xlu0 %475 }
 0x2ba   :  { %v494_v35 = vmax.f32 %v484_v30, 0.0  ;;  %5120 = vmatprep.subr.bf16.mxu1 %v5119_v31  ;;  %v426_v17 = vmul.f32 %v411_v32, %v5635_v21  ;;  %v487_v36 = vadd.f32 %v476_v33, %v427_v63  ;;  %v501_v21 = vld [vmem:[%s7029_s4 + $0x18] sm:$0xff]  ;;  %v601_v33 = vld [vmem:[%s7031_s5 + $0x10] sm:$0xff] }
 0x2bb   :  { %5122 = vmatpush3.bf16.msra.mxu1 %v5119_v31  ;;  %v602_v32 = vld [vmem:[%s7031_s5 + $0x18] sm:$0xff] }
 0x2bc   :  { %v5123_v37 = vpack.c.bf16 %v495_v34, %v494_v35  ;;  %v497_v10 = vmax.f32 %v487_v36, 0.0  ;;  %v606_v36 = vld [vmem:[%s7030_s6 + $0x18] sm:$0xff] }
 0x2bd   :  { %v471_v38 = vpop.permute.xlu1 %470 }
 0x2be   :  { %v486_v39 = vadd.f32 %v471_v38, %v426_v17  ;;  %5124 = vmatprep.subr.bf16.mxu1 %v5123_v37  ;;  %v711_v38 = vld [vmem:[%s7032_s7] sm:$0xff] }
 0x2bf   :  { %5126 = vmatpush3.bf16.msra.mxu1 %v5123_v37  ;;  %v605_v37 = vld [vmem:[%s7030_s6 + $0x10] sm:$0xff] }
 0x2c0   :  { %v496_v40 = vmax.f32 %v486_v39, 0.0 }
 0x2c2   :  { %v5127_v41 = vpack.c.bf16 %v497_v10, %v496_v40 }
 0x2c4   :  { %5128 = vmatprep.subr.bf16.mxu1 %v5127_v41 }
 0x2c5   :  { %5130 = vmatpush3.bf16.msra.mxu1 %v5127_v41 }
 0x2c8   :  { %4851 = vmatmul.mubr.msk.f32.vlgmr.msra.gmra.mrb[0].mxu1 %vm70_vm0, %v499_v42 }
 0x2c9   :  { %4853 = vmatprep.mubr.msk.f32.mxu1 %vm70_vm0, %v500_v25 }
 0x2cc   :  { %4854 = vmatmul.mubr.msk.f32.gmra.mrb[2].mxu1 %vm70_vm0, %v501_v21 }
 0x2cd   :  { %4864 = vmatprep.mubr.msk.f32.mxu1 %vm236_vm1, %v711_v38 }
 0x39b   :  { %v4852_v43 = vpop.f32.mrb[0].mxu1 }
 0x39c   :  { %v580_v44 = vpop.f32.mrb[1].mxu1  ;;  %v610_v45 = vsel %vm236_vm1, %v4852_v43, 0.0 }
 0x39d   :  { %611 = vadd.xlane.f32.xlu0 %v610_v45  ;;  %v607_v46 = vsel %vm236_vm1, %v580_v44, 0.0 }
 0x39e   :  { %608 = vadd.xlane.f32.xlu1 %v607_v46 }
 0x39f   :  { %v4855_v47 = vpop.f32.mrb[2].mxu1 }
 0x3a0   :  { %v590_v49 = vpop.f32.mrb[3].mxu1  ;;  %v616_v50 = vsel %vm236_vm1, %v4855_v47, 0.0 }
 0x3a1   :  { %v613_v51 = vsel %vm236_vm1, %v590_v49, 0.0 }
 0x3a2   :  { %617 = vadd.xlane.f32.xlu1 %v616_v50  ;;  %614 = vadd.xlane.f32.xlu0 %v613_v51 }
 0x42a   :  { %v612_v52 = vpop.xlane.xlu0 %611 }
 0x42b   :  { %v620_v53 = vmul.f32 0.03125, %v612_v52  ;;  %v609_v56 = vpop.xlane.xlu1 %608 }
 0x42c   :  { %v619_v57 = vmul.f32 0.03125, %v609_v56 }
 0x42d   :  { %v5739_v58 = vsub.f32 %v4852_v43, %v620_v53 }
 0x42e   :  { %v5741_v59 = vsub.f32 %v580_v44, %v619_v57 }
 0x42f   :  { %v618_v60 = vpop.xlane.xlu1 %617  ;;  %v615_v61 = vpop.xlane.xlu0 %614  ;;  %v628_v0 = vmul.f32 %v5739_v58, %v5739_v58 }
 0x430   :  { %v622_v1 = vmul.f32 0.03125, %v618_v60  ;;  %v621_v2 = vmul.f32 0.03125, %v615_v61  ;;  %v627_v3 = vmul.f32 %v5741_v59, %v5741_v59  ;;  %v712_v61 = vld [vmem:[%s7032_s7 + $0x8] sm:$0xff] }
 0x431   :  { %v634_v4 = vsel %vm236_vm1, %v628_v0, 0.0  ;;  %v713_v0 = vld [vmem:[%s7032_s7 + $0x10] sm:$0xff] }
 0x432   :  { %v5748_v5 = vsub.f32 %v4855_v47, %v622_v1  ;;  %v5750_v6 = vsub.f32 %v590_v49, %v621_v2  ;;  %635 = vadd.xlane.f32.xlu1 %v634_v4  ;;  %v631_v8 = vsel %vm236_vm1, %v627_v3, 0.0  ;;  %v714_v1 = vld [vmem:[%s7032_s7 + $0x18] sm:$0xff] }
 0x433   :  { %632 = vadd.xlane.f32.xlu0 %v631_v8 }
 0x434   :  { %v630_v9 = vmul.f32 %v5748_v5, %v5748_v5  ;;  %v629_v11 = vmul.f32 %v5750_v6, %v5750_v6 }
 0x436   :  { %v640_v12 = vsel %vm236_vm1, %v630_v9, 0.0  ;;  %v637_v13 = vsel %vm236_vm1, %v629_v11, 0.0 }
 0x437   :  { %641 = vadd.xlane.f32.xlu1 %v640_v12  ;;  %638 = vadd.xlane.f32.xlu0 %v637_v13 }
 0x448   :  { %685 = vperm.xlu1 %5273, %v603_v14  }
 0x44d   :  { %690 = vperm.xlu0 %5274, %v604_v15  }
 0x4bf   :  { %v636_v48 = vpop.xlane.xlu1 %635 }
 0x4c0   :  { %v644_v16 = vmul.f32 0.03125, %v636_v48  ;;  %v633_v55 = vpop.xlane.xlu0 %632 }
 0x4c1   :  { %v643_v18 = vmul.f32 0.03125, %v633_v55 }
 0x4c2   :  { %v648_v19 = vadd.f32 1e-05, %v644_v16 }
 0x4c3   :  { %v647_v20 = vadd.f32 1e-05, %v643_v18 }
 0x4c4   :  { %5295 = vrsqrt.f32 %v648_v19  ;;  %v642_v54 = vpop.xlane.xlu1 %641  ;;  %v639_v22 = vpop.xlane.xlu0 %638 }
 0x4c5   :  { %5297 = vrsqrt.f32 %v647_v20  ;;  %v646_v23 = vmul.f32 0.03125, %v642_v54  ;;  %v645_v24 = vmul.f32 0.03125, %v639_v22 }
 0x4c7   :  { %v650_v26 = vadd.f32 1e-05, %v646_v23  ;;  %v649_v27 = vadd.f32 1e-05, %v645_v24 }
 0x4c8   :  { %v686_v39 = vpop.permute.xlu1 %685 }
 0x4c9   :  { %5299 = vrsqrt.f32 %v650_v26 }
 0x4ca   :  { %5301 = vrsqrt.f32 %v649_v27 }
 0x4cc   :  { %v691_v10 = vpop.permute.xlu0 %690 }
 0x4ce   :  { %v5296_v29 = vpop.eup %5295 }
 0x4cf   :  { %v5298_v7 = vpop.eup %5297  ;;  %v656_v30 = vmul.f32 %v5296_v29, %v600_v28 }
 0x4d0   :  { %v655_v31 = vmul.f32 %v5298_v7, %v599_v62 }
 0x4d1   :  { %666 = vperm.xlu1 %5273, %v656_v30   ;;  %v816_v30 = vld [vmem:[%s7033_s9] sm:$0xff] }
 0x4d2   :  { %661 = vperm.xlu0 %5274, %v655_v31   ;;  %v817_v31 = vld [vmem:[%s7033_s9 + $0x8] sm:$0xff] }
 0x4d3   :  { %v5300_v34 = vpop.eup %5299 }
 0x4d4   :  { %v5302_v35 = vpop.eup %5301  ;;  %v658_v63 = vmul.f32 %v5300_v34, %v602_v32 }
 0x4d5   :  { %v657_v17 = vmul.f32 %v5302_v35, %v601_v33 }
 0x4d6   :  { %676 = vperm.xlu0 %5274, %v658_v63  }
 0x4d7   :  { %671 = vperm.xlu1 %5273, %v657_v17  }
 0x4da   :  { %700 = vperm.xlu0 %5274, %v606_v36  }
 0x4db   :  { %695 = vperm.xlu1 %5273, %v605_v37  }
 0x550   :  { %v667_v40 = vpop.permute.xlu1 %666 }
 0x551   :  { %v680_v41 = vmul.f32 %v667_v40, %v5739_v58  ;;  %v662_v42 = vpop.permute.xlu0 %661 }
 0x552   :  { %v679_v25 = vmul.f32 %v662_v42, %v5741_v59  ;;  %v812_v42 = vld [vmem:[%s7034_s8] sm:$0xff] }
 0x553   :  { %v5789_v21 = vadd.f32 %v691_v10, %v680_v41  ;;  %v813_v41 = vld [vmem:[%s7034_s8 + $0x8] sm:$0xff] }
 0x554   :  { %v5791_v43 = vadd.f32 %v686_v39, %v679_v25 }
 0x555   :  { %v708_v44 = vmax.f32 %v5789_v21, 0.0  ;;  %v677_v45 = vpop.permute.xlu0 %676 }
 0x556   :  { %v707_v46 = vmax.f32 %v5791_v43, 0.0  ;;  %v672_v47 = vpop.permute.xlu1 %671  ;;  %v682_v49 = vmul.f32 %v677_v45, %v5748_v5 }
 0x557   :  { %v681_v51 = vmul.f32 %v672_v47, %v5750_v6 }
 0x558   :  { %v5131_v50 = vpack.c.bf16 %v708_v44, %v707_v46 }
 0x559   :  { %v701_v52 = vpop.permute.xlu0 %700 }
 0x55a   :  { %v696_v53 = vpop.permute.xlu1 %695  ;;  %v5801_v56 = vadd.f32 %v701_v52, %v682_v49  ;;  %5132 = vmatprep.subr.bf16.mxu1 %v5131_v50 }
 0x55b   :  { %v5803_v57 = vadd.f32 %v696_v53, %v681_v51  ;;  %5134 = vmatpush3.bf16.msra.mxu1 %v5131_v50  ;;  %v815_v50 = vld [vmem:[%s7034_s8 + $0x18] sm:$0xff]  ;;  %v814_v51 = vld [vmem:[%s7034_s8 + $0x10] sm:$0xff] }
 0x55c   :  { %v710_v58 = vmax.f32 %v5801_v56, 0.0  ;;  %v4406_v56 = vld [vmem:[%s7032_s7 + $0x38] sm:$0xff] }
 0x55d   :  { %v709_v59 = vmax.f32 %v5803_v57, 0.0 }
 0x55f   :  { %v5135_v60 = vpack.c.bf16 %v710_v58, %v709_v59 }
 0x561   :  { %5136 = vmatprep.subr.bf16.mxu1 %v5135_v60 }
 0x562   :  { %5138 = vmatpush3.bf16.msra.mxu1 %v5135_v60 }
 0x565   :  { %4865 = vmatmul.mubr.msk.f32.vlgmr.msra.gmra.mrb[4].mxu1 %vm236_vm1, %v712_v61 }
 0x566   :  { %4867 = vmatprep.mubr.msk.f32.mxu1 %vm236_vm1, %v713_v0  ;;  %v819_v0 = vld [vmem:[%s7033_s9 + $0x18] sm:$0xff] }
 0x569   :  { %4868 = vmatmul.mubr.msk.f32.gmra.mrb[6].mxu1 %vm236_vm1, %v714_v1  ;;  %v818_v1 = vld [vmem:[%s7033_s9 + $0x10] sm:$0xff] }
 0x638   :  { %v4866_v2 = vpop.f32.mrb[4].mxu1 }
 0x639   :  { %v793_v3 = vpop.f32.mrb[5].mxu1  ;;  %v823_v4 = vsel %vm236_vm1, %v4866_v2, 0.0 }
 0x63a   :  { %824 = vadd.xlane.f32.xlu0 %v823_v4  ;;  %v820_v5 = vsel %vm236_vm1, %v793_v3, 0.0 }
 0x63b   :  { %821 = vadd.xlane.f32.xlu1 %v820_v5 }
 0x63c   :  { %v4869_v6 = vpop.f32.mrb[6].mxu1 }
 0x63d   :  { %v803_v8 = vpop.f32.mrb[7].mxu1  ;;  %v829_v9 = vsel %vm236_vm1, %v4869_v6, 0.0 }
 0x63e   :  { %v826_v11 = vsel %vm236_vm1, %v803_v8, 0.0 }
 0x63f   :  { %830 = vadd.xlane.f32.xlu1 %v829_v9  ;;  %827 = vadd.xlane.f32.xlu0 %v826_v11 }
 0x6c7   :  { %v825_v12 = vpop.xlane.xlu0 %824 }
 0x6c8   :  { %v833_v13 = vmul.f32 0.03125, %v825_v12  ;;  %v822_v14 = vpop.xlane.xlu1 %821 }
 0x6c9   :  { %v832_v15 = vmul.f32 0.03125, %v822_v14 }
 0x6ca   :  { %v5827_v48 = vsub.f32 %v4866_v2, %v833_v13  ;;  %v924_v2 = vld [vmem:[%s7035_s10] sm:$0xff] }
 0x6cb   :  { %v5829_v16 = vsub.f32 %v793_v3, %v832_v15  ;;  %4878 = vmatprep.mubr.msk.f32.mxu1 %vm236_vm1, %v924_v2 }
 0x6cc   :  { %v831_v55 = vpop.xlane.xlu1 %830  ;;  %v828_v18 = vpop.xlane.xlu0 %827  ;;  %v841_v19 = vmul.f32 %v5827_v48, %v5827_v48 }
 0x6cd   :  { %v835_v20 = vmul.f32 0.03125, %v831_v55  ;;  %v834_v54 = vmul.f32 0.03125, %v828_v18  ;;  %v840_v22 = vmul.f32 %v5829_v16, %v5829_v16 }
 0x6ce   :  { %v847_v23 = vsel %vm236_vm1, %v841_v19, 0.0 }
 0x6cf   :  { %v5836_v24 = vsub.f32 %v4869_v6, %v835_v20  ;;  %v5838_v26 = vsub.f32 %v803_v8, %v834_v54  ;;  %848 = vadd.xlane.f32.xlu1 %v847_v23  ;;  %v844_v27 = vsel %vm236_vm1, %v840_v22, 0.0 }
 0x6d0   :  { %845 = vadd.xlane.f32.xlu0 %v844_v27 }
 0x6d1   :  { %v843_v28 = vmul.f32 %v5836_v24, %v5836_v24  ;;  %v842_v62 = vmul.f32 %v5838_v26, %v5838_v26 }
 0x6d3   :  { %v853_v29 = vsel %vm236_vm1, %v843_v28, 0.0  ;;  %v850_v7 = vsel %vm236_vm1, %v842_v62, 0.0  ;;  %v925_v62 = vld [vmem:[%s7035_s10 + $0x8] sm:$0xff] }
 0x6d4   :  { %854 = vadd.xlane.f32.xlu1 %v853_v29  ;;  %851 = vadd.xlane.f32.xlu0 %v850_v7 }
 0x6e5   :  { %898 = vperm.xlu1 %5273, %v816_v30  }
 0x6ea   :  { %903 = vperm.xlu0 %5274, %v817_v31  }
 0x75c   :  { %v849_v32 = vpop.xlane.xlu1 %848 }
 0x75d   :  { %v857_v33 = vmul.f32 0.03125, %v849_v32  ;;  %v846_v34 = vpop.xlane.xlu0 %845 }
 0x75e   :  { %v856_v35 = vmul.f32 0.03125, %v846_v34 }
 0x75f   :  { %v861_v63 = vadd.f32 1e-05, %v857_v33 }
 0x760   :  { %v860_v17 = vadd.f32 1e-05, %v856_v35 }
 0x761   :  { %5303 = vrsqrt.f32 %v861_v63  ;;  %v855_v36 = vpop.xlane.xlu1 %854  ;;  %v852_v37 = vpop.xlane.xlu0 %851 }
 0x762   :  { %5305 = vrsqrt.f32 %v860_v17  ;;  %v859_v38 = vmul.f32 0.03125, %v855_v36  ;;  %v858_v39 = vmul.f32 0.03125, %v852_v37 }
 0x764   :  { %v863_v10 = vadd.f32 1e-05, %v859_v38  ;;  %v862_v40 = vadd.f32 1e-05, %v858_v39 }
 0x765   :  { %v899_v3 = vpop.permute.xlu1 %898 }
 0x766   :  { %5307 = vrsqrt.f32 %v863_v10 }
 0x767   :  { %5309 = vrsqrt.f32 %v862_v40 }
 0x769   :  { %v904_v4 = vpop.permute.xlu0 %903 }
 0x76b   :  { %v5304_v25 = vpop.eup %5303 }
 0x76c   :  { %v5306_v45 = vpop.eup %5305  ;;  %v869_v47 = vmul.f32 %v5304_v25, %v813_v41 }
 0x76d   :  { %v868_v49 = vmul.f32 %v5306_v45, %v812_v42 }
 0x76e   :  { %879 = vperm.xlu1 %5273, %v869_v47  }
 0x76f   :  { %874 = vperm.xlu0 %5274, %v868_v49  }
 0x770   :  { %v5308_v52 = vpop.eup %5307 }
 0x771   :  { %v5310_v53 = vpop.eup %5309  ;;  %v871_v60 = vmul.f32 %v5308_v52, %v815_v50 }
 0x772   :  { %v870_v61 = vmul.f32 %v5310_v53, %v814_v51 }
 0x773   :  { %889 = vperm.xlu0 %5274, %v871_v60  }
 0x774   :  { %884 = vperm.xlu1 %5273, %v870_v61  }
 0x777   :  { %913 = vperm.xlu0 %5274, %v819_v0   ;;  %v1029_v0 = vld [vmem:[%s7036_s12] sm:$0xff] }
 0x778   :  { %908 = vperm.xlu1 %5273, %v818_v1   ;;  %v1030_v1 = vld [vmem:[%s7036_s12 + $0x8] sm:$0xff] }
 0x7ed   :  { %v880_v5 = vpop.permute.xlu1 %879 }
 0x7ee   :  { %v893_v6 = vmul.f32 %v880_v5, %v5827_v48  ;;  %v875_v8 = vpop.permute.xlu0 %874 }
 0x7ef   :  { %v892_v9 = vmul.f32 %v875_v8, %v5829_v16 }
 0x7f0   :  { %v917_v11 = vadd.f32 %v904_v4, %v893_v6 }
 0x7f1   :  { %v916_v12 = vadd.f32 %v899_v3, %v892_v9 }
 0x7f2   :  { %v921_v13 = vmax.f32 %v917_v11, 0.0  ;;  %v890_v14 = vpop.permute.xlu0 %889 }
 0x7f3   :  { %v920_v15 = vmax.f32 %v916_v12, 0.0  ;;  %v885_v55 = vpop.permute.xlu1 %884  ;;  %v895_v18 = vmul.f32 %v890_v14, %v5836_v24  ;;  %v926_v24 = vld [vmem:[%s7035_s10 + $0x10] sm:$0xff] }
 0x7f4   :  { %v894_v20 = vmul.f32 %v885_v55, %v5838_v26  ;;  %v927_v26 = vld [vmem:[%s7035_s10 + $0x18] sm:$0xff]  ;;  %v1026_v55 = vld [vmem:[%s7037_s11 + $0x8] sm:$0xff] }
 0x7f5   :  { %v5139_v19 = vpack.c.bf16 %v921_v13, %v920_v15 }
 0x7f6   :  { %v914_v54 = vpop.permute.xlu0 %913 }
 0x7f7   :  { %v909_v22 = vpop.permute.xlu1 %908  ;;  %v919_v23 = vadd.f32 %v914_v54, %v895_v18  ;;  %5140 = vmatprep.subr.bf16.mxu1 %v5139_v19  ;;  %v1025_v18 = vld [vmem:[%s7037_s11] sm:$0xff] }
 0x7f8   :  { %v918_v27 = vadd.f32 %v909_v22, %v894_v20  ;;  %5142 = vmatpush3.bf16.msra.mxu1 %v5139_v19 }
 0x7f9   :  { %v923_v48 = vmax.f32 %v919_v23, 0.0  ;;  %v1028_v23 = vld [vmem:[%s7037_s11 + $0x18] sm:$0xff] }
 0x7fa   :  { %v922_v28 = vmax.f32 %v918_v27, 0.0  ;;  %v1027_v27 = vld [vmem:[%s7037_s11 + $0x10] sm:$0xff] }
 0x7fc   :  { %v5143_v16 = vpack.c.bf16 %v923_v48, %v922_v28 }
 0x7fe   :  { %5144 = vmatprep.subr.bf16.mxu1 %v5143_v16 }
 0x7ff   :  { %5146 = vmatpush3.bf16.msra.mxu1 %v5143_v16 }
 0x802   :  { %4879 = vmatmul.mubr.msk.f32.vlgmr.msra.gmra.mrb[8].mxu1 %vm236_vm1, %v925_v62 }
 0x803   :  { %4881 = vmatprep.mubr.msk.f32.mxu1 %vm236_vm1, %v926_v24  ;;  %v1032_v24 = vld [vmem:[%s7036_s12 + $0x18] sm:$0xff] }
 0x806   :  { %4882 = vmatmul.mubr.msk.f32.gmra.mrb[10].mxu1 %vm236_vm1, %v927_v26  ;;  %v1031_v26 = vld [vmem:[%s7036_s12 + $0x10] sm:$0xff] }
 0x8d5   :  { %v4880_v29 = vpop.f32.mrb[8].mxu1 }
 0x8d6   :  { %v1006_v7 = vpop.f32.mrb[9].mxu1  ;;  %v1036_v30 = vsel %vm236_vm1, %v4880_v29, 0.0 }
 0x8d7   :  { %1037 = vadd.xlane.f32.xlu0 %v1036_v30  ;;  %v1033_v31 = vsel %vm236_vm1, %v1006_v7, 0.0 }
 0x8d8   :  { %1034 = vadd.xlane.f32.xlu1 %v1033_v31 }
 0x8d9   :  { %v4883_v32 = vpop.f32.mrb[10].mxu1 }
 0x8da   :  { %v1016_v33 = vpop.f32.mrb[11].mxu1  ;;  %v1042_v34 = vsel %vm236_vm1, %v4883_v32, 0.0 }
 0x8db   :  { %v1039_v35 = vsel %vm236_vm1, %v1016_v33, 0.0 }
 0x8dc   :  { %1043 = vadd.xlane.f32.xlu1 %v1042_v34  ;;  %1040 = vadd.xlane.f32.xlu0 %v1039_v35 }
 0x964   :  { %v1038_v63 = vpop.xlane.xlu0 %1037 }
 0x965   :  { %v1046_v17 = vmul.f32 0.03125, %v1038_v63  ;;  %v1035_v36 = vpop.xlane.xlu1 %1034 }
 0x966   :  { %v1045_v37 = vmul.f32 0.03125, %v1035_v36 }
 0x967   :  { %v5895_v38 = vsub.f32 %v4880_v29, %v1046_v17  ;;  %v4403_v29 = vld [vmem:[%s7032_s7 + $0x20] sm:$0xff] }
 0x968   :  { %v5897_v39 = vsub.f32 %v1006_v7, %v1045_v37  ;;  %4892 = vmatprep.mubr.msk.f32.mxu0 %vm236_vm1, %v4403_v29 }
 0x969   :  { %v1044_v10 = vpop.xlane.xlu1 %1043  ;;  %v1041_v40 = vpop.xlane.xlu0 %1040  ;;  %v1054_v41 = vmul.f32 %v5895_v38, %v5895_v38 }
 0x96a   :  { %v1048_v42 = vmul.f32 0.03125, %v1044_v10  ;;  %v1047_v25 = vmul.f32 0.03125, %v1041_v40  ;;  %v1053_v45 = vmul.f32 %v5897_v39, %v5897_v39 }
 0x96b   :  { %v1060_v47 = vsel %vm236_vm1, %v1054_v41, 0.0 }
 0x96c   :  { %v5904_v49 = vsub.f32 %v4883_v32, %v1048_v42  ;;  %v5906_v50 = vsub.f32 %v1016_v33, %v1047_v25  ;;  %1061 = vadd.xlane.f32.xlu1 %v1060_v47  ;;  %v1057_v51 = vsel %vm236_vm1, %v1053_v45, 0.0 }
 0x96d   :  { %1058 = vadd.xlane.f32.xlu0 %v1057_v51 }
 0x96e   :  { %v1056_v52 = vmul.f32 %v5904_v49, %v5904_v49  ;;  %v1055_v53 = vmul.f32 %v5906_v50, %v5906_v50 }
 0x970   :  { %v1066_v60 = vsel %vm236_vm1, %v1056_v52, 0.0  ;;  %v1063_v61 = vsel %vm236_vm1, %v1055_v53, 0.0 }
 0x971   :  { %1067 = vadd.xlane.f32.xlu1 %v1066_v60  ;;  %1064 = vadd.xlane.f32.xlu0 %v1063_v61 }
 0x982   :  { %1111 = vperm.xlu1 %5273, %v1029_v0  }
 0x987   :  { %1116 = vperm.xlu0 %5274, %v1030_v1  }
 0x9f9   :  { %v1062_v2 = vpop.xlane.xlu1 %1061 }
 0x9fa   :  { %v1070_v3 = vmul.f32 0.03125, %v1062_v2  ;;  %v1059_v4 = vpop.xlane.xlu0 %1058 }
 0x9fb   :  { %v1069_v5 = vmul.f32 0.03125, %v1059_v4 }
 0x9fc   :  { %v1074_v6 = vadd.f32 1e-05, %v1070_v3 }
 0x9fd   :  { %v1073_v8 = vadd.f32 1e-05, %v1069_v5 }
 0x9fe   :  { %5311 = vrsqrt.f32 %v1074_v6  ;;  %v1068_v9 = vpop.xlane.xlu1 %1067  ;;  %v1065_v11 = vpop.xlane.xlu0 %1064 }
 0x9ff   :  { %5313 = vrsqrt.f32 %v1073_v8  ;;  %v1072_v12 = vmul.f32 0.03125, %v1068_v9  ;;  %v1071_v13 = vmul.f32 0.03125, %v1065_v11 }
 0xa01   :  { %v1076_v14 = vadd.f32 1e-05, %v1072_v12  ;;  %v1075_v15 = vadd.f32 1e-05, %v1071_v13 }
 0xa02   :  { %v1112_v7 = vpop.permute.xlu1 %1111 }
 0xa03   :  { %5315 = vrsqrt.f32 %v1076_v14 }
 0xa04   :  { %5317 = vrsqrt.f32 %v1075_v15 }
 0xa06   :  { %v1117_v30 = vpop.permute.xlu0 %1116 }
 0xa08   :  { %v5312_v19 = vpop.eup %5311 }
 0xa09   :  { %v5314_v20 = vpop.eup %5313  ;;  %v1082_v54 = vmul.f32 %v5312_v19, %v1026_v55 }
 0xa0a   :  { %v1081_v22 = vmul.f32 %v5314_v20, %v1025_v18 }
 0xa0b   :  { %1092 = vperm.xlu1 %5273, %v1082_v54  }
 0xa0c   :  { %1087 = vperm.xlu0 %5274, %v1081_v22  }
 0xa0d   :  { %v5316_v48 = vpop.eup %5315 }
 0xa0e   :  { %v5318_v28 = vpop.eup %5317  ;;  %v1084_v16 = vmul.f32 %v5316_v48, %v1028_v23  ;;  %v4415_v48 = vld [vmem:[%s7033_s9 + $0x20] sm:$0xff] }
 0xa0f   :  { %v1083_v62 = vmul.f32 %v5318_v28, %v1027_v27  ;;  %v4416_v28 = vld [vmem:[%s7033_s9 + $0x28] sm:$0xff] }
 0xa10   :  { %1102 = vperm.xlu0 %5274, %v1084_v16  }
 0xa11   :  { %1097 = vperm.xlu1 %5273, %v1083_v62  }
 0xa14   :  { %1126 = vperm.xlu0 %5274, %v1032_v24  }
 0xa15   :  { %1121 = vperm.xlu1 %5273, %v1031_v26  }
 0xa8a   :  { %v1093_v31 = vpop.permute.xlu1 %1092 }
 0xa8b   :  { %v1106_v32 = vmul.f32 %v1093_v31, %v5895_v38  ;;  %v1088_v33 = vpop.permute.xlu0 %1087 }
 0xa8c   :  { %v1105_v34 = vmul.f32 %v1088_v33, %v5897_v39 }
 0xa8d   :  { %v1130_v35 = vadd.f32 %v1117_v30, %v1106_v32 }
 0xa8e   :  { %v1129_v63 = vadd.f32 %v1112_v7, %v1105_v34 }
 0xa8f   :  { %v1134_v17 = vmax.f32 %v1130_v35, 0.0  ;;  %v1103_v36 = vpop.permute.xlu0 %1102 }
 0xa90   :  { %v1133_v37 = vmax.f32 %v1129_v63, 0.0  ;;  %v1098_v10 = vpop.permute.xlu1 %1097  ;;  %v1108_v41 = vmul.f32 %v1103_v36, %v5904_v49  ;;  %v4404_v49 = vld [vmem:[%s7032_s7 + $0x28] sm:$0xff] }
 0xa91   :  { %v5947_v40 = vadd.f32 %v1134_v17, %v708_v44  ;;  %v1107_v38 = vmul.f32 %v1098_v10, %v5906_v50  ;;  %v4405_v50 = vld [vmem:[%s7032_s7 + $0x30] sm:$0xff]  ;;  %v4412_v63 = vld [vmem:[%s7034_s8 + $0x28] sm:$0xff]  ;;  %v4411_v17 = vld [vmem:[%s7034_s8 + $0x20] sm:$0xff] }
 0xa92   :  { %v5952_v42 = vadd.f32 %v1133_v37, %v707_v46 }
 0xa93   :  { %v1127_v25 = vpop.permute.xlu0 %1126 }
 0xa94   :  { %v1122_v39 = vpop.permute.xlu1 %1121  ;;  %v1132_v45 = vadd.f32 %v1127_v25, %v1108_v41  ;;  %v5147_v47 = vpack.c.bf16 %v5947_v40, %v5952_v42  ;;  %v4413_v25 = vld [vmem:[%s7034_s8 + $0x30] sm:$0xff] }
 0xa95   :  { %v1131_v51 = vadd.f32 %v1122_v39, %v1107_v38  ;;  %v4414_v38 = vld [vmem:[%s7034_s8 + $0x38] sm:$0xff] }
 0xa96   :  { %v1136_v52 = vmax.f32 %v1132_v45, 0.0  ;;  %5148 = vmatprep.subr.bf16.mxu0 %v5147_v47 }
 0xa97   :  { %v1135_v21 = vmax.f32 %v1131_v51, 0.0  ;;  %5150 = vmatpush3.bf16.msra.mxu0 %v5147_v47 }
 0xa98   :  { %v5959_v44 = vadd.f32 %v1136_v52, %v710_v58  ;;  %v4418_v52 = vld [vmem:[%s7033_s9 + $0x38] sm:$0xff] }
 0xa99   :  { %v5963_v43 = vadd.f32 %v1135_v21, %v709_v59  ;;  %v4417_v21 = vld [vmem:[%s7033_s9 + $0x30] sm:$0xff] }
 0xa9b   :  { %v5151_v46 = vpack.c.bf16 %v5959_v44, %v5963_v43 }
 0xa9d   :  { %5152 = vmatprep.subr.bf16.mxu0 %v5151_v46 }
 0xa9e   :  { %5154 = vmatpush3.bf16.msra.mxu0 %v5151_v46  ;;  %v4419_v46 = vld [vmem:[%s7035_s10 + $0x20] sm:$0xff] }
 0xa9f   :  { %4906 = vmatprep.mubr.msk.f32.mxu1 %vm236_vm1, %v4419_v46 }
 0xaa1   :  { %4893 = vmatmul.mubr.msk.f32.vlgmr.msra.gmra.mrb[10].mxu0 %vm236_vm1, %v4404_v49 }
 0xaa2   :  { %4895 = vmatprep.mubr.msk.f32.mxu0 %vm236_vm1, %v4405_v50 }
 0xaa5   :  { %4896 = vmatmul.mubr.msk.f32.gmra.mrb[12].mxu0 %vm236_vm1, %v4406_v56 }
 0xb74   :  { %v4894_v57 = vpop.f32.mrb[10].mxu0 }
 0xb75   :  { %v1224_v58 = vpop.f32.mrb[11].mxu0  ;;  %v1256_v59 = vsel %vm236_vm1, %v4894_v57, 0.0 }
 0xb76   :  { %1257 = vadd.xlane.f32.xlu0 %v1256_v59  ;;  %v1253_v53 = vsel %vm236_vm1, %v1224_v58, 0.0 }
 0xb77   :  { %1254 = vadd.xlane.f32.xlu1 %v1253_v53 }
 0xb78   :  { %v4897_v60 = vpop.f32.mrb[12].mxu0 }
 0xb79   :  { %v1234_v61 = vpop.f32.mrb[13].mxu0  ;;  %v1262_v0 = vsel %vm236_vm1, %v4897_v60, 0.0 }
 0xb7a   :  { %v1259_v1 = vsel %vm236_vm1, %v1234_v61, 0.0 }
 0xb7b   :  { %1263 = vadd.xlane.f32.xlu1 %v1262_v0  ;;  %1260 = vadd.xlane.f32.xlu0 %v1259_v1 }
 0xc03   :  { %v1258_v2 = vpop.xlane.xlu0 %1257 }
 0xc04   :  { %v1266_v3 = vmul.f32 0.03125, %v1258_v2  ;;  %v1255_v4 = vpop.xlane.xlu1 %1254 }
 0xc05   :  { %v1265_v5 = vmul.f32 0.03125, %v1255_v4 }
 0xc06   :  { %v5983_v6 = vsub.f32 %v4894_v57, %v1266_v3 }
 0xc07   :  { %v5985_v8 = vsub.f32 %v1224_v58, %v1265_v5 }
 0xc08   :  { %v1264_v9 = vpop.xlane.xlu1 %1263  ;;  %v1261_v11 = vpop.xlane.xlu0 %1260  ;;  %v1274_v12 = vmul.f32 %v5983_v6, %v5983_v6 }
 0xc09   :  { %v1268_v13 = vmul.f32 0.03125, %v1264_v9  ;;  %v1267_v14 = vmul.f32 0.03125, %v1261_v11  ;;  %v1273_v15 = vmul.f32 %v5985_v8, %v5985_v8 }
 0xc0a   :  { %v1280_v55 = vsel %vm236_vm1, %v1274_v12, 0.0 }
 0xc0b   :  { %v5992_v18 = vsub.f32 %v4897_v60, %v1268_v13  ;;  %v5994_v19 = vsub.f32 %v1234_v61, %v1267_v14  ;;  %1281 = vadd.xlane.f32.xlu1 %v1280_v55  ;;  %v1277_v20 = vsel %vm236_vm1, %v1273_v15, 0.0  ;;  %v4420_v15 = vld [vmem:[%s7035_s10 + $0x28] sm:$0xff]  ;;  %v4421_v55 = vld [vmem:[%s7035_s10 + $0x30] sm:$0xff] }
 0xc0c   :  { %1278 = vadd.xlane.f32.xlu0 %v1277_v20 }
 0xc0d   :  { %v1276_v54 = vmul.f32 %v5992_v18, %v5992_v18  ;;  %v1275_v22 = vmul.f32 %v5994_v19, %v5994_v19 }
 0xc0f   :  { %v1286_v23 = vsel %vm236_vm1, %v1276_v54, 0.0  ;;  %v1283_v27 = vsel %vm236_vm1, %v1275_v22, 0.0 }
 0xc10   :  { %1287 = vadd.xlane.f32.xlu1 %v1286_v23  ;;  %1284 = vadd.xlane.f32.xlu0 %v1283_v27 }
 0xc21   :  { %1331 = vperm.xlu1 %5273, %v4415_v48  }
 0xc26   :  { %1336 = vperm.xlu0 %5274, %v4416_v28  }
 0xc98   :  { %v1282_v16 = vpop.xlane.xlu1 %1281 }
 0xc99   :  { %v1290_v62 = vmul.f32 0.03125, %v1282_v16  ;;  %v1279_v24 = vpop.xlane.xlu0 %1278 }
 0xc9a   :  { %v1289_v26 = vmul.f32 0.03125, %v1279_v24 }
 0xc9b   :  { %v1294_v29 = vadd.f32 1e-05, %v1290_v62 }
 0xc9c   :  { %v1293_v7 = vadd.f32 1e-05, %v1289_v26 }
 0xc9d   :  { %5319 = vrsqrt.f32 %v1294_v29  ;;  %v1288_v30 = vpop.xlane.xlu1 %1287  ;;  %v1285_v31 = vpop.xlane.xlu0 %1284 }
 0xc9e   :  { %5321 = vrsqrt.f32 %v1293_v7  ;;  %v1292_v32 = vmul.f32 0.03125, %v1288_v30  ;;  %v1291_v33 = vmul.f32 0.03125, %v1285_v31 }
 0xca0   :  { %v1296_v34 = vadd.f32 1e-05, %v1292_v32  ;;  %v1295_v35 = vadd.f32 1e-05, %v1291_v33 }
 0xca1   :  { %v1332_v49 = vpop.permute.xlu1 %1331 }
 0xca2   :  { %5323 = vrsqrt.f32 %v1296_v34 }
 0xca3   :  { %5325 = vrsqrt.f32 %v1295_v35 }
 0xca5   :  { %v1337_v50 = vpop.permute.xlu0 %1336 }
 0xca7   :  { %v5320_v36 = vpop.eup %5319 }
 0xca8   :  { %v5322_v37 = vpop.eup %5321  ;;  %v1302_v10 = vmul.f32 %v5320_v36, %v4412_v63 }
 0xca9   :  { %v1301_v41 = vmul.f32 %v5322_v37, %v4411_v17 }
 0xcaa   :  { %1312 = vperm.xlu1 %5273, %v1302_v10  }
 0xcab   :  { %1307 = vperm.xlu0 %5274, %v1301_v41  }
 0xcac   :  { %v5324_v39 = vpop.eup %5323 }
 0xcad   :  { %v5326_v45 = vpop.eup %5325  ;;  %v1304_v47 = vmul.f32 %v5324_v39, %v4414_v38  ;;  %v4431_v39 = vld [vmem:[%s7036_s12 + $0x20] sm:$0xff] }
 0xcae   :  { %v1303_v51 = vmul.f32 %v5326_v45, %v4413_v25  ;;  %v4432_v45 = vld [vmem:[%s7036_s12 + $0x28] sm:$0xff] }
 0xcaf   :  { %1322 = vperm.xlu0 %5274, %v1304_v47  }
 0xcb0   :  { %1317 = vperm.xlu1 %5273, %v1303_v51  }
 0xcb3   :  { %1346 = vperm.xlu0 %5274, %v4418_v52  }
 0xcb4   :  { %1341 = vperm.xlu1 %5273, %v4417_v21  }
 0xd29   :  { %v1313_v56 = vpop.permute.xlu1 %1312 }
 0xd2a   :  { %v1326_v57 = vmul.f32 %v1313_v56, %v5983_v6  ;;  %v1308_v58 = vpop.permute.xlu0 %1307 }
 0xd2b   :  { %v1325_v59 = vmul.f32 %v1308_v58, %v5985_v8 }
 0xd2c   :  { %v1350_v53 = vadd.f32 %v1337_v50, %v1326_v57 }
 0xd2d   :  { %v1349_v60 = vadd.f32 %v1332_v49, %v1325_v59 }
 0xd2e   :  { %v1354_v61 = vmax.f32 %v1350_v53, 0.0  ;;  %v1323_v0 = vpop.permute.xlu0 %1322 }
 0xd2f   :  { %v1353_v1 = vmax.f32 %v1349_v60, 0.0  ;;  %v1318_v2 = vpop.permute.xlu1 %1317  ;;  %v1328_v3 = vmul.f32 %v1323_v0, %v5992_v18  ;;  %v4422_v18 = vld [vmem:[%s7035_s10 + $0x38] sm:$0xff]  ;;  %v4428_v60 = vld [vmem:[%s7037_s11 + $0x28] sm:$0xff] }
 0xd30   :  { %v1327_v5 = vmul.f32 %v1318_v2, %v5994_v19 }
 0xd31   :  { %v5155_v4 = vpack.c.bf16 %v1354_v61, %v1353_v1  ;;  %v4427_v61 = vld [vmem:[%s7037_s11 + $0x20] sm:$0xff] }
 0xd32   :  { %v1347_v9 = vpop.permute.xlu0 %1346 }
 0xd33   :  { %v1342_v11 = vpop.permute.xlu1 %1341  ;;  %v1352_v12 = vadd.f32 %v1347_v9, %v1328_v3  ;;  %5156 = vmatprep.subr.bf16.mxu1 %v5155_v4 }
 0xd34   :  { %v1351_v13 = vadd.f32 %v1342_v11, %v1327_v5  ;;  %5158 = vmatpush3.bf16.msra.mxu1 %v5155_v4  ;;  %v4430_v4 = vld [vmem:[%s7037_s11 + $0x38] sm:$0xff]  ;;  %v4429_v5 = vld [vmem:[%s7037_s11 + $0x30] sm:$0xff] }
 0xd35   :  { %v1356_v6 = vmax.f32 %v1352_v12, 0.0 }
 0xd36   :  { %v1355_v14 = vmax.f32 %v1351_v13, 0.0 }
 0xd38   :  { %v5159_v8 = vpack.c.bf16 %v1356_v6, %v1355_v14  ;;  %v4434_v6 = vld [vmem:[%s7036_s12 + $0x38] sm:$0xff]  ;;  %v4433_v14 = vld [vmem:[%s7036_s12 + $0x30] sm:$0xff] }
 0xd3a   :  { %5160 = vmatprep.subr.bf16.mxu1 %v5159_v8 }
 0xd3b   :  { %5162 = vmatpush3.bf16.msra.mxu1 %v5159_v8 }
 0xd3e   :  { %4907 = vmatmul.mubr.msk.f32.vlgmr.msra.gmra.mrb[12].mxu1 %vm236_vm1, %v4420_v15 }
 0xd3f   :  { %4909 = vmatprep.mubr.msk.f32.mxu1 %vm236_vm1, %v4421_v55 }
 0xd42   :  { %4910 = vmatmul.mubr.msk.f32.gmra.mrb[14].mxu1 %vm236_vm1, %v4422_v18 }
 0xe11   :  { %v4908_v19 = vpop.f32.mrb[12].mxu1 }
 0xe12   :  { %v1440_v20 = vpop.f32.mrb[13].mxu1  ;;  %v1472_v54 = vsel %vm236_vm1, %v4908_v19, 0.0 }
 0xe13   :  { %1473 = vadd.xlane.f32.xlu0 %v1472_v54  ;;  %v1469_v22 = vsel %vm236_vm1, %v1440_v20, 0.0 }
 0xe14   :  { %1470 = vadd.xlane.f32.xlu1 %v1469_v22 }
 0xe15   :  { %v4911_v23 = vpop.f32.mrb[14].mxu1 }
 0xe16   :  { %v1450_v27 = vpop.f32.mrb[15].mxu1  ;;  %v1478_v48 = vsel %vm236_vm1, %v4911_v23, 0.0 }
 0xe17   :  { %v1475_v28 = vsel %vm236_vm1, %v1450_v27, 0.0 }
 0xe18   :  { %1479 = vadd.xlane.f32.xlu1 %v1478_v48  ;;  %1476 = vadd.xlane.f32.xlu0 %v1475_v28 }
 0xea0   :  { %v1474_v16 = vpop.xlane.xlu0 %1473 }
 0xea1   :  { %v1482_v62 = vmul.f32 0.03125, %v1474_v16  ;;  %v1471_v24 = vpop.xlane.xlu1 %1470 }
 0xea2   :  { %v1481_v26 = vmul.f32 0.03125, %v1471_v24 }
 0xea3   :  { %v6051_v29 = vsub.f32 %v4908_v19, %v1482_v62 }
 0xea4   :  { %v6053_v7 = vsub.f32 %v1440_v20, %v1481_v26 }
 0xea5   :  { %v1480_v30 = vpop.xlane.xlu1 %1479  ;;  %v1477_v31 = vpop.xlane.xlu0 %1476  ;;  %v1490_v32 = vmul.f32 %v6051_v29, %v6051_v29 }
 0xea6   :  { %v1484_v33 = vmul.f32 0.03125, %v1480_v30  ;;  %v1483_v34 = vmul.f32 0.03125, %v1477_v31  ;;  %v1489_v35 = vmul.f32 %v6053_v7, %v6053_v7 }
 0xea7   :  { %v1496_v63 = vsel %vm236_vm1, %v1490_v32, 0.0  ;;  %v4435_v32 = vld [vmem:[%s7032_s7 + $0x40] sm:$0xff] }
 0xea8   :  { %v6060_v17 = vsub.f32 %v4911_v23, %v1484_v33  ;;  %v6062_v36 = vsub.f32 %v1450_v27, %v1483_v34  ;;  %1497 = vadd.xlane.f32.xlu1 %v1496_v63  ;;  %v1493_v37 = vsel %vm236_vm1, %v1489_v35, 0.0  ;;  %4920 = vmatprep.mubr.msk.f32.mxu0 %vm236_vm1, %v4435_v32  ;;  %v4444_v32 = vld [vmem:[%s7034_s8 + $0x48] sm:$0xff] }
 0xea9   :  { %1494 = vadd.xlane.f32.xlu0 %v1493_v37 }
 0xeaa   :  { %v1492_v10 = vmul.f32 %v6060_v17, %v6060_v17  ;;  %v1491_v41 = vmul.f32 %v6062_v36, %v6062_v36 }
 0xeac   :  { %v1502_v38 = vsel %vm236_vm1, %v1492_v10, 0.0  ;;  %v1499_v25 = vsel %vm236_vm1, %v1491_v41, 0.0 }
 0xead   :  { %1503 = vadd.xlane.f32.xlu1 %v1502_v38  ;;  %1500 = vadd.xlane.f32.xlu0 %v1499_v25 }
 0xebe   :  { %1547 = vperm.xlu1 %5273, %v4431_v39  }
 0xec3   :  { %1552 = vperm.xlu0 %5274, %v4432_v45  }
 0xf35   :  { %v1498_v47 = vpop.xlane.xlu1 %1497 }
 0xf36   :  { %v1506_v51 = vmul.f32 0.03125, %v1498_v47  ;;  %v1495_v52 = vpop.xlane.xlu0 %1494 }
 0xf37   :  { %v1505_v21 = vmul.f32 0.03125, %v1495_v52  ;;  %v4437_v52 = vld [vmem:[%s7032_s7 + $0x50] sm:$0xff] }
 0xf38   :  { %v1510_v46 = vadd.f32 1e-05, %v1506_v51  ;;  %v4436_v51 = vld [vmem:[%s7032_s7 + $0x48] sm:$0xff] }
 0xf39   :  { %v1509_v49 = vadd.f32 1e-05, %v1505_v21  ;;  %v4438_v21 = vld [vmem:[%s7032_s7 + $0x58] sm:$0xff] }
 0xf3a   :  { %5327 = vrsqrt.f32 %v1510_v46  ;;  %v1504_v50 = vpop.xlane.xlu1 %1503  ;;  %v1501_v56 = vpop.xlane.xlu0 %1500 }
 0xf3b   :  { %5329 = vrsqrt.f32 %v1509_v49  ;;  %v1508_v57 = vmul.f32 0.03125, %v1504_v50  ;;  %v1507_v58 = vmul.f32 0.03125, %v1501_v56 }
 0xf3d   :  { %v1512_v59 = vadd.f32 1e-05, %v1508_v57  ;;  %v1511_v53 = vadd.f32 1e-05, %v1507_v58 }
 0xf3e   :  { %v1548_v8 = vpop.permute.xlu1 %1547 }
 0xf3f   :  { %5331 = vrsqrt.f32 %v1512_v59 }
 0xf40   :  { %5333 = vrsqrt.f32 %v1511_v53 }
 0xf42   :  { %v1553_v15 = vpop.permute.xlu0 %1552 }
 0xf44   :  { %v5328_v0 = vpop.eup %5327 }
 0xf45   :  { %v5330_v1 = vpop.eup %5329  ;;  %v1518_v2 = vmul.f32 %v5328_v0, %v4428_v60 }
 0xf46   :  { %v1517_v3 = vmul.f32 %v5330_v1, %v4427_v61 }
 0xf47   :  { %1528 = vperm.xlu1 %5273, %v1518_v2  }
 0xf48   :  { %1523 = vperm.xlu0 %5274, %v1517_v3  }
 0xf49   :  { %v5332_v9 = vpop.eup %5331 }
 0xf4a   :  { %v5334_v11 = vpop.eup %5333  ;;  %v1520_v12 = vmul.f32 %v5332_v9, %v4430_v4 }
 0xf4b   :  { %v1519_v13 = vmul.f32 %v5334_v11, %v4429_v5 }
 0xf4c   :  { %1538 = vperm.xlu0 %5274, %v1520_v12  }
 0xf4d   :  { %1533 = vperm.xlu1 %5273, %v1519_v13  }
 0xf50   :  { %1562 = vperm.xlu0 %5274, %v4434_v6  }
 0xf51   :  { %1557 = vperm.xlu1 %5273, %v4433_v14  }
 0xfc6   :  { %v1529_v55 = vpop.permute.xlu1 %1528 }
 0xfc7   :  { %v1542_v18 = vmul.f32 %v1529_v55, %v6051_v29  ;;  %v1524_v19 = vpop.permute.xlu0 %1523 }
 0xfc8   :  { %v1541_v20 = vmul.f32 %v1524_v19, %v6053_v7 }
 0xfc9   :  { %v1566_v54 = vadd.f32 %v1553_v15, %v1542_v18 }
 0xfca   :  { %v1565_v22 = vadd.f32 %v1548_v8, %v1541_v20 }
 0xfcb   :  { %v1570_v23 = vmax.f32 %v1566_v54, 0.0  ;;  %v1539_v27 = vpop.permute.xlu0 %1538  ;;  %v4447_v54 = vld [vmem:[%s7033_s9 + $0x40] sm:$0xff] }
 0xfcc   :  { %v1569_v48 = vmax.f32 %v1565_v22, 0.0  ;;  %v1534_v28 = vpop.permute.xlu1 %1533  ;;  %v1544_v24 = vmul.f32 %v1539_v27, %v6060_v17  ;;  %v4448_v22 = vld [vmem:[%s7033_s9 + $0x48] sm:$0xff] }
 0xfcd   :  { %v1574_v16 = vadd.f32 %v1570_v23, %v5947_v40  ;;  %v1543_v26 = vmul.f32 %v1534_v28, %v6062_v36 }
 0xfce   :  { %v1573_v62 = vadd.f32 %v1569_v48, %v5952_v42 }
 0xfcf   :  { %1583 = vrot.lane.b32.xlu0 %v1574_v16, %s5432_s23  ;;  %v1563_v29 = vpop.permute.xlu0 %1562 }
 0xfd0   :  { %v1558_v30 = vpop.permute.xlu1 %1557  ;;  %v1568_v31 = vadd.f32 %v1563_v29, %v1544_v24  ;;  %1581 = vrot.lane.b32.xlu1 %v1573_v62, %s5432_s23 }
 0xfd1   :  { %v1567_v7 = vadd.f32 %v1558_v30, %v1543_v26 }
 0xfd2   :  { %v1572_v33 = vmax.f32 %v1568_v31, 0.0 }
 0xfd3   :  { %v1571_v40 = vmax.f32 %v1567_v7, 0.0 }
 0xfd4   :  { %v1576_v42 = vadd.f32 %v1572_v33, %v5959_v44  ;;  %v4443_v33 = vld [vmem:[%s7034_s8 + $0x40] sm:$0xff] }
 0xfd5   :  { %v1575_v34 = vadd.f32 %v1571_v40, %v5963_v43 }
 0xfd6   :  { %1587 = vrot.lane.b32.xlu0 %v1576_v42, %s5432_s23 }
 0xfd7   :  { %1585 = vrot.lane.b32.xlu1 %v1575_v34, %s5432_s23 }
0x1041   :  { %v1584_v35 = vpop.permute.xlu0 %1583 }
0x1042   :  { %v1594_v63 = vadd.f32 %v1584_v35, %v1574_v16  ;;  %v1582_v17 = vpop.permute.xlu1 %1581 }
0x1043   :  { %v1593_v36 = vadd.f32 %v1582_v17, %v1573_v62  ;;  %v4445_v17 = vld [vmem:[%s7034_s8 + $0x50] sm:$0xff] }
0x1044   :  { %v6107_v37 = vmul.f32 0.5, %v1594_v63  ;;  %v4446_v63 = vld [vmem:[%s7034_s8 + $0x58] sm:$0xff] }
0x1045   :  { %v6109_v10 = vmul.f32 0.5, %v1593_v36 }
0x1047   :  { %v5163_v41 = vpack.c.bf16 %v6107_v37, %v6109_v10 }
0x1048   :  { %v1588_v38 = vpop.permute.xlu0 %1587 }
0x1049   :  { %v1586_v25 = vpop.permute.xlu1 %1585  ;;  %v1596_v39 = vadd.f32 %v1588_v38, %v1576_v42  ;;  %5164 = vmatprep.subr.bf16.mxu0 %v5163_v41 }
0x104a   :  { %v1595_v44 = vadd.f32 %v1586_v25, %v1575_v34  ;;  %5166 = vmatpush3.bf16.msra.mxu0 %v5163_v41 }
0x104b   :  { %v6113_v43 = vmul.f32 0.5, %v1596_v39  ;;  %v4450_v39 = vld [vmem:[%s7033_s9 + $0x58] sm:$0xff] }
0x104c   :  { %v6115_v45 = vmul.f32 0.5, %v1595_v44  ;;  %v4449_v44 = vld [vmem:[%s7033_s9 + $0x50] sm:$0xff] }
0x104e   :  { %v5167_v47 = vpack.c.bf16 %v6113_v43, %v6115_v45 }
0x1050   :  { %5168 = vmatprep.subr.bf16.mxu0 %v5167_v47 }
0x1051   :  { %5170 = vmatpush3.bf16.msra.mxu0 %v5167_v47  ;;  %v4451_v47 = vld [vmem:[%s7035_s10 + $0x40] sm:$0xff] }
0x1052   :  { %4934 = vmatprep.mubr.msk.f32.mxu1 %vm236_vm1, %v4451_v47 }
0x1054   :  { %4921 = vmatmul.mubr.msk.f32.vlgmr.msra.gmra.mrb[14].mxu0 %vm236_vm1, %v4436_v51 }
0x1055   :  { %4923 = vmatprep.mubr.msk.f32.mxu0 %vm236_vm1, %v4437_v52 }
0x1058   :  { %4924 = vmatmul.mubr.msk.f32.gmra.mrb[16].mxu0 %vm236_vm1, %v4438_v21 }
0x1127   :  { %v4922_v46 = vpop.f32.mrb[14].mxu0 }
0x1128   :  { %v1684_v49 = vpop.f32.mrb[15].mxu0  ;;  %v1717_v50 = vsel %vm1713_vm2, %v4922_v46, 0.0 }
0x1129   :  { %1718 = vadd.xlane.f32.xlu0 %v1717_v50  ;;  %v1714_v56 = vsel %vm1713_vm2, %v1684_v49, 0.0 }
0x112a   :  { %1715 = vadd.xlane.f32.xlu1 %v1714_v56 }
0x112b   :  { %v4925_v57 = vpop.f32.mrb[16].mxu0 }
0x112c   :  { %v1694_v58 = vpop.f32.mrb[17].mxu0  ;;  %v1723_v59 = vsel %vm1713_vm2, %v4925_v57, 0.0 }
0x112d   :  { %v1720_v53 = vsel %vm1713_vm2, %v1694_v58, 0.0 }
0x112e   :  { %1724 = vadd.xlane.f32.xlu1 %v1723_v59  ;;  %1721 = vadd.xlane.f32.xlu0 %v1720_v53 }
0x11b6   :  { %v1719_v60 = vpop.xlane.xlu0 %1718 }
0x11b7   :  { %v1728_v61 = vmul.f32 0.0625, %v1719_v60  ;;  %v1716_v0 = vpop.xlane.xlu1 %1715 }
0x11b8   :  { %v1727_v1 = vmul.f32 0.0625, %v1716_v0 }
0x11b9   :  { %v6135_v2 = vsub.f32 %v4922_v46, %v1728_v61 }
0x11ba   :  { %v6137_v3 = vsub.f32 %v1684_v49, %v1727_v1 }
0x11bb   :  { %v1725_v4 = vpop.xlane.xlu1 %1724  ;;  %v1722_v5 = vpop.xlane.xlu0 %1721  ;;  %v1736_v9 = vmul.f32 %v6135_v2, %v6135_v2 }
0x11bc   :  { %v1730_v11 = vmul.f32 0.0625, %v1725_v4  ;;  %v1729_v12 = vmul.f32 0.0625, %v1722_v5  ;;  %v1735_v13 = vmul.f32 %v6137_v3, %v6137_v3 }
0x11bd   :  { %v1742_v6 = vsel %vm1713_vm2, %v1736_v9, 0.0 }
0x11be   :  { %v6144_v14 = vsub.f32 %v4925_v57, %v1730_v11  ;;  %v6146_v8 = vsub.f32 %v1694_v58, %v1729_v12  ;;  %1743 = vadd.xlane.f32.xlu1 %v1742_v6  ;;  %v1739_v15 = vsel %vm1713_vm2, %v1735_v13, 0.0  ;;  %v4452_v13 = vld [vmem:[%s7035_s10 + $0x48] sm:$0xff]  ;;  %v4453_v6 = vld [vmem:[%s7035_s10 + $0x50] sm:$0xff] }
0x11bf   :  { %1740 = vadd.xlane.f32.xlu0 %v1739_v15 }
0x11c0   :  { %v1738_v55 = vmul.f32 %v6144_v14, %v6144_v14  ;;  %v1737_v18 = vmul.f32 %v6146_v8, %v6146_v8 }
0x11c2   :  { %v1748_v19 = vsel %vm1713_vm2, %v1738_v55, 0.0  ;;  %v1745_v20 = vsel %vm1713_vm2, %v1737_v18, 0.0 }
0x11c3   :  { %1749 = vadd.xlane.f32.xlu1 %v1748_v19  ;;  %1746 = vadd.xlane.f32.xlu0 %v1745_v20 }
0x11d4   :  { %1793 = vperm.xlu1 %5273, %v4447_v54  }
0x11d9   :  { %1798 = vperm.xlu0 %5274, %v4448_v22  }
0x124b   :  { %v1744_v23 = vpop.xlane.xlu1 %1743 }
0x124c   :  { %v1752_v27 = vmul.f32 0.0625, %v1744_v23  ;;  %v1741_v48 = vpop.xlane.xlu0 %1740 }
0x124d   :  { %v1751_v28 = vmul.f32 0.0625, %v1741_v48 }
0x124e   :  { %v1756_v16 = vadd.f32 1e-05, %v1752_v27 }
0x124f   :  { %v1755_v62 = vadd.f32 1e-05, %v1751_v28 }
0x1250   :  { %5335 = vrsqrt.f32 %v1756_v16  ;;  %v1750_v24 = vpop.xlane.xlu1 %1749  ;;  %v1747_v26 = vpop.xlane.xlu0 %1746 }
0x1251   :  { %5337 = vrsqrt.f32 %v1755_v62  ;;  %v1754_v29 = vmul.f32 0.0625, %v1750_v24  ;;  %v1753_v30 = vmul.f32 0.0625, %v1747_v26 }
0x1253   :  { %v1758_v31 = vadd.f32 1e-05, %v1754_v29  ;;  %v1757_v7 = vadd.f32 1e-05, %v1753_v30 }
0x1254   :  { %v1794_v51 = vpop.permute.xlu1 %1793 }
0x1255   :  { %5339 = vrsqrt.f32 %v1758_v31 }
0x1256   :  { %5341 = vrsqrt.f32 %v1757_v7 }
0x1258   :  { %v1799_v52 = vpop.permute.xlu0 %1798 }
0x125a   :  { %v5336_v40 = vpop.eup %5335 }
0x125b   :  { %v5338_v42 = vpop.eup %5337  ;;  %v1764_v34 = vmul.f32 %v5336_v40, %v4444_v32 }
0x125c   :  { %v1763_v35 = vmul.f32 %v5338_v42, %v4443_v33 }
0x125d   :  { %1774 = vperm.xlu1 %5273, %v1764_v34  }
0x125e   :  { %1769 = vperm.xlu0 %5274, %v1763_v35  }
0x125f   :  { %v5340_v36 = vpop.eup %5339 }
0x1260   :  { %v5342_v41 = vpop.eup %5341  ;;  %v1766_v38 = vmul.f32 %v5340_v36, %v4446_v63  ;;  %v4463_v36 = vld [vmem:[%s7036_s12 + $0x40] sm:$0xff] }
0x1261   :  { %v1765_v25 = vmul.f32 %v5342_v41, %v4445_v17  ;;  %v4464_v41 = vld [vmem:[%s7036_s12 + $0x48] sm:$0xff] }
0x1262   :  { %1784 = vperm.xlu0 %5274, %v1766_v38  }
0x1263   :  { %1779 = vperm.xlu1 %5273, %v1765_v25  }
0x1266   :  { %1808 = vperm.xlu0 %5274, %v4450_v39  }
0x1267   :  { %1803 = vperm.xlu1 %5273, %v4449_v44  }
0x12dc   :  { %v1775_v21 = vpop.permute.xlu1 %1774 }
0x12dd   :  { %v1788_v46 = vmul.f32 %v1775_v21, %v6135_v2  ;;  %v1770_v49 = vpop.permute.xlu0 %1769 }
0x12de   :  { %v1787_v50 = vmul.f32 %v1770_v49, %v6137_v3 }
0x12df   :  { %v1812_v56 = vadd.f32 %v1799_v52, %v1788_v46 }
0x12e0   :  { %v1811_v57 = vadd.f32 %v1794_v51, %v1787_v50 }
0x12e1   :  { %v1816_v58 = vmax.f32 %v1812_v56, 0.0  ;;  %v1785_v59 = vpop.permute.xlu0 %1784 }
0x12e2   :  { %v1815_v53 = vmax.f32 %v1811_v57, 0.0  ;;  %v1780_v60 = vpop.permute.xlu1 %1779  ;;  %v1790_v61 = vmul.f32 %v1785_v59, %v6144_v14  ;;  %v4454_v14 = vld [vmem:[%s7035_s10 + $0x58] sm:$0xff]  ;;  %v4460_v57 = vld [vmem:[%s7037_s11 + $0x48] sm:$0xff] }
0x12e3   :  { %v1789_v1 = vmul.f32 %v1780_v60, %v6146_v8 }
0x12e4   :  { %v5171_v0 = vpack.c.bf16 %v1816_v58, %v1815_v53  ;;  %v4459_v58 = vld [vmem:[%s7037_s11 + $0x40] sm:$0xff] }
0x12e5   :  { %v1809_v4 = vpop.permute.xlu0 %1808 }
0x12e6   :  { %v1804_v5 = vpop.permute.xlu1 %1803  ;;  %v1814_v9 = vadd.f32 %v1809_v4, %v1790_v61  ;;  %5172 = vmatprep.subr.bf16.mxu1 %v5171_v0 }
0x12e7   :  { %v1813_v11 = vadd.f32 %v1804_v5, %v1789_v1  ;;  %5174 = vmatpush3.bf16.msra.mxu1 %v5171_v0  ;;  %v4462_v0 = vld [vmem:[%s7037_s11 + $0x58] sm:$0xff]  ;;  %v4461_v1 = vld [vmem:[%s7037_s11 + $0x50] sm:$0xff] }
0x12e8   :  { %v1818_v2 = vmax.f32 %v1814_v9, 0.0 }
0x12e9   :  { %v1817_v12 = vmax.f32 %v1813_v11, 0.0 }
0x12eb   :  { %v5175_v3 = vpack.c.bf16 %v1818_v2, %v1817_v12  ;;  %v4466_v2 = vld [vmem:[%s7036_s12 + $0x58] sm:$0xff]  ;;  %v4465_v12 = vld [vmem:[%s7036_s12 + $0x50] sm:$0xff] }
0x12ed   :  { %5176 = vmatprep.subr.bf16.mxu1 %v5175_v3 }
0x12ee   :  { %5178 = vmatpush3.bf16.msra.mxu1 %v5175_v3  ;;  %v4467_v3 = vld [vmem:[%s7032_s7 + $0x60] sm:$0xff] }
0x12ef   :  { %4948 = vmatprep.mubr.msk.f32.mxu0 %vm236_vm1, %v4467_v3 }
0x12f1   :  { %4935 = vmatmul.mubr.msk.f32.vlgmr.msra.gmra.mrb[16].mxu1 %vm236_vm1, %v4452_v13 }
0x12f2   :  { %4937 = vmatprep.mubr.msk.f32.mxu1 %vm236_vm1, %v4453_v6 }
0x12f5   :  { %4938 = vmatmul.mubr.msk.f32.gmra.mrb[18].mxu1 %vm236_vm1, %v4454_v14 }
0x13c4   :  { %v4936_v8 = vpop.f32.mrb[16].mxu1 }
0x13c5   :  { %v1902_v15 = vpop.f32.mrb[17].mxu1  ;;  %v1934_v55 = vsel %vm1713_vm2, %v4936_v8, 0.0 }
0x13c6   :  { %1935 = vadd.xlane.f32.xlu0 %v1934_v55  ;;  %v1931_v18 = vsel %vm1713_vm2, %v1902_v15, 0.0 }
0x13c7   :  { %1932 = vadd.xlane.f32.xlu1 %v1931_v18 }
0x13c8   :  { %v4939_v19 = vpop.f32.mrb[18].mxu1 }
0x13c9   :  { %v1912_v20 = vpop.f32.mrb[19].mxu1  ;;  %v1940_v54 = vsel %vm1713_vm2, %v4939_v19, 0.0 }
0x13ca   :  { %v1937_v22 = vsel %vm1713_vm2, %v1912_v20, 0.0 }
0x13cb   :  { %1941 = vadd.xlane.f32.xlu1 %v1940_v54  ;;  %1938 = vadd.xlane.f32.xlu0 %v1937_v22 }
0x1453   :  { %v1936_v23 = vpop.xlane.xlu0 %1935 }
0x1454   :  { %v1944_v27 = vmul.f32 0.0625, %v1936_v23  ;;  %v1933_v48 = vpop.xlane.xlu1 %1932 }
0x1455   :  { %v1943_v28 = vmul.f32 0.0625, %v1933_v48 }
0x1456   :  { %v6203_v16 = vsub.f32 %v4936_v8, %v1944_v27 }
0x1457   :  { %v6205_v62 = vsub.f32 %v1902_v15, %v1943_v28 }
0x1458   :  { %v1942_v24 = vpop.xlane.xlu1 %1941  ;;  %v1939_v26 = vpop.xlane.xlu0 %1938  ;;  %v1952_v29 = vmul.f32 %v6203_v16, %v6203_v16 }
0x1459   :  { %v1946_v30 = vmul.f32 0.0625, %v1942_v24  ;;  %v1945_v31 = vmul.f32 0.0625, %v1939_v26  ;;  %v1951_v7 = vmul.f32 %v6205_v62, %v6205_v62 }
0x145a   :  { %v1958_v32 = vsel %vm1713_vm2, %v1952_v29, 0.0 }
0x145b   :  { %v6212_v33 = vsub.f32 %v4939_v19, %v1946_v30  ;;  %v6214_v40 = vsub.f32 %v1912_v20, %v1945_v31  ;;  %1959 = vadd.xlane.f32.xlu1 %v1958_v32  ;;  %v1955_v42 = vsel %vm1713_vm2, %v1951_v7, 0.0 }
0x145c   :  { %1956 = vadd.xlane.f32.xlu0 %v1955_v42 }
0x145d   :  { %v1954_v34 = vmul.f32 %v6212_v33, %v6212_v33  ;;  %v1953_v35 = vmul.f32 %v6214_v40, %v6214_v40 }
0x145f   :  { %v1964_v63 = vsel %vm1713_vm2, %v1954_v34, 0.0  ;;  %v1961_v17 = vsel %vm1713_vm2, %v1953_v35, 0.0 }
0x1460   :  { %1965 = vadd.xlane.f32.xlu1 %v1964_v63  ;;  %1962 = vadd.xlane.f32.xlu0 %v1961_v17 }
0x1471   :  { %2009 = vperm.xlu1 %5273, %v4463_v36  }
0x1476   :  { %2014 = vperm.xlu0 %5274, %v4464_v41  }
0x14e8   :  { %v1960_v38 = vpop.xlane.xlu1 %1959 }
0x14e9   :  { %v1968_v25 = vmul.f32 0.0625, %v1960_v38  ;;  %v1957_v39 = vpop.xlane.xlu0 %1956 }
0x14ea   :  { %v1967_v44 = vmul.f32 0.0625, %v1957_v39 }
0x14eb   :  { %v1972_v47 = vadd.f32 1e-05, %v1968_v25 }
0x14ec   :  { %v1971_v51 = vadd.f32 1e-05, %v1967_v44 }
0x14ed   :  { %5343 = vrsqrt.f32 %v1972_v47  ;;  %v1966_v52 = vpop.xlane.xlu1 %1965  ;;  %v1963_v21 = vpop.xlane.xlu0 %1962 }
0x14ee   :  { %5345 = vrsqrt.f32 %v1971_v51  ;;  %v1970_v46 = vmul.f32 0.0625, %v1966_v52  ;;  %v1969_v49 = vmul.f32 0.0625, %v1963_v21 }
0x14f0   :  { %v1974_v50 = vadd.f32 1e-05, %v1970_v46  ;;  %v1973_v56 = vadd.f32 1e-05, %v1969_v49 }
0x14f1   :  { %v2010_v13 = vpop.permute.xlu1 %2009 }
0x14f2   :  { %5347 = vrsqrt.f32 %v1974_v50 }
0x14f3   :  { %5349 = vrsqrt.f32 %v1973_v56 }
0x14f5   :  { %v2015_v6 = vpop.permute.xlu0 %2014 }
0x14f7   :  { %v5344_v59 = vpop.eup %5343 }
0x14f8   :  { %v5346_v53 = vpop.eup %5345  ;;  %v1980_v60 = vmul.f32 %v5344_v59, %v4460_v57 }
0x14f9   :  { %v1979_v61 = vmul.f32 %v5346_v53, %v4459_v58 }
0x14fa   :  { %1990 = vperm.xlu1 %5273, %v1980_v60  }
0x14fb   :  { %1985 = vperm.xlu0 %5274, %v1979_v61  }
0x14fc   :  { %v5348_v4 = vpop.eup %5347 }
0x14fd   :  { %v5350_v5 = vpop.eup %5349  ;;  %v1982_v9 = vmul.f32 %v5348_v4, %v4462_v0  ;;  %v4479_v4 = vld [vmem:[%s7033_s9 + $0x60] sm:$0xff] }
0x14fe   :  { %v1981_v11 = vmul.f32 %v5350_v5, %v4461_v1  ;;  %v4480_v5 = vld [vmem:[%s7033_s9 + $0x68] sm:$0xff] }
0x14ff   :  { %2000 = vperm.xlu0 %5274, %v1982_v9  }
0x1500   :  { %1995 = vperm.xlu1 %5273, %v1981_v11  }
0x1503   :  { %2024 = vperm.xlu0 %5274, %v4466_v2  }
0x1504   :  { %2019 = vperm.xlu1 %5273, %v4465_v12  }
0x1579   :  { %v1991_v14 = vpop.permute.xlu1 %1990 }
0x157a   :  { %v2004_v8 = vmul.f32 %v1991_v14, %v6203_v16  ;;  %v1986_v15 = vpop.permute.xlu0 %1985 }
0x157b   :  { %v2003_v55 = vmul.f32 %v1986_v15, %v6205_v62 }
0x157c   :  { %v2028_v18 = vadd.f32 %v2015_v6, %v2004_v8 }
0x157d   :  { %v2027_v19 = vadd.f32 %v2010_v13, %v2003_v55 }
0x157e   :  { %v2032_v20 = vmax.f32 %v2028_v18, 0.0  ;;  %v2001_v54 = vpop.permute.xlu0 %2000 }
0x157f   :  { %v2031_v22 = vmax.f32 %v2027_v19, 0.0  ;;  %v1996_v23 = vpop.permute.xlu1 %1995  ;;  %v2006_v48 = vmul.f32 %v2001_v54, %v6212_v33  ;;  %v4468_v33 = vld [vmem:[%s7032_s7 + $0x68] sm:$0xff] }
0x1580   :  { %v6254_v27 = vadd.f32 %v2032_v20, %v6107_v37  ;;  %v2005_v24 = vmul.f32 %v1996_v23, %v6214_v40  ;;  %v4469_v40 = vld [vmem:[%s7032_s7 + $0x70] sm:$0xff]  ;;  %v4476_v19 = vld [vmem:[%s7034_s8 + $0x68] sm:$0xff]  ;;  %v4475_v20 = vld [vmem:[%s7034_s8 + $0x60] sm:$0xff] }
0x1581   :  { %v6258_v28 = vadd.f32 %v2031_v22, %v6109_v10 }
0x1582   :  { %v2025_v16 = vpop.permute.xlu0 %2024 }
0x1583   :  { %v2020_v26 = vpop.permute.xlu1 %2019  ;;  %v2030_v29 = vadd.f32 %v2025_v16, %v2006_v48  ;;  %v5179_v62 = vpack.c.bf16 %v6254_v27, %v6258_v28  ;;  %v4477_v16 = vld [vmem:[%s7034_s8 + $0x70] sm:$0xff] }
0x1584   :  { %v2029_v30 = vadd.f32 %v2020_v26, %v2005_v24  ;;  %v4478_v24 = vld [vmem:[%s7034_s8 + $0x78] sm:$0xff] }
0x1585   :  { %v2034_v31 = vmax.f32 %v2030_v29, 0.0  ;;  %5180 = vmatprep.subr.bf16.mxu0 %v5179_v62 }
0x1586   :  { %v2033_v7 = vmax.f32 %v2029_v30, 0.0  ;;  %5182 = vmatpush3.bf16.msra.mxu0 %v5179_v62 }
0x1587   :  { %v6264_v37 = vadd.f32 %v2034_v31, %v6113_v43  ;;  %v4470_v43 = vld [vmem:[%s7032_s7 + $0x78] sm:$0xff] }
0x1588   :  { %v6267_v32 = vadd.f32 %v2033_v7, %v6115_v45  ;;  %v4482_v31 = vld [vmem:[%s7033_s9 + $0x78] sm:$0xff]  ;;  %v4481_v7 = vld [vmem:[%s7033_s9 + $0x70] sm:$0xff] }
0x158a   :  { %v5183_v10 = vpack.c.bf16 %v6264_v37, %v6267_v32 }
0x158c   :  { %5184 = vmatprep.subr.bf16.mxu0 %v5183_v10 }
0x158d   :  { %5186 = vmatpush3.bf16.msra.mxu0 %v5183_v10  ;;  %v4483_v10 = vld [vmem:[%s7035_s10 + $0x60] sm:$0xff] }
0x158e   :  { %4962 = vmatprep.mubr.msk.f32.mxu1 %vm236_vm1, %v4483_v10 }
0x1590   :  { %4949 = vmatmul.mubr.msk.f32.vlgmr.msra.gmra.mrb[18].mxu0 %vm236_vm1, %v4468_v33 }
0x1591   :  { %4951 = vmatprep.mubr.msk.f32.mxu0 %vm236_vm1, %v4469_v40 }
0x1594   :  { %4952 = vmatmul.mubr.msk.f32.gmra.mrb[20].mxu0 %vm236_vm1, %v4470_v43 }
0x1663   :  { %v4950_v45 = vpop.f32.mrb[18].mxu0 }
0x1664   :  { %v2122_v42 = vpop.f32.mrb[19].mxu0  ;;  %v2154_v34 = vsel %vm1713_vm2, %v4950_v45, 0.0 }
0x1665   :  { %2155 = vadd.xlane.f32.xlu0 %v2154_v34  ;;  %v2151_v35 = vsel %vm1713_vm2, %v2122_v42, 0.0 }
0x1666   :  { %2152 = vadd.xlane.f32.xlu1 %v2151_v35 }
0x1667   :  { %v4953_v63 = vpop.f32.mrb[20].mxu0 }
0x1668   :  { %v2132_v17 = vpop.f32.mrb[21].mxu0  ;;  %v2160_v36 = vsel %vm1713_vm2, %v4953_v63, 0.0 }
0x1669   :  { %v2157_v41 = vsel %vm1713_vm2, %v2132_v17, 0.0 }
0x166a   :  { %2161 = vadd.xlane.f32.xlu1 %v2160_v36  ;;  %2158 = vadd.xlane.f32.xlu0 %v2157_v41 }
0x16f2   :  { %v2156_v38 = vpop.xlane.xlu0 %2155 }
0x16f3   :  { %v2164_v25 = vmul.f32 0.0625, %v2156_v38  ;;  %v2153_v39 = vpop.xlane.xlu1 %2152 }
0x16f4   :  { %v2163_v44 = vmul.f32 0.0625, %v2153_v39 }
0x16f5   :  { %v6287_v47 = vsub.f32 %v4950_v45, %v2164_v25 }
0x16f6   :  { %v6289_v51 = vsub.f32 %v2122_v42, %v2163_v44 }
0x16f7   :  { %v2162_v52 = vpop.xlane.xlu1 %2161  ;;  %v2159_v21 = vpop.xlane.xlu0 %2158  ;;  %v2172_v46 = vmul.f32 %v6287_v47, %v6287_v47 }
0x16f8   :  { %v2166_v49 = vmul.f32 0.0625, %v2162_v52  ;;  %v2165_v50 = vmul.f32 0.0625, %v2159_v21  ;;  %v2171_v56 = vmul.f32 %v6289_v51, %v6289_v51 }
0x16f9   :  { %v2178_v57 = vsel %vm1713_vm2, %v2172_v46, 0.0 }
0x16fa   :  { %v6296_v58 = vsub.f32 %v4953_v63, %v2166_v49  ;;  %v6298_v59 = vsub.f32 %v2132_v17, %v2165_v50  ;;  %2179 = vadd.xlane.f32.xlu1 %v2178_v57  ;;  %v2175_v53 = vsel %vm1713_vm2, %v2171_v56, 0.0  ;;  %v4484_v56 = vld [vmem:[%s7035_s10 + $0x68] sm:$0xff]  ;;  %v4485_v57 = vld [vmem:[%s7035_s10 + $0x70] sm:$0xff] }
0x16fb   :  { %2176 = vadd.xlane.f32.xlu0 %v2175_v53 }
0x16fc   :  { %v2174_v60 = vmul.f32 %v6296_v58, %v6296_v58  ;;  %v2173_v61 = vmul.f32 %v6298_v59, %v6298_v59 }
0x16fe   :  { %v2184_v0 = vsel %vm1713_vm2, %v2174_v60, 0.0  ;;  %v2181_v1 = vsel %vm1713_vm2, %v2173_v61, 0.0 }
0x16ff   :  { %2185 = vadd.xlane.f32.xlu1 %v2184_v0  ;;  %2182 = vadd.xlane.f32.xlu0 %v2181_v1 }
0x1710   :  { %2229 = vperm.xlu1 %5273, %v4479_v4  }
0x1715   :  { %2234 = vperm.xlu0 %5274, %v4480_v5  }
0x1787   :  { %v2180_v9 = vpop.xlane.xlu1 %2179 }
0x1788   :  { %v2188_v11 = vmul.f32 0.0625, %v2180_v9  ;;  %v2177_v2 = vpop.xlane.xlu0 %2176 }
0x1789   :  { %v2187_v12 = vmul.f32 0.0625, %v2177_v2 }
0x178a   :  { %v2192_v3 = vadd.f32 1e-05, %v2188_v11 }
0x178b   :  { %v2191_v13 = vadd.f32 1e-05, %v2187_v12 }
0x178c   :  { %5351 = vrsqrt.f32 %v2192_v3  ;;  %v2186_v6 = vpop.xlane.xlu1 %2185  ;;  %v2183_v14 = vpop.xlane.xlu0 %2182 }
0x178d   :  { %5353 = vrsqrt.f32 %v2191_v13  ;;  %v2190_v8 = vmul.f32 0.0625, %v2186_v6  ;;  %v2189_v15 = vmul.f32 0.0625, %v2183_v14 }
0x178f   :  { %v2194_v55 = vadd.f32 1e-05, %v2190_v8  ;;  %v2193_v18 = vadd.f32 1e-05, %v2189_v15 }
0x1790   :  { %v2230_v33 = vpop.permute.xlu1 %2229 }
0x1791   :  { %5355 = vrsqrt.f32 %v2194_v55 }
0x1792   :  { %5357 = vrsqrt.f32 %v2193_v18 }
0x1794   :  { %v2235_v40 = vpop.permute.xlu0 %2234 }
0x1796   :  { %v5352_v54 = vpop.eup %5351 }
0x1797   :  { %v5354_v22 = vpop.eup %5353  ;;  %v2200_v23 = vmul.f32 %v5352_v54, %v4476_v19 }
0x1798   :  { %v2199_v48 = vmul.f32 %v5354_v22, %v4475_v20 }
0x1799   :  { %2210 = vperm.xlu1 %5273, %v2200_v23  }
0x179a   :  { %2205 = vperm.xlu0 %5274, %v2199_v48  }
0x179b   :  { %v5356_v26 = vpop.eup %5355 }
0x179c   :  { %v5358_v29 = vpop.eup %5357  ;;  %v2202_v62 = vmul.f32 %v5356_v26, %v4478_v24  ;;  %v4495_v26 = vld [vmem:[%s7036_s12 + $0x60] sm:$0xff] }
0x179d   :  { %v2201_v30 = vmul.f32 %v5358_v29, %v4477_v16  ;;  %v4496_v29 = vld [vmem:[%s7036_s12 + $0x68] sm:$0xff] }
0x179e   :  { %2220 = vperm.xlu0 %5274, %v2202_v62  }
0x179f   :  { %2215 = vperm.xlu1 %5273, %v2201_v30  }
0x17a2   :  { %2244 = vperm.xlu0 %5274, %v4482_v31  }
0x17a3   :  { %2239 = vperm.xlu1 %5273, %v4481_v7  }
0x1818   :  { %v2211_v43 = vpop.permute.xlu1 %2210 }
0x1819   :  { %v2224_v45 = vmul.f32 %v2211_v43, %v6287_v47  ;;  %v2206_v42 = vpop.permute.xlu0 %2205 }
0x181a   :  { %v2223_v34 = vmul.f32 %v2206_v42, %v6289_v51 }
0x181b   :  { %v2248_v35 = vadd.f32 %v2235_v40, %v2224_v45 }
0x181c   :  { %v2247_v63 = vadd.f32 %v2230_v33, %v2223_v34 }
0x181d   :  { %v2252_v17 = vmax.f32 %v2248_v35, 0.0  ;;  %v2221_v36 = vpop.permute.xlu0 %2220 }
0x181e   :  { %v2251_v41 = vmax.f32 %v2247_v63, 0.0  ;;  %v2216_v38 = vpop.permute.xlu1 %2215  ;;  %v2226_v25 = vmul.f32 %v2221_v36, %v6296_v58  ;;  %v4486_v58 = vld [vmem:[%s7035_s10 + $0x78] sm:$0xff]  ;;  %v4492_v63 = vld [vmem:[%s7037_s11 + $0x68] sm:$0xff] }
0x181f   :  { %v2225_v44 = vmul.f32 %v2216_v38, %v6298_v59 }
0x1820   :  { %v5187_v39 = vpack.c.bf16 %v2252_v17, %v2251_v41  ;;  %v4491_v17 = vld [vmem:[%s7037_s11 + $0x60] sm:$0xff] }
0x1821   :  { %v2245_v52 = vpop.permute.xlu0 %2244 }
0x1822   :  { %v2240_v21 = vpop.permute.xlu1 %2239  ;;  %v2250_v46 = vadd.f32 %v2245_v52, %v2226_v25  ;;  %5188 = vmatprep.subr.bf16.mxu1 %v5187_v39 }
0x1823   :  { %v2249_v49 = vadd.f32 %v2240_v21, %v2225_v44  ;;  %5190 = vmatpush3.bf16.msra.mxu1 %v5187_v39  ;;  %v4494_v39 = vld [vmem:[%s7037_s11 + $0x78] sm:$0xff]  ;;  %v4493_v44 = vld [vmem:[%s7037_s11 + $0x70] sm:$0xff] }
0x1824   :  { %v2254_v47 = vmax.f32 %v2250_v46, 0.0 }
0x1825   :  { %v2253_v50 = vmax.f32 %v2249_v49, 0.0 }
0x1827   :  { %v5191_v51 = vpack.c.bf16 %v2254_v47, %v2253_v50  ;;  %v4498_v47 = vld [vmem:[%s7036_s12 + $0x78] sm:$0xff]  ;;  %v4497_v50 = vld [vmem:[%s7036_s12 + $0x70] sm:$0xff] }
0x1829   :  { %5192 = vmatprep.subr.bf16.mxu1 %v5191_v51 }
0x182a   :  { %5194 = vmatpush3.bf16.msra.mxu1 %v5191_v51 }
0x182d   :  { %4963 = vmatmul.mubr.msk.f32.vlgmr.msra.gmra.mrb[20].mxu1 %vm236_vm1, %v4484_v56 }
0x182e   :  { %4965 = vmatprep.mubr.msk.f32.mxu1 %vm236_vm1, %v4485_v57 }
0x1831   :  { %4966 = vmatmul.mubr.msk.f32.gmra.mrb[22].mxu1 %vm236_vm1, %v4486_v58 }
0x1900   :  { %v4964_v59 = vpop.f32.mrb[20].mxu1 }
0x1901   :  { %v2338_v53 = vpop.f32.mrb[21].mxu1  ;;  %v2370_v60 = vsel %vm1713_vm2, %v4964_v59, 0.0 }
0x1902   :  { %2371 = vadd.xlane.f32.xlu0 %v2370_v60  ;;  %v2367_v61 = vsel %vm1713_vm2, %v2338_v53, 0.0 }
0x1903   :  { %2368 = vadd.xlane.f32.xlu1 %v2367_v61 }
0x1904   :  { %v4967_v0 = vpop.f32.mrb[22].mxu1 }
0x1905   :  { %v2348_v1 = vpop.f32.mrb[23].mxu1  ;;  %v2376_v4 = vsel %vm1713_vm2, %v4967_v0, 0.0 }
0x1906   :  { %v2373_v5 = vsel %vm1713_vm2, %v2348_v1, 0.0 }
0x1907   :  { %2377 = vadd.xlane.f32.xlu1 %v2376_v4  ;;  %2374 = vadd.xlane.f32.xlu0 %v2373_v5 }
0x198f   :  { %v2372_v9 = vpop.xlane.xlu0 %2371 }
0x1990   :  { %v2380_v11 = vmul.f32 0.0625, %v2372_v9  ;;  %v2369_v2 = vpop.xlane.xlu1 %2368 }
0x1991   :  { %v2379_v12 = vmul.f32 0.0625, %v2369_v2 }
0x1992   :  { %v6355_v3 = vsub.f32 %v4964_v59, %v2380_v11 }
0x1993   :  { %v6357_v13 = vsub.f32 %v2338_v53, %v2379_v12 }
0x1994   :  { %v2378_v6 = vpop.xlane.xlu1 %2377  ;;  %v2375_v14 = vpop.xlane.xlu0 %2374  ;;  %v2388_v8 = vmul.f32 %v6355_v3, %v6355_v3 }
0x1995   :  { %v2382_v15 = vmul.f32 0.0625, %v2378_v6  ;;  %v2381_v55 = vmul.f32 0.0625, %v2375_v14  ;;  %v2387_v18 = vmul.f32 %v6357_v13, %v6357_v13 }
0x1996   :  { %v2394_v19 = vsel %vm1713_vm2, %v2388_v8, 0.0  ;;  %v4499_v8 = vld [vmem:[%s7032_s7 + $0x80] sm:$0xff] }
0x1997   :  { %v6364_v20 = vsub.f32 %v4967_v0, %v2382_v15  ;;  %v6366_v54 = vsub.f32 %v2348_v1, %v2381_v55  ;;  %2395 = vadd.xlane.f32.xlu1 %v2394_v19  ;;  %v2391_v22 = vsel %vm1713_vm2, %v2387_v18, 0.0  ;;  %4976 = vmatprep.mubr.msk.f32.mxu0 %vm236_vm1, %v4499_v8  ;;  %v4508_v8 = vld [vmem:[%s7034_s8 + $0x88] sm:$0xff] }
0x1998   :  { %2392 = vadd.xlane.f32.xlu0 %v2391_v22 }
0x1999   :  { %v2390_v23 = vmul.f32 %v6364_v20, %v6364_v20  ;;  %v2389_v48 = vmul.f32 %v6366_v54, %v6366_v54 }
0x199b   :  { %v2400_v24 = vsel %vm1713_vm2, %v2390_v23, 0.0  ;;  %v2397_v16 = vsel %vm1713_vm2, %v2389_v48, 0.0 }
0x199c   :  { %2401 = vadd.xlane.f32.xlu1 %v2400_v24  ;;  %2398 = vadd.xlane.f32.xlu0 %v2397_v16 }
0x19ad   :  { %2445 = vperm.xlu1 %5273, %v4495_v26  }
0x19b2   :  { %2450 = vperm.xlu0 %5274, %v4496_v29  }
0x1a24   :  { %v2396_v62 = vpop.xlane.xlu1 %2395 }
0x1a25   :  { %v2404_v30 = vmul.f32 0.0625, %v2396_v62  ;;  %v2393_v31 = vpop.xlane.xlu0 %2392 }
0x1a26   :  { %v2403_v7 = vmul.f32 0.0625, %v2393_v31  ;;  %v4501_v31 = vld [vmem:[%s7032_s7 + $0x90] sm:$0xff] }
0x1a27   :  { %v2408_v10 = vadd.f32 1e-05, %v2404_v30  ;;  %v4500_v30 = vld [vmem:[%s7032_s7 + $0x88] sm:$0xff] }
0x1a28   :  { %v2407_v33 = vadd.f32 1e-05, %v2403_v7  ;;  %v4502_v7 = vld [vmem:[%s7032_s7 + $0x98] sm:$0xff] }
0x1a29   :  { %5359 = vrsqrt.f32 %v2408_v10  ;;  %v2402_v40 = vpop.xlane.xlu1 %2401  ;;  %v2399_v43 = vpop.xlane.xlu0 %2398 }
0x1a2a   :  { %5361 = vrsqrt.f32 %v2407_v33  ;;  %v2406_v45 = vmul.f32 0.0625, %v2402_v40  ;;  %v2405_v42 = vmul.f32 0.0625, %v2399_v43 }
0x1a2c   :  { %v2410_v34 = vadd.f32 1e-05, %v2406_v45  ;;  %v2409_v35 = vadd.f32 1e-05, %v2405_v42 }
0x1a2d   :  { %v2446_v51 = vpop.permute.xlu1 %2445 }
0x1a2e   :  { %5363 = vrsqrt.f32 %v2410_v34 }
0x1a2f   :  { %5365 = vrsqrt.f32 %v2409_v35 }
0x1a31   :  { %v2451_v56 = vpop.permute.xlu0 %2450 }
0x1a33   :  { %v5360_v36 = vpop.eup %5359 }
0x1a34   :  { %v5362_v41 = vpop.eup %5361  ;;  %v2416_v38 = vmul.f32 %v5360_v36, %v4492_v63 }
0x1a35   :  { %v2415_v25 = vmul.f32 %v5362_v41, %v4491_v17 }
0x1a36   :  { %2426 = vperm.xlu1 %5273, %v2416_v38  }
0x1a37   :  { %2421 = vperm.xlu0 %5274, %v2415_v25  }
0x1a38   :  { %v5364_v52 = vpop.eup %5363 }
0x1a39   :  { %v5366_v21 = vpop.eup %5365  ;;  %v2418_v46 = vmul.f32 %v5364_v52, %v4494_v39 }
0x1a3a   :  { %v2417_v49 = vmul.f32 %v5366_v21, %v4493_v44 }
0x1a3b   :  { %2436 = vperm.xlu0 %5274, %v2418_v46  }
0x1a3c   :  { %2431 = vperm.xlu1 %5273, %v2417_v49  }
0x1a3f   :  { %2460 = vperm.xlu0 %5274, %v4498_v47  }
0x1a40   :  { %2455 = vperm.xlu1 %5273, %v4497_v50  }
0x1ab5   :  { %v2427_v57 = vpop.permute.xlu1 %2426 }
0x1ab6   :  { %v2440_v58 = vmul.f32 %v2427_v57, %v6355_v3  ;;  %v2422_v59 = vpop.permute.xlu0 %2421 }
0x1ab7   :  { %v2439_v53 = vmul.f32 %v2422_v59, %v6357_v13 }
0x1ab8   :  { %v2464_v60 = vadd.f32 %v2451_v56, %v2440_v58 }
0x1ab9   :  { %v2463_v61 = vadd.f32 %v2446_v51, %v2439_v53 }
0x1aba   :  { %v2468_v0 = vmax.f32 %v2464_v60, 0.0  ;;  %v2437_v1 = vpop.permute.xlu0 %2436  ;;  %v4511_v60 = vld [vmem:[%s7033_s9 + $0x80] sm:$0xff] }
0x1abb   :  { %v2467_v4 = vmax.f32 %v2463_v61, 0.0  ;;  %v2432_v5 = vpop.permute.xlu1 %2431  ;;  %v2442_v2 = vmul.f32 %v2437_v1, %v6364_v20  ;;  %v4512_v61 = vld [vmem:[%s7033_s9 + $0x88] sm:$0xff] }
0x1abc   :  { %v2472_v9 = vadd.f32 %v2468_v0, %v6254_v27  ;;  %v2441_v12 = vmul.f32 %v2432_v5, %v6366_v54 }
0x1abd   :  { %v2471_v11 = vadd.f32 %v2467_v4, %v6258_v28 }
0x1abe   :  { %2481 = vrot.lane.b32.xlu0 %v2472_v9, %s5433_s30  ;;  %v2461_v3 = vpop.permute.xlu0 %2460 }
0x1abf   :  { %v2456_v6 = vpop.permute.xlu1 %2455  ;;  %v2466_v14 = vadd.f32 %v2461_v3, %v2442_v2  ;;  %2479 = vrot.lane.b32.xlu1 %v2471_v11, %s5433_s30 }
0x1ac0   :  { %v2465_v13 = vadd.f32 %v2456_v6, %v2441_v12 }
0x1ac1   :  { %v2470_v15 = vmax.f32 %v2466_v14, 0.0 }
0x1ac2   :  { %v2469_v27 = vmax.f32 %v2465_v13, 0.0 }
0x1ac3   :  { %v2474_v28 = vadd.f32 %v2470_v15, %v6264_v37  ;;  %v4507_v15 = vld [vmem:[%s7034_s8 + $0x80] sm:$0xff] }
0x1ac4   :  { %v2473_v55 = vadd.f32 %v2469_v27, %v6267_v32 }
0x1ac5   :  { %2485 = vrot.lane.b32.xlu0 %v2474_v28, %s5433_s30 }
0x1ac6   :  { %2483 = vrot.lane.b32.xlu1 %v2473_v55, %s5433_s30 }
0x1b30   :  { %v2482_v18 = vpop.permute.xlu0 %2481 }
0x1b31   :  { %v2492_v19 = vadd.f32 %v2482_v18, %v2472_v9  ;;  %v2480_v20 = vpop.permute.xlu1 %2479 }
0x1b32   :  { %v2491_v54 = vadd.f32 %v2480_v20, %v2471_v11  ;;  %v4509_v20 = vld [vmem:[%s7034_s8 + $0x90] sm:$0xff] }
0x1b33   :  { %v6411_v22 = vmul.f32 0.5, %v2492_v19  ;;  %v4510_v19 = vld [vmem:[%s7034_s8 + $0x98] sm:$0xff] }
0x1b34   :  { %v6413_v23 = vmul.f32 0.5, %v2491_v54 }
0x1b36   :  { %v5195_v48 = vpack.c.bf16 %v6411_v22, %v6413_v23 }
0x1b37   :  { %v2486_v24 = vpop.permute.xlu0 %2485 }
0x1b38   :  { %v2484_v16 = vpop.permute.xlu1 %2483  ;;  %v2494_v26 = vadd.f32 %v2486_v24, %v2474_v28  ;;  %5196 = vmatprep.subr.bf16.mxu0 %v5195_v48 }
0x1b39   :  { %v2493_v37 = vadd.f32 %v2484_v16, %v2473_v55  ;;  %5198 = vmatpush3.bf16.msra.mxu0 %v5195_v48 }
0x1b3a   :  { %v6417_v32 = vmul.f32 0.5, %v2494_v26  ;;  %v4514_v26 = vld [vmem:[%s7033_s9 + $0x98] sm:$0xff] }
0x1b3b   :  { %v6419_v29 = vmul.f32 0.5, %v2493_v37  ;;  %v4513_v37 = vld [vmem:[%s7033_s9 + $0x90] sm:$0xff] }
0x1b3d   :  { %v5199_v62 = vpack.c.bf16 %v6417_v32, %v6419_v29 }
0x1b3f   :  { %5200 = vmatprep.subr.bf16.mxu0 %v5199_v62 }
0x1b40   :  { %5202 = vmatpush3.bf16.msra.mxu0 %v5199_v62  ;;  %v4515_v62 = vld [vmem:[%s7035_s10 + $0x80] sm:$0xff] }
0x1b41   :  { %4990 = vmatprep.mubr.msk.f32.mxu1 %vm236_vm1, %v4515_v62 }
0x1b43   :  { %4977 = vmatmul.mubr.msk.f32.vlgmr.msra.gmra.mrb[22].mxu0 %vm236_vm1, %v4500_v30 }
0x1b44   :  { %4979 = vmatprep.mubr.msk.f32.mxu0 %vm236_vm1, %v4501_v31 }
0x1b47   :  { %4980 = vmatmul.mubr.msk.f32.gmra.mrb[24].mxu0 %vm236_vm1, %v4502_v7 }
0x1c16   :  { %v4978_v10 = vpop.f32.mrb[22].mxu0 }
0x1c17   :  { %v2582_v33 = vpop.f32.mrb[23].mxu0  ;;  %v2615_v40 = vsel %vm2611_vm3, %v4978_v10, 0.0 }
0x1c18   :  { %2616 = vadd.xlane.f32.xlu0 %v2615_v40  ;;  %v2612_v43 = vsel %vm2611_vm3, %v2582_v33, 0.0 }
0x1c19   :  { %2613 = vadd.xlane.f32.xlu1 %v2612_v43 }
0x1c1a   :  { %v4981_v45 = vpop.f32.mrb[24].mxu0 }
0x1c1b   :  { %v2592_v42 = vpop.f32.mrb[25].mxu0  ;;  %v2621_v34 = vsel %vm2611_vm3, %v4981_v45, 0.0 }
0x1c1c   :  { %v2618_v35 = vsel %vm2611_vm3, %v2592_v42, 0.0 }
0x1c1d   :  { %2622 = vadd.xlane.f32.xlu1 %v2621_v34  ;;  %2619 = vadd.xlane.f32.xlu0 %v2618_v35 }
0x1ca5   :  { %v2617_v63 = vpop.xlane.xlu0 %2616 }
0x1ca6   :  { %v2626_v17 = vmul.f32 0.125, %v2617_v63  ;;  %v2614_v36 = vpop.xlane.xlu1 %2613 }
0x1ca7   :  { %v2625_v41 = vmul.f32 0.125, %v2614_v36 }
0x1ca8   :  { %v6439_v38 = vsub.f32 %v4978_v10, %v2626_v17 }
0x1ca9   :  { %v6441_v25 = vsub.f32 %v2582_v33, %v2625_v41 }
0x1caa   :  { %v2623_v39 = vpop.xlane.xlu1 %2622  ;;  %v2620_v44 = vpop.xlane.xlu0 %2619  ;;  %v2634_v52 = vmul.f32 %v6439_v38, %v6439_v38 }
0x1cab   :  { %v2628_v21 = vmul.f32 0.125, %v2623_v39  ;;  %v2627_v46 = vmul.f32 0.125, %v2620_v44  ;;  %v2633_v49 = vmul.f32 %v6441_v25, %v6441_v25 }
0x1cac   :  { %v2640_v47 = vsel %vm2611_vm3, %v2634_v52, 0.0 }
0x1cad   :  { %v6448_v50 = vsub.f32 %v4981_v45, %v2628_v21  ;;  %v6450_v51 = vsub.f32 %v2592_v42, %v2627_v46  ;;  %2641 = vadd.xlane.f32.xlu1 %v2640_v47  ;;  %v2637_v56 = vsel %vm2611_vm3, %v2633_v49, 0.0  ;;  %v4516_v49 = vld [vmem:[%s7035_s10 + $0x88] sm:$0xff]  ;;  %v4517_v47 = vld [vmem:[%s7035_s10 + $0x90] sm:$0xff] }
0x1cae   :  { %2638 = vadd.xlane.f32.xlu0 %v2637_v56 }
0x1caf   :  { %v2636_v57 = vmul.f32 %v6448_v50, %v6448_v50  ;;  %v2635_v58 = vmul.f32 %v6450_v51, %v6450_v51 }
0x1cb1   :  { %v2646_v59 = vsel %vm2611_vm3, %v2636_v57, 0.0  ;;  %v2643_v53 = vsel %vm2611_vm3, %v2635_v58, 0.0 }
0x1cb2   :  { %2647 = vadd.xlane.f32.xlu1 %v2646_v59  ;;  %2644 = vadd.xlane.f32.xlu0 %v2643_v53 }
0x1cc3   :  { %2691 = vperm.xlu1 %5273, %v4511_v60  }
0x1cc8   :  { %2696 = vperm.xlu0 %5274, %v4512_v61  }
0x1d3a   :  { %v2642_v0 = vpop.xlane.xlu1 %2641 }
0x1d3b   :  { %v2650_v1 = vmul.f32 0.125, %v2642_v0  ;;  %v2639_v4 = vpop.xlane.xlu0 %2638 }
0x1d3c   :  { %v2649_v5 = vmul.f32 0.125, %v2639_v4 }
0x1d3d   :  { %v2654_v9 = vadd.f32 1e-05, %v2650_v1 }
0x1d3e   :  { %v2653_v11 = vadd.f32 1e-05, %v2649_v5 }
0x1d3f   :  { %5367 = vrsqrt.f32 %v2654_v9  ;;  %v2648_v2 = vpop.xlane.xlu1 %2647  ;;  %v2645_v12 = vpop.xlane.xlu0 %2644 }
0x1d40   :  { %5369 = vrsqrt.f32 %v2653_v11  ;;  %v2652_v3 = vmul.f32 0.125, %v2648_v2  ;;  %v2651_v6 = vmul.f32 0.125, %v2645_v12 }
0x1d42   :  { %v2656_v14 = vadd.f32 1e-05, %v2652_v3  ;;  %v2655_v13 = vadd.f32 1e-05, %v2651_v6 }
0x1d43   :  { %v2692_v30 = vpop.permute.xlu1 %2691 }
0x1d44   :  { %5371 = vrsqrt.f32 %v2656_v14 }
0x1d45   :  { %5373 = vrsqrt.f32 %v2655_v13 }
0x1d47   :  { %v2697_v31 = vpop.permute.xlu0 %2696 }
0x1d49   :  { %v5368_v27 = vpop.eup %5367 }
0x1d4a   :  { %v5370_v28 = vpop.eup %5369  ;;  %v2662_v55 = vmul.f32 %v5368_v27, %v4508_v8 }
0x1d4b   :  { %v2661_v18 = vmul.f32 %v5370_v28, %v4507_v15 }
0x1d4c   :  { %2672 = vperm.xlu1 %5273, %v2662_v55  }
0x1d4d   :  { %2667 = vperm.xlu0 %5274, %v2661_v18  }
0x1d4e   :  { %v5372_v54 = vpop.eup %5371 }
0x1d4f   :  { %v5374_v48 = vpop.eup %5373  ;;  %v2664_v24 = vmul.f32 %v5372_v54, %v4510_v19  ;;  %v4527_v54 = vld [vmem:[%s7036_s12 + $0x80] sm:$0xff] }
0x1d50   :  { %v2663_v16 = vmul.f32 %v5374_v48, %v4509_v20  ;;  %v4528_v48 = vld [vmem:[%s7036_s12 + $0x88] sm:$0xff] }
0x1d51   :  { %2682 = vperm.xlu0 %5274, %v2664_v24  }
0x1d52   :  { %2677 = vperm.xlu1 %5273, %v2663_v16  }
0x1d55   :  { %2706 = vperm.xlu0 %5274, %v4514_v26  }
0x1d56   :  { %2701 = vperm.xlu1 %5273, %v4513_v37  }
0x1dcb   :  { %v2673_v7 = vpop.permute.xlu1 %2672 }
0x1dcc   :  { %v2686_v10 = vmul.f32 %v2673_v7, %v6439_v38  ;;  %v2668_v33 = vpop.permute.xlu0 %2667 }
0x1dcd   :  { %v2685_v40 = vmul.f32 %v2668_v33, %v6441_v25 }
0x1dce   :  { %v2710_v43 = vadd.f32 %v2697_v31, %v2686_v10 }
0x1dcf   :  { %v2709_v45 = vadd.f32 %v2692_v30, %v2685_v40 }
0x1dd0   :  { %v2714_v42 = vmax.f32 %v2710_v43, 0.0  ;;  %v2683_v34 = vpop.permute.xlu0 %2682 }
0x1dd1   :  { %v2713_v35 = vmax.f32 %v2709_v45, 0.0  ;;  %v2678_v63 = vpop.permute.xlu1 %2677  ;;  %v2688_v17 = vmul.f32 %v2683_v34, %v6448_v50  ;;  %v4518_v50 = vld [vmem:[%s7035_s10 + $0x98] sm:$0xff]  ;;  %v4524_v45 = vld [vmem:[%s7037_s11 + $0x88] sm:$0xff] }
0x1dd2   :  { %v2687_v41 = vmul.f32 %v2678_v63, %v6450_v51 }
0x1dd3   :  { %v5203_v36 = vpack.c.bf16 %v2714_v42, %v2713_v35  ;;  %v4523_v42 = vld [vmem:[%s7037_s11 + $0x80] sm:$0xff] }
0x1dd4   :  { %v2707_v39 = vpop.permute.xlu0 %2706 }
0x1dd5   :  { %v2702_v44 = vpop.permute.xlu1 %2701  ;;  %v2712_v52 = vadd.f32 %v2707_v39, %v2688_v17  ;;  %5204 = vmatprep.subr.bf16.mxu1 %v5203_v36 }
0x1dd6   :  { %v2711_v21 = vadd.f32 %v2702_v44, %v2687_v41  ;;  %5206 = vmatpush3.bf16.msra.mxu1 %v5203_v36  ;;  %v4526_v36 = vld [vmem:[%s7037_s11 + $0x98] sm:$0xff]  ;;  %v4525_v41 = vld [vmem:[%s7037_s11 + $0x90] sm:$0xff] }
0x1dd7   :  { %v2716_v38 = vmax.f32 %v2712_v52, 0.0 }
0x1dd8   :  { %v2715_v46 = vmax.f32 %v2711_v21, 0.0 }
0x1dda   :  { %v5207_v25 = vpack.c.bf16 %v2716_v38, %v2715_v46  ;;  %v4530_v38 = vld [vmem:[%s7036_s12 + $0x98] sm:$0xff]  ;;  %v4529_v46 = vld [vmem:[%s7036_s12 + $0x90] sm:$0xff] }
0x1ddc   :  { %5208 = vmatprep.subr.bf16.mxu1 %v5207_v25 }
0x1ddd   :  { %5210 = vmatpush3.bf16.msra.mxu1 %v5207_v25  ;;  %v4531_v25 = vld [vmem:[%s7032_s7 + $0xa0] sm:$0xff] }
0x1dde   :  { %5004 = vmatprep.mubr.msk.f32.mxu0 %vm236_vm1, %v4531_v25 }
0x1de0   :  { %4991 = vmatmul.mubr.msk.f32.vlgmr.msra.gmra.mrb[24].mxu1 %vm236_vm1, %v4516_v49 }
0x1de1   :  { %4993 = vmatprep.mubr.msk.f32.mxu1 %vm236_vm1, %v4517_v47 }
0x1de4   :  { %4994 = vmatmul.mubr.msk.f32.gmra.mrb[26].mxu1 %vm236_vm1, %v4518_v50 }
0x1eb3   :  { %v4992_v51 = vpop.f32.mrb[24].mxu1 }
0x1eb4   :  { %v2800_v56 = vpop.f32.mrb[25].mxu1  ;;  %v2832_v57 = vsel %vm2611_vm3, %v4992_v51, 0.0 }
0x1eb5   :  { %2833 = vadd.xlane.f32.xlu0 %v2832_v57  ;;  %v2829_v58 = vsel %vm2611_vm3, %v2800_v56, 0.0 }
0x1eb6   :  { %2830 = vadd.xlane.f32.xlu1 %v2829_v58 }
0x1eb7   :  { %v4995_v59 = vpop.f32.mrb[26].mxu1 }
0x1eb8   :  { %v2810_v53 = vpop.f32.mrb[27].mxu1  ;;  %v2838_v60 = vsel %vm2611_vm3, %v4995_v59, 0.0 }
0x1eb9   :  { %v2835_v61 = vsel %vm2611_vm3, %v2810_v53, 0.0 }
0x1eba   :  { %2839 = vadd.xlane.f32.xlu1 %v2838_v60  ;;  %2836 = vadd.xlane.f32.xlu0 %v2835_v61 }
0x1f42   :  { %v2834_v0 = vpop.xlane.xlu0 %2833 }
0x1f43   :  { %v2842_v1 = vmul.f32 0.125, %v2834_v0  ;;  %v2831_v4 = vpop.xlane.xlu1 %2830 }
0x1f44   :  { %v2841_v5 = vmul.f32 0.125, %v2831_v4 }
0x1f45   :  { %v6507_v9 = vsub.f32 %v4992_v51, %v2842_v1 }
0x1f46   :  { %v6509_v11 = vsub.f32 %v2800_v56, %v2841_v5 }
0x1f47   :  { %v2840_v2 = vpop.xlane.xlu1 %2839  ;;  %v2837_v12 = vpop.xlane.xlu0 %2836  ;;  %v2850_v3 = vmul.f32 %v6507_v9, %v6507_v9 }
0x1f48   :  { %v2844_v6 = vmul.f32 0.125, %v2840_v2  ;;  %v2843_v14 = vmul.f32 0.125, %v2837_v12  ;;  %v2849_v13 = vmul.f32 %v6509_v11, %v6509_v11 }
0x1f49   :  { %v2856_v8 = vsel %vm2611_vm3, %v2850_v3, 0.0 }
0x1f4a   :  { %v6516_v15 = vsub.f32 %v4995_v59, %v2844_v6  ;;  %v6518_v27 = vsub.f32 %v2810_v53, %v2843_v14  ;;  %2857 = vadd.xlane.f32.xlu1 %v2856_v8  ;;  %v2853_v28 = vsel %vm2611_vm3, %v2849_v13, 0.0 }
0x1f4b   :  { %2854 = vadd.xlane.f32.xlu0 %v2853_v28 }
0x1f4c   :  { %v2852_v55 = vmul.f32 %v6516_v15, %v6516_v15  ;;  %v2851_v18 = vmul.f32 %v6518_v27, %v6518_v27 }
0x1f4e   :  { %v2862_v19 = vsel %vm2611_vm3, %v2852_v55, 0.0  ;;  %v2859_v20 = vsel %vm2611_vm3, %v2851_v18, 0.0 }
0x1f4f   :  { %2863 = vadd.xlane.f32.xlu1 %v2862_v19  ;;  %2860 = vadd.xlane.f32.xlu0 %v2859_v20 }
0x1f60   :  { %2907 = vperm.xlu1 %5273, %v4527_v54  }
0x1f65   :  { %2912 = vperm.xlu0 %5274, %v4528_v48  }
0x1fd7   :  { %v2858_v24 = vpop.xlane.xlu1 %2857 }
0x1fd8   :  { %v2866_v16 = vmul.f32 0.125, %v2858_v24  ;;  %v2855_v26 = vpop.xlane.xlu0 %2854 }
0x1fd9   :  { %v2865_v37 = vmul.f32 0.125, %v2855_v26 }
0x1fda   :  { %v2870_v62 = vadd.f32 1e-05, %v2866_v16 }
0x1fdb   :  { %v2869_v30 = vadd.f32 1e-05, %v2865_v37 }
0x1fdc   :  { %5375 = vrsqrt.f32 %v2870_v62  ;;  %v2864_v31 = vpop.xlane.xlu1 %2863  ;;  %v2861_v7 = vpop.xlane.xlu0 %2860 }
0x1fdd   :  { %5377 = vrsqrt.f32 %v2869_v30  ;;  %v2868_v10 = vmul.f32 0.125, %v2864_v31  ;;  %v2867_v33 = vmul.f32 0.125, %v2861_v7 }
0x1fdf   :  { %v2872_v40 = vadd.f32 1e-05, %v2868_v10  ;;  %v2871_v43 = vadd.f32 1e-05, %v2867_v33 }
0x1fe0   :  { %v2908_v49 = vpop.permute.xlu1 %2907 }
0x1fe1   :  { %5379 = vrsqrt.f32 %v2872_v40 }
0x1fe2   :  { %5381 = vrsqrt.f32 %v2871_v43 }
0x1fe4   :  { %v2913_v47 = vpop.permute.xlu0 %2912 }
0x1fe6   :  { %v5376_v34 = vpop.eup %5375 }
0x1fe7   :  { %v5378_v35 = vpop.eup %5377  ;;  %v2878_v63 = vmul.f32 %v5376_v34, %v4524_v45 }
0x1fe8   :  { %v2877_v17 = vmul.f32 %v5378_v35, %v4523_v42 }
0x1fe9   :  { %2888 = vperm.xlu1 %5273, %v2878_v63  }
0x1fea   :  { %2883 = vperm.xlu0 %5274, %v2877_v17  }
0x1feb   :  { %v5380_v39 = vpop.eup %5379 }
0x1fec   :  { %v5382_v44 = vpop.eup %5381  ;;  %v2880_v52 = vmul.f32 %v5380_v39, %v4526_v36  ;;  %v4543_v39 = vld [vmem:[%s7033_s9 + $0xa0] sm:$0xff] }
0x1fed   :  { %v2879_v21 = vmul.f32 %v5382_v44, %v4525_v41  ;;  %v4544_v44 = vld [vmem:[%s7033_s9 + $0xa8] sm:$0xff] }
0x1fee   :  { %2898 = vperm.xlu0 %5274, %v2880_v52  }
0x1fef   :  { %2893 = vperm.xlu1 %5273, %v2879_v21  }
0x1ff2   :  { %2922 = vperm.xlu0 %5274, %v4530_v38  }
0x1ff3   :  { %2917 = vperm.xlu1 %5273, %v4529_v46  }
0x2068   :  { %v2889_v50 = vpop.permute.xlu1 %2888 }
0x2069   :  { %v2902_v51 = vmul.f32 %v2889_v50, %v6507_v9  ;;  %v2884_v56 = vpop.permute.xlu0 %2883 }
0x206a   :  { %v2901_v57 = vmul.f32 %v2884_v56, %v6509_v11 }
0x206b   :  { %v2926_v58 = vadd.f32 %v2913_v47, %v2902_v51 }
0x206c   :  { %v2925_v59 = vadd.f32 %v2908_v49, %v2901_v57 }
0x206d   :  { %v2930_v53 = vmax.f32 %v2926_v58, 0.0  ;;  %v2899_v60 = vpop.permute.xlu0 %2898 }
0x206e   :  { %v2929_v61 = vmax.f32 %v2925_v59, 0.0  ;;  %v2894_v0 = vpop.permute.xlu1 %2893  ;;  %v2904_v4 = vmul.f32 %v2899_v60, %v6516_v15  ;;  %v4532_v15 = vld [vmem:[%s7032_s7 + $0xa8] sm:$0xff] }
0x206f   :  { %v6558_v1 = vadd.f32 %v2930_v53, %v6411_v22  ;;  %v2903_v2 = vmul.f32 %v2894_v0, %v6518_v27  ;;  %v4533_v27 = vld [vmem:[%s7032_s7 + $0xb0] sm:$0xff]  ;;  %v4540_v59 = vld [vmem:[%s7034_s8 + $0xa8] sm:$0xff]  ;;  %v4539_v53 = vld [vmem:[%s7034_s8 + $0xa0] sm:$0xff] }
0x2070   :  { %v6562_v5 = vadd.f32 %v2929_v61, %v6413_v23 }
0x2071   :  { %v2923_v9 = vpop.permute.xlu0 %2922 }
0x2072   :  { %v2918_v12 = vpop.permute.xlu1 %2917  ;;  %v2928_v3 = vadd.f32 %v2923_v9, %v2904_v4  ;;  %v5211_v11 = vpack.c.bf16 %v6558_v1, %v6562_v5  ;;  %v4541_v9 = vld [vmem:[%s7034_s8 + $0xb0] sm:$0xff] }
0x2073   :  { %v2927_v6 = vadd.f32 %v2918_v12, %v2903_v2  ;;  %v4542_v2 = vld [vmem:[%s7034_s8 + $0xb8] sm:$0xff] }
0x2074   :  { %v2932_v14 = vmax.f32 %v2928_v3, 0.0  ;;  %5212 = vmatprep.subr.bf16.mxu0 %v5211_v11 }
0x2075   :  { %v2931_v13 = vmax.f32 %v2927_v6, 0.0  ;;  %5214 = vmatpush3.bf16.msra.mxu0 %v5211_v11 }
0x2076   :  { %v6568_v22 = vadd.f32 %v2932_v14, %v6417_v32  ;;  %v4534_v32 = vld [vmem:[%s7032_s7 + $0xb8] sm:$0xff] }
0x2077   :  { %v6571_v8 = vadd.f32 %v2931_v13, %v6419_v29  ;;  %v4546_v14 = vld [vmem:[%s7033_s9 + $0xb8] sm:$0xff]  ;;  %v4545_v13 = vld [vmem:[%s7033_s9 + $0xb0] sm:$0xff] }
0x2079   :  { %v5215_v23 = vpack.c.bf16 %v6568_v22, %v6571_v8 }
0x207b   :  { %5216 = vmatprep.subr.bf16.mxu0 %v5215_v23 }
0x207c   :  { %5218 = vmatpush3.bf16.msra.mxu0 %v5215_v23  ;;  %v4547_v23 = vld [vmem:[%s7035_s10 + $0xa0] sm:$0xff] }
0x207d   :  { %5018 = vmatprep.mubr.msk.f32.mxu1 %vm236_vm1, %v4547_v23 }
0x207f   :  { %5005 = vmatmul.mubr.msk.f32.vlgmr.msra.gmra.mrb[26].mxu0 %vm236_vm1, %v4532_v15 }
0x2080   :  { %5007 = vmatprep.mubr.msk.f32.mxu0 %vm236_vm1, %v4533_v27 }
0x2083   :  { %5008 = vmatmul.mubr.msk.f32.gmra.mrb[28].mxu0 %vm236_vm1, %v4534_v32 }
0x2152   :  { %v5006_v29 = vpop.f32.mrb[26].mxu0 }
0x2153   :  { %v3020_v28 = vpop.f32.mrb[27].mxu0  ;;  %v3052_v55 = vsel %vm2611_vm3, %v5006_v29, 0.0 }
0x2154   :  { %3053 = vadd.xlane.f32.xlu0 %v3052_v55  ;;  %v3049_v18 = vsel %vm2611_vm3, %v3020_v28, 0.0 }
0x2155   :  { %3050 = vadd.xlane.f32.xlu1 %v3049_v18 }
0x2156   :  { %v5009_v19 = vpop.f32.mrb[28].mxu0 }
0x2157   :  { %v3030_v20 = vpop.f32.mrb[29].mxu0  ;;  %v3058_v54 = vsel %vm2611_vm3, %v5009_v19, 0.0 }
0x2158   :  { %v3055_v48 = vsel %vm2611_vm3, %v3030_v20, 0.0 }
0x2159   :  { %3059 = vadd.xlane.f32.xlu1 %v3058_v54  ;;  %3056 = vadd.xlane.f32.xlu0 %v3055_v48 }
0x21e1   :  { %v3054_v24 = vpop.xlane.xlu0 %3053 }
0x21e2   :  { %v3062_v16 = vmul.f32 0.125, %v3054_v24  ;;  %v3051_v26 = vpop.xlane.xlu1 %3050 }
0x21e3   :  { %v3061_v37 = vmul.f32 0.125, %v3051_v26 }
0x21e4   :  { %v6591_v62 = vsub.f32 %v5006_v29, %v3062_v16 }
0x21e5   :  { %v6593_v30 = vsub.f32 %v3020_v28, %v3061_v37 }
0x21e6   :  { %v3060_v31 = vpop.xlane.xlu1 %3059  ;;  %v3057_v7 = vpop.xlane.xlu0 %3056  ;;  %v3070_v10 = vmul.f32 %v6591_v62, %v6591_v62 }
0x21e7   :  { %v3064_v33 = vmul.f32 0.125, %v3060_v31  ;;  %v3063_v40 = vmul.f32 0.125, %v3057_v7  ;;  %v3069_v43 = vmul.f32 %v6593_v30, %v6593_v30 }
0x21e8   :  { %v3076_v45 = vsel %vm2611_vm3, %v3070_v10, 0.0 }
0x21e9   :  { %v6600_v42 = vsub.f32 %v5009_v19, %v3064_v33  ;;  %v6602_v34 = vsub.f32 %v3030_v20, %v3063_v40  ;;  %3077 = vadd.xlane.f32.xlu1 %v3076_v45  ;;  %v3073_v35 = vsel %vm2611_vm3, %v3069_v43, 0.0  ;;  %v4548_v43 = vld [vmem:[%s7035_s10 + $0xa8] sm:$0xff]  ;;  %v4549_v45 = vld [vmem:[%s7035_s10 + $0xb0] sm:$0xff] }
0x21ea   :  { %3074 = vadd.xlane.f32.xlu0 %v3073_v35 }
0x21eb   :  { %v3072_v63 = vmul.f32 %v6600_v42, %v6600_v42  ;;  %v3071_v17 = vmul.f32 %v6602_v34, %v6602_v34 }
0x21ed   :  { %v3082_v36 = vsel %vm2611_vm3, %v3072_v63, 0.0  ;;  %v3079_v41 = vsel %vm2611_vm3, %v3071_v17, 0.0 }
0x21ee   :  { %3083 = vadd.xlane.f32.xlu1 %v3082_v36  ;;  %3080 = vadd.xlane.f32.xlu0 %v3079_v41 }
0x21ff   :  { %3127 = vperm.xlu1 %5273, %v4543_v39  }
0x2204   :  { %3132 = vperm.xlu0 %5274, %v4544_v44  }
0x2276   :  { %v3078_v52 = vpop.xlane.xlu1 %3077 }
0x2277   :  { %v3086_v21 = vmul.f32 0.125, %v3078_v52  ;;  %v3075_v38 = vpop.xlane.xlu0 %3074 }
0x2278   :  { %v3085_v46 = vmul.f32 0.125, %v3075_v38 }
0x2279   :  { %v3090_v25 = vadd.f32 1e-05, %v3086_v21 }
0x227a   :  { %v3089_v49 = vadd.f32 1e-05, %v3085_v46 }
0x227b   :  { %5383 = vrsqrt.f32 %v3090_v25  ;;  %v3084_v47 = vpop.xlane.xlu1 %3083  ;;  %v3081_v50 = vpop.xlane.xlu0 %3080 }
0x227c   :  { %5385 = vrsqrt.f32 %v3089_v49  ;;  %v3088_v51 = vmul.f32 0.125, %v3084_v47  ;;  %v3087_v56 = vmul.f32 0.125, %v3081_v50 }
0x227e   :  { %v3092_v57 = vadd.f32 1e-05, %v3088_v51  ;;  %v3091_v58 = vadd.f32 1e-05, %v3087_v56 }
0x227f   :  { %v3128_v15 = vpop.permute.xlu1 %3127 }
0x2280   :  { %5387 = vrsqrt.f32 %v3092_v57 }
0x2281   :  { %5389 = vrsqrt.f32 %v3091_v58 }
0x2283   :  { %v3133_v27 = vpop.permute.xlu0 %3132 }
0x2285   :  { %v5384_v60 = vpop.eup %5383 }
0x2286   :  { %v5386_v61 = vpop.eup %5385  ;;  %v3098_v0 = vmul.f32 %v5384_v60, %v4540_v59 }
0x2287   :  { %v3097_v4 = vmul.f32 %v5386_v61, %v4539_v53 }
0x2288   :  { %3108 = vperm.xlu1 %5273, %v3098_v0  }
0x2289   :  { %3103 = vperm.xlu0 %5274, %v3097_v4  }
0x228a   :  { %v5388_v12 = vpop.eup %5387 }
0x228b   :  { %v5390_v3 = vpop.eup %5389  ;;  %v3100_v11 = vmul.f32 %v5388_v12, %v4542_v2  ;;  %v4559_v12 = vld [vmem:[%s7036_s12 + $0xa0] sm:$0xff] }
0x228c   :  { %v3099_v6 = vmul.f32 %v5390_v3, %v4541_v9  ;;  %v4560_v3 = vld [vmem:[%s7036_s12 + $0xa8] sm:$0xff] }
0x228d   :  { %3118 = vperm.xlu0 %5274, %v3100_v11  }
0x228e   :  { %3113 = vperm.xlu1 %5273, %v3099_v6  }
0x2291   :  { %3142 = vperm.xlu0 %5274, %v4546_v14  }
0x2292   :  { %3137 = vperm.xlu1 %5273, %v4545_v13  }
0x2307   :  { %v3109_v32 = vpop.permute.xlu1 %3108 }
0x2308   :  { %v3122_v29 = vmul.f32 %v3109_v32, %v6591_v62  ;;  %v3104_v28 = vpop.permute.xlu0 %3103 }
0x2309   :  { %v3121_v55 = vmul.f32 %v3104_v28, %v6593_v30 }
0x230a   :  { %v3146_v18 = vadd.f32 %v3133_v27, %v3122_v29 }
0x230b   :  { %v3145_v19 = vadd.f32 %v3128_v15, %v3121_v55 }
0x230c   :  { %v3150_v20 = vmax.f32 %v3146_v18, 0.0  ;;  %v3119_v54 = vpop.permute.xlu0 %3118 }
0x230d   :  { %v3149_v48 = vmax.f32 %v3145_v19, 0.0  ;;  %v3114_v24 = vpop.permute.xlu1 %3113  ;;  %v3124_v16 = vmul.f32 %v3119_v54, %v6600_v42  ;;  %v4550_v42 = vld [vmem:[%s7035_s10 + $0xb8] sm:$0xff]  ;;  %v4556_v19 = vld [vmem:[%s7037_s11 + $0xa8] sm:$0xff] }
0x230e   :  { %v3123_v37 = vmul.f32 %v3114_v24, %v6602_v34 }
0x230f   :  { %v5219_v26 = vpack.c.bf16 %v3150_v20, %v3149_v48  ;;  %v4555_v20 = vld [vmem:[%s7037_s11 + $0xa0] sm:$0xff] }
0x2310   :  { %v3143_v31 = vpop.permute.xlu0 %3142 }
0x2311   :  { %v3138_v7 = vpop.permute.xlu1 %3137  ;;  %v3148_v10 = vadd.f32 %v3143_v31, %v3124_v16  ;;  %5220 = vmatprep.subr.bf16.mxu1 %v5219_v26 }
0x2312   :  { %v3147_v33 = vadd.f32 %v3138_v7, %v3123_v37  ;;  %5222 = vmatpush3.bf16.msra.mxu1 %v5219_v26  ;;  %v4558_v26 = vld [vmem:[%s7037_s11 + $0xb8] sm:$0xff]  ;;  %v4557_v37 = vld [vmem:[%s7037_s11 + $0xb0] sm:$0xff] }
0x2313   :  { %v3152_v62 = vmax.f32 %v3148_v10, 0.0 }
0x2314   :  { %v3151_v40 = vmax.f32 %v3147_v33, 0.0 }
0x2316   :  { %v5223_v30 = vpack.c.bf16 %v3152_v62, %v3151_v40  ;;  %v4562_v62 = vld [vmem:[%s7036_s12 + $0xb8] sm:$0xff]  ;;  %v4561_v40 = vld [vmem:[%s7036_s12 + $0xb0] sm:$0xff] }
0x2318   :  { %5224 = vmatprep.subr.bf16.mxu1 %v5223_v30 }
0x2319   :  { %5226 = vmatpush3.bf16.msra.mxu1 %v5223_v30 }
0x231c   :  { %5019 = vmatmul.mubr.msk.f32.vlgmr.msra.gmra.mrb[28].mxu1 %vm236_vm1, %v4548_v43 }
0x231d   :  { %5021 = vmatprep.mubr.msk.f32.mxu1 %vm236_vm1, %v4549_v45 }
0x2320   :  { %5022 = vmatmul.mubr.msk.f32.gmra.mrb[30].mxu1 %vm236_vm1, %v4550_v42 }
0x23ef   :  { %v5020_v34 = vpop.f32.mrb[28].mxu1 }
0x23f0   :  { %v3236_v35 = vpop.f32.mrb[29].mxu1  ;;  %v3268_v63 = vsel %vm2611_vm3, %v5020_v34, 0.0 }
0x23f1   :  { %3269 = vadd.xlane.f32.xlu0 %v3268_v63  ;;  %v3265_v17 = vsel %vm2611_vm3, %v3236_v35, 0.0 }
0x23f2   :  { %3266 = vadd.xlane.f32.xlu1 %v3265_v17 }
0x23f3   :  { %v5023_v36 = vpop.f32.mrb[30].mxu1 }
0x23f4   :  { %v3246_v41 = vpop.f32.mrb[31].mxu1  ;;  %v3274_v39 = vsel %vm2611_vm3, %v5023_v36, 0.0 }
0x23f5   :  { %v3271_v44 = vsel %vm2611_vm3, %v3246_v41, 0.0 }
0x23f6   :  { %3275 = vadd.xlane.f32.xlu1 %v3274_v39  ;;  %3272 = vadd.xlane.f32.xlu0 %v3271_v44 }
0x247e   :  { %v3270_v52 = vpop.xlane.xlu0 %3269 }
0x247f   :  { %v3278_v21 = vmul.f32 0.125, %v3270_v52  ;;  %v3267_v38 = vpop.xlane.xlu1 %3266 }
0x2480   :  { %v3277_v46 = vmul.f32 0.125, %v3267_v38 }
0x2481   :  { %v6659_v25 = vsub.f32 %v5020_v34, %v3278_v21 }
0x2482   :  { %v6661_v49 = vsub.f32 %v3236_v35, %v3277_v46 }
0x2483   :  { %v3276_v47 = vpop.xlane.xlu1 %3275  ;;  %v3273_v50 = vpop.xlane.xlu0 %3272  ;;  %v3286_v51 = vmul.f32 %v6659_v25, %v6659_v25 }
0x2484   :  { %v3280_v56 = vmul.f32 0.125, %v3276_v47  ;;  %v3279_v57 = vmul.f32 0.125, %v3273_v50  ;;  %v3285_v58 = vmul.f32 %v6661_v49, %v6661_v49 }
0x2485   :  { %v3292_v59 = vsel %vm2611_vm3, %v3286_v51, 0.0  ;;  %v4563_v51 = vld [vmem:[%s7032_s7 + $0xc0] sm:$0xff] }
0x2486   :  { %v6668_v53 = vsub.f32 %v5023_v36, %v3280_v56  ;;  %v6670_v60 = vsub.f32 %v3246_v41, %v3279_v57  ;;  %3293 = vadd.xlane.f32.xlu1 %v3292_v59  ;;  %v3289_v61 = vsel %vm2611_vm3, %v3285_v58, 0.0  ;;  %5032 = vmatprep.mubr.msk.f32.mxu0 %vm236_vm1, %v4563_v51  ;;  %v4572_v51 = vld [vmem:[%s7034_s8 + $0xc8] sm:$0xff] }
0x2487   :  { %3290 = vadd.xlane.f32.xlu0 %v3289_v61 }
0x2488   :  { %v3288_v0 = vmul.f32 %v6668_v53, %v6668_v53  ;;  %v3287_v4 = vmul.f32 %v6670_v60, %v6670_v60 }
0x248a   :  { %v3298_v2 = vsel %vm2611_vm3, %v3288_v0, 0.0  ;;  %v3295_v9 = vsel %vm2611_vm3, %v3287_v4, 0.0 }
0x248b   :  { %3299 = vadd.xlane.f32.xlu1 %v3298_v2  ;;  %3296 = vadd.xlane.f32.xlu0 %v3295_v9 }
0x249c   :  { %3343 = vperm.xlu1 %5273, %v4559_v12  }
0x24a1   :  { %3348 = vperm.xlu0 %5274, %v4560_v3  }
0x2513   :  { %v3294_v11 = vpop.xlane.xlu1 %3293 }
0x2514   :  { %v3302_v6 = vmul.f32 0.125, %v3294_v11  ;;  %v3291_v14 = vpop.xlane.xlu0 %3290 }
0x2515   :  { %v3301_v13 = vmul.f32 0.125, %v3291_v14  ;;  %v4565_v14 = vld [vmem:[%s7032_s7 + $0xd0] sm:$0xff] }
0x2516   :  { %v3306_v23 = vadd.f32 1e-05, %v3302_v6  ;;  %v4564_v6 = vld [vmem:[%s7032_s7 + $0xc8] sm:$0xff] }
0x2517   :  { %v3305_v15 = vadd.f32 1e-05, %v3301_v13  ;;  %v4566_v13 = vld [vmem:[%s7032_s7 + $0xd8] sm:$0xff] }
0x2518   :  { %5391 = vrsqrt.f32 %v3306_v23  ;;  %v3300_v27 = vpop.xlane.xlu1 %3299  ;;  %v3297_v32 = vpop.xlane.xlu0 %3296 }
0x2519   :  { %5393 = vrsqrt.f32 %v3305_v15  ;;  %v3304_v29 = vmul.f32 0.125, %v3300_v27  ;;  %v3303_v28 = vmul.f32 0.125, %v3297_v32 }
0x251b   :  { %v3308_v55 = vadd.f32 1e-05, %v3304_v29  ;;  %v3307_v18 = vadd.f32 1e-05, %v3303_v28 }
0x251c   :  { %v3344_v30 = vpop.permute.xlu1 %3343 }
0x251d   :  { %5395 = vrsqrt.f32 %v3308_v55 }
0x251e   :  { %5397 = vrsqrt.f32 %v3307_v18 }
0x2520   :  { %v3349_v43 = vpop.permute.xlu0 %3348 }
0x2522   :  { %v5392_v54 = vpop.eup %5391 }
0x2523   :  { %v5394_v48 = vpop.eup %5393  ;;  %v3314_v24 = vmul.f32 %v5392_v54, %v4556_v19 }
0x2524   :  { %v3313_v16 = vmul.f32 %v5394_v48, %v4555_v20 }
0x2525   :  { %3324 = vperm.xlu1 %5273, %v3314_v24  }
0x2526   :  { %3319 = vperm.xlu0 %5274, %v3313_v16  }
0x2527   :  { %v5396_v31 = vpop.eup %5395 }
0x2528   :  { %v5398_v7 = vpop.eup %5397  ;;  %v3316_v10 = vmul.f32 %v5396_v31, %v4558_v26 }
0x2529   :  { %v3315_v33 = vmul.f32 %v5398_v7, %v4557_v37 }
0x252a   :  { %3334 = vperm.xlu0 %5274, %v3316_v10  }
0x252b   :  { %3329 = vperm.xlu1 %5273, %v3315_v33  }
0x252e   :  { %3358 = vperm.xlu0 %5274, %v4562_v62  }
0x252f   :  { %3353 = vperm.xlu1 %5273, %v4561_v40  }
0x25a4   :  { %v3325_v45 = vpop.permute.xlu1 %3324 }
0x25a5   :  { %v3338_v42 = vmul.f32 %v3325_v45, %v6659_v25  ;;  %v3320_v34 = vpop.permute.xlu0 %3319 }
0x25a6   :  { %v3337_v35 = vmul.f32 %v3320_v34, %v6661_v49 }
0x25a7   :  { %v3362_v63 = vadd.f32 %v3349_v43, %v3338_v42 }
0x25a8   :  { %v3361_v17 = vadd.f32 %v3344_v30, %v3337_v35 }
0x25a9   :  { %v3366_v36 = vmax.f32 %v3362_v63, 0.0  ;;  %v3335_v41 = vpop.permute.xlu0 %3334  ;;  %v4575_v63 = vld [vmem:[%s7033_s9 + $0xc0] sm:$0xff] }
0x25aa   :  { %v3365_v39 = vmax.f32 %v3361_v17, 0.0  ;;  %v3330_v44 = vpop.permute.xlu1 %3329  ;;  %v3340_v38 = vmul.f32 %v3335_v41, %v6668_v53  ;;  %v4576_v17 = vld [vmem:[%s7033_s9 + $0xc8] sm:$0xff] }
0x25ab   :  { %v3370_v52 = vadd.f32 %v3366_v36, %v6558_v1  ;;  %v3339_v46 = vmul.f32 %v3330_v44, %v6670_v60 }
0x25ac   :  { %v3369_v21 = vadd.f32 %v3365_v39, %v6562_v5 }
0x25ad   :  { %3379 = vrot.lane.b32.xlu0 %v3370_v52, %s5434_s20  ;;  %v3359_v25 = vpop.permute.xlu0 %3358 }
0x25ae   :  { %v3354_v47 = vpop.permute.xlu1 %3353  ;;  %v3364_v50 = vadd.f32 %v3359_v25, %v3340_v38  ;;  %3377 = vrot.lane.b32.xlu1 %v3369_v21, %s5434_s20 }
0x25af   :  { %v3363_v49 = vadd.f32 %v3354_v47, %v3339_v46 }
0x25b0   :  { %v3368_v56 = vmax.f32 %v3364_v50, 0.0 }
0x25b1   :  { %v3367_v1 = vmax.f32 %v3363_v49, 0.0 }
0x25b2   :  { %v3372_v5 = vadd.f32 %v3368_v56, %v6568_v22  ;;  %v4571_v56 = vld [vmem:[%s7034_s8 + $0xc0] sm:$0xff] }
0x25b3   :  { %v3371_v57 = vadd.f32 %v3367_v1, %v6571_v8 }
0x25b4   :  { %3383 = vrot.lane.b32.xlu0 %v3372_v5, %s5434_s20 }
0x25b5   :  { %3381 = vrot.lane.b32.xlu1 %v3371_v57, %s5434_s20 }
0x261f   :  { %v3380_v58 = vpop.permute.xlu0 %3379 }
0x2620   :  { %v3390_v59 = vadd.f32 %v3380_v58, %v3370_v52  ;;  %v3378_v53 = vpop.permute.xlu1 %3377 }
0x2621   :  { %v3389_v60 = vadd.f32 %v3378_v53, %v3369_v21  ;;  %v4573_v53 = vld [vmem:[%s7034_s8 + $0xd0] sm:$0xff] }
0x2622   :  { %v6715_v61 = vmul.f32 0.5, %v3390_v59  ;;  %v4574_v59 = vld [vmem:[%s7034_s8 + $0xd8] sm:$0xff] }
0x2623   :  { %v6717_v0 = vmul.f32 0.5, %v3389_v60 }
0x2625   :  { %v5227_v4 = vpack.c.bf16 %v6715_v61, %v6717_v0 }
0x2626   :  { %v3384_v2 = vpop.permute.xlu0 %3383 }
0x2627   :  { %v3382_v9 = vpop.permute.xlu1 %3381  ;;  %v3392_v12 = vadd.f32 %v3384_v2, %v3372_v5  ;;  %5228 = vmatprep.subr.bf16.mxu0 %v5227_v4 }
0x2628   :  { %v3391_v22 = vadd.f32 %v3382_v9, %v3371_v57  ;;  %5230 = vmatpush3.bf16.msra.mxu0 %v5227_v4 }
0x2629   :  { %v6721_v8 = vmul.f32 0.5, %v3392_v12  ;;  %v4578_v12 = vld [vmem:[%s7033_s9 + $0xd8] sm:$0xff] }
0x262a   :  { %v6723_v3 = vmul.f32 0.5, %v3391_v22  ;;  %v4577_v22 = vld [vmem:[%s7033_s9 + $0xd0] sm:$0xff] }
0x262c   :  { %v5231_v11 = vpack.c.bf16 %v6721_v8, %v6723_v3 }
0x262e   :  { %5232 = vmatprep.subr.bf16.mxu0 %v5231_v11 }
0x262f   :  { %5234 = vmatpush3.bf16.msra.mxu0 %v5231_v11  ;;  %v4579_v11 = vld [vmem:[%s7035_s10 + $0xc0] sm:$0xff] }
0x2630   :  { %5046 = vmatprep.mubr.msk.f32.mxu1 %vm236_vm1, %v4579_v11 }
0x2632   :  { %5033 = vmatmul.mubr.msk.f32.vlgmr.msra.gmra.mrb[30].mxu0 %vm236_vm1, %v4564_v6 }
0x2633   :  { %5035 = vmatprep.mubr.msk.f32.mxu0 %vm236_vm1, %v4565_v14 }
0x2636   :  { %5036 = vmatmul.mubr.msk.f32.gmra.mrb[32].mxu0 %vm236_vm1, %v4566_v13 }
0x2705   :  { %v5034_v23 = vpop.f32.mrb[30].mxu0 }
0x2706   :  { %v3480_v15 = vpop.f32.mrb[31].mxu0  ;;  %v3513_v27 = vsel %vm3509_vm4, %v5034_v23, 0.0 }
0x2707   :  { %3514 = vadd.xlane.f32.xlu0 %v3513_v27  ;;  %v3510_v32 = vsel %vm3509_vm4, %v3480_v15, 0.0 }
0x2708   :  { %3511 = vadd.xlane.f32.xlu1 %v3510_v32 }
0x2709   :  { %v5037_v29 = vpop.f32.mrb[32].mxu0 }
0x270a   :  { %v3490_v28 = vpop.f32.mrb[33].mxu0  ;;  %v3519_v55 = vsel %vm3509_vm4, %v5037_v29, 0.0 }
0x270b   :  { %v3516_v18 = vsel %vm3509_vm4, %v3490_v28, 0.0 }
0x270c   :  { %3520 = vadd.xlane.f32.xlu1 %v3519_v55  ;;  %3517 = vadd.xlane.f32.xlu0 %v3516_v18 }
0x2794   :  { %v3515_v19 = vpop.xlane.xlu0 %3514 }
0x2795   :  { %v3524_v20 = vmul.f32 0.25, %v3515_v19  ;;  %v3512_v54 = vpop.xlane.xlu1 %3511 }
0x2796   :  { %v3523_v48 = vmul.f32 0.25, %v3512_v54 }
0x2797   :  { %v6743_v24 = vsub.f32 %v5034_v23, %v3524_v20 }
0x2798   :  { %v6745_v16 = vsub.f32 %v3480_v15, %v3523_v48 }
0x2799   :  { %v3521_v26 = vpop.xlane.xlu1 %3520  ;;  %v3518_v37 = vpop.xlane.xlu0 %3517  ;;  %v3532_v31 = vmul.f32 %v6743_v24, %v6743_v24 }
0x279a   :  { %v3526_v7 = vmul.f32 0.25, %v3521_v26  ;;  %v3525_v10 = vmul.f32 0.25, %v3518_v37  ;;  %v3531_v33 = vmul.f32 %v6745_v16, %v6745_v16 }
0x279b   :  { %v3538_v62 = vsel %vm3509_vm4, %v3532_v31, 0.0 }
0x279c   :  { %v6752_v40 = vsub.f32 %v5037_v29, %v3526_v7  ;;  %v6754_v30 = vsub.f32 %v3490_v28, %v3525_v10  ;;  %3539 = vadd.xlane.f32.xlu1 %v3538_v62  ;;  %v3535_v43 = vsel %vm3509_vm4, %v3531_v33, 0.0  ;;  %v4580_v33 = vld [vmem:[%s7035_s10 + $0xc8] sm:$0xff]  ;;  %v4581_v62 = vld [vmem:[%s7035_s10 + $0xd0] sm:$0xff] }
0x279d   :  { %3536 = vadd.xlane.f32.xlu0 %v3535_v43 }
0x279e   :  { %v3534_v45 = vmul.f32 %v6752_v40, %v6752_v40  ;;  %v3533_v42 = vmul.f32 %v6754_v30, %v6754_v30 }
0x27a0   :  { %v3544_v34 = vsel %vm3509_vm4, %v3534_v45, 0.0  ;;  %v3541_v35 = vsel %vm3509_vm4, %v3533_v42, 0.0 }
0x27a1   :  { %3545 = vadd.xlane.f32.xlu1 %v3544_v34  ;;  %3542 = vadd.xlane.f32.xlu0 %v3541_v35 }
0x27b2   :  { %3589 = vperm.xlu1 %5273, %v4575_v63  }
0x27b7   :  { %3594 = vperm.xlu0 %5274, %v4576_v17  }
0x2829   :  { %v3540_v36 = vpop.xlane.xlu1 %3539 }
0x282a   :  { %v3548_v41 = vmul.f32 0.25, %v3540_v36  ;;  %v3537_v39 = vpop.xlane.xlu0 %3536 }
0x282b   :  { %v3547_v44 = vmul.f32 0.25, %v3537_v39 }
0x282c   :  { %v3552_v52 = vadd.f32 1e-05, %v3548_v41 }
0x282d   :  { %v3551_v21 = vadd.f32 1e-05, %v3547_v44 }
0x282e   :  { %5399 = vrsqrt.f32 %v3552_v52  ;;  %v3546_v38 = vpop.xlane.xlu1 %3545  ;;  %v3543_v46 = vpop.xlane.xlu0 %3542 }
0x282f   :  { %5401 = vrsqrt.f32 %v3551_v21  ;;  %v3550_v25 = vmul.f32 0.25, %v3546_v38  ;;  %v3549_v47 = vmul.f32 0.25, %v3543_v46 }
0x2831   :  { %v3554_v50 = vadd.f32 1e-05, %v3550_v25  ;;  %v3553_v49 = vadd.f32 1e-05, %v3549_v47 }
0x2832   :  { %v3590_v6 = vpop.permute.xlu1 %3589 }
0x2833   :  { %5403 = vrsqrt.f32 %v3554_v50 }
0x2834   :  { %5405 = vrsqrt.f32 %v3553_v49 }
0x2836   :  { %v3595_v14 = vpop.permute.xlu0 %3594 }
0x2838   :  { %v5400_v1 = vpop.eup %5399 }
0x2839   :  { %v5402_v5 = vpop.eup %5401  ;;  %v3560_v57 = vmul.f32 %v5400_v1, %v4572_v51 }
0x283a   :  { %v3559_v58 = vmul.f32 %v5402_v5, %v4571_v56 }
0x283b   :  { %3570 = vperm.xlu1 %5273, %v3560_v57  }
0x283c   :  { %3565 = vperm.xlu0 %5274, %v3559_v58  }
0x283d   :  { %v5404_v60 = vpop.eup %5403 }
0x283e   :  { %v5406_v4 = vpop.eup %5405  ;;  %v3562_v2 = vmul.f32 %v5404_v60, %v4574_v59  ;;  %v4591_v60 = vld [vmem:[%s7036_s12 + $0xc0] sm:$0xff] }
0x283f   :  { %v3561_v9 = vmul.f32 %v5406_v4, %v4573_v53  ;;  %v4592_v4 = vld [vmem:[%s7036_s12 + $0xc8] sm:$0xff] }
0x2840   :  { %3580 = vperm.xlu0 %5274, %v3562_v2  }
0x2841   :  { %3575 = vperm.xlu1 %5273, %v3561_v9  }
0x2844   :  { %3604 = vperm.xlu0 %5274, %v4578_v12  }
0x2845   :  { %3599 = vperm.xlu1 %5273, %v4577_v22  }
0x28ba   :  { %v3571_v13 = vpop.permute.xlu1 %3570 }
0x28bb   :  { %v3584_v23 = vmul.f32 %v3571_v13, %v6743_v24  ;;  %v3566_v15 = vpop.permute.xlu0 %3565 }
0x28bc   :  { %v3583_v27 = vmul.f32 %v3566_v15, %v6745_v16 }
0x28bd   :  { %v3608_v32 = vadd.f32 %v3595_v14, %v3584_v23 }
0x28be   :  { %v3607_v29 = vadd.f32 %v3590_v6, %v3583_v27 }
0x28bf   :  { %v3612_v28 = vmax.f32 %v3608_v32, 0.0  ;;  %v3581_v55 = vpop.permute.xlu0 %3580 }
0x28c0   :  { %v3611_v18 = vmax.f32 %v3607_v29, 0.0  ;;  %v3576_v19 = vpop.permute.xlu1 %3575  ;;  %v3586_v20 = vmul.f32 %v3581_v55, %v6752_v40  ;;  %v4582_v40 = vld [vmem:[%s7035_s10 + $0xd8] sm:$0xff]  ;;  %v4588_v29 = vld [vmem:[%s7037_s11 + $0xc8] sm:$0xff] }
0x28c1   :  { %v3585_v48 = vmul.f32 %v3576_v19, %v6754_v30 }
0x28c2   :  { %v5235_v54 = vpack.c.bf16 %v3612_v28, %v3611_v18  ;;  %v4587_v28 = vld [vmem:[%s7037_s11 + $0xc0] sm:$0xff] }
0x28c3   :  { %v3605_v26 = vpop.permute.xlu0 %3604 }
0x28c4   :  { %v3600_v37 = vpop.permute.xlu1 %3599  ;;  %v3610_v31 = vadd.f32 %v3605_v26, %v3586_v20  ;;  %5236 = vmatprep.subr.bf16.mxu1 %v5235_v54 }
0x28c5   :  { %v3609_v7 = vadd.f32 %v3600_v37, %v3585_v48  ;;  %5238 = vmatpush3.bf16.msra.mxu1 %v5235_v54  ;;  %v4590_v54 = vld [vmem:[%s7037_s11 + $0xd8] sm:$0xff]  ;;  %v4589_v48 = vld [vmem:[%s7037_s11 + $0xd0] sm:$0xff] }
0x28c6   :  { %v3614_v24 = vmax.f32 %v3610_v31, 0.0 }
0x28c7   :  { %v3613_v10 = vmax.f32 %v3609_v7, 0.0 }
0x28c9   :  { %v5239_v16 = vpack.c.bf16 %v3614_v24, %v3613_v10  ;;  %v4594_v24 = vld [vmem:[%s7036_s12 + $0xd8] sm:$0xff]  ;;  %v4593_v10 = vld [vmem:[%s7036_s12 + $0xd0] sm:$0xff] }
0x28cb   :  { %5240 = vmatprep.subr.bf16.mxu1 %v5239_v16 }
0x28cc   :  { %5242 = vmatpush3.bf16.msra.mxu1 %v5239_v16  ;;  %v4595_v16 = vld [vmem:[%s7032_s7 + $0xe0] sm:$0xff] }
0x28cd   :  { %5060 = vmatprep.mubr.msk.f32.mxu0 %vm236_vm1, %v4595_v16 }
0x28cf   :  { %5047 = vmatmul.mubr.msk.f32.vlgmr.msra.gmra.mrb[32].mxu1 %vm236_vm1, %v4580_v33 }
0x28d0   :  { %5049 = vmatprep.mubr.msk.f32.mxu1 %vm236_vm1, %v4581_v62 }
0x28d3   :  { %5050 = vmatmul.mubr.msk.f32.gmra.mrb[34].mxu1 %vm236_vm1, %v4582_v40 }
0x29a2   :  { %v5048_v30 = vpop.f32.mrb[32].mxu1 }
0x29a3   :  { %v3698_v43 = vpop.f32.mrb[33].mxu1  ;;  %v3730_v45 = vsel %vm3509_vm4, %v5048_v30, 0.0 }
0x29a4   :  { %3731 = vadd.xlane.f32.xlu0 %v3730_v45  ;;  %v3727_v42 = vsel %vm3509_vm4, %v3698_v43, 0.0 }
0x29a5   :  { %3728 = vadd.xlane.f32.xlu1 %v3727_v42 }
0x29a6   :  { %v5051_v34 = vpop.f32.mrb[34].mxu1 }
0x29a7   :  { %v3708_v35 = vpop.f32.mrb[35].mxu1  ;;  %v3736_v63 = vsel %vm3509_vm4, %v5051_v34, 0.0 }
0x29a8   :  { %v3733_v17 = vsel %vm3509_vm4, %v3708_v35, 0.0 }
0x29a9   :  { %3737 = vadd.xlane.f32.xlu1 %v3736_v63  ;;  %3734 = vadd.xlane.f32.xlu0 %v3733_v17 }
0x2a31   :  { %v3732_v36 = vpop.xlane.xlu0 %3731 }
0x2a32   :  { %v3740_v41 = vmul.f32 0.25, %v3732_v36  ;;  %v3729_v39 = vpop.xlane.xlu1 %3728 }
0x2a33   :  { %v3739_v44 = vmul.f32 0.25, %v3729_v39 }
0x2a34   :  { %v6811_v52 = vsub.f32 %v5048_v30, %v3740_v41 }
0x2a35   :  { %v6813_v21 = vsub.f32 %v3698_v43, %v3739_v44 }
0x2a36   :  { %v3738_v38 = vpop.xlane.xlu1 %3737  ;;  %v3735_v46 = vpop.xlane.xlu0 %3734  ;;  %v3748_v25 = vmul.f32 %v6811_v52, %v6811_v52 }
0x2a37   :  { %v3742_v47 = vmul.f32 0.25, %v3738_v38  ;;  %v3741_v50 = vmul.f32 0.25, %v3735_v46  ;;  %v3747_v49 = vmul.f32 %v6813_v21, %v6813_v21 }
0x2a38   :  { %v3754_v51 = vsel %vm3509_vm4, %v3748_v25, 0.0 }
0x2a39   :  { %v6820_v56 = vsub.f32 %v5051_v34, %v3742_v47  ;;  %v6822_v1 = vsub.f32 %v3708_v35, %v3741_v50  ;;  %3755 = vadd.xlane.f32.xlu1 %v3754_v51  ;;  %v3751_v5 = vsel %vm3509_vm4, %v3747_v49, 0.0 }
0x2a3a   :  { %3752 = vadd.xlane.f32.xlu0 %v3751_v5 }
0x2a3b   :  { %v3750_v57 = vmul.f32 %v6820_v56, %v6820_v56  ;;  %v3749_v58 = vmul.f32 %v6822_v1, %v6822_v1 }
0x2a3d   :  { %v3760_v59 = vsel %vm3509_vm4, %v3750_v57, 0.0  ;;  %v3757_v53 = vsel %vm3509_vm4, %v3749_v58, 0.0 }
0x2a3e   :  { %3761 = vadd.xlane.f32.xlu1 %v3760_v59  ;;  %3758 = vadd.xlane.f32.xlu0 %v3757_v53 }
0x2a4f   :  { %3805 = vperm.xlu1 %5273, %v4591_v60  }
0x2a54   :  { %3810 = vperm.xlu0 %5274, %v4592_v4  }
0x2ac6   :  { %v3756_v2 = vpop.xlane.xlu1 %3755 }
0x2ac7   :  { %v3764_v9 = vmul.f32 0.25, %v3756_v2  ;;  %v3753_v12 = vpop.xlane.xlu0 %3752 }
0x2ac8   :  { %v3763_v22 = vmul.f32 0.25, %v3753_v12 }
0x2ac9   :  { %v3768_v11 = vadd.f32 1e-05, %v3764_v9 }
0x2aca   :  { %v3767_v6 = vadd.f32 1e-05, %v3763_v22 }
0x2acb   :  { %5407 = vrsqrt.f32 %v3768_v11  ;;  %v3762_v14 = vpop.xlane.xlu1 %3761  ;;  %v3759_v13 = vpop.xlane.xlu0 %3758 }
0x2acc   :  { %5409 = vrsqrt.f32 %v3767_v6  ;;  %v3766_v23 = vmul.f32 0.25, %v3762_v14  ;;  %v3765_v15 = vmul.f32 0.25, %v3759_v13 }
0x2ace   :  { %v3770_v27 = vadd.f32 1e-05, %v3766_v23  ;;  %v3769_v32 = vadd.f32 1e-05, %v3765_v15 }
0x2acf   :  { %v3806_v33 = vpop.permute.xlu1 %3805 }
0x2ad0   :  { %5411 = vrsqrt.f32 %v3770_v27 }
0x2ad1   :  { %5413 = vrsqrt.f32 %v3769_v32 }
0x2ad3   :  { %v3811_v62 = vpop.permute.xlu0 %3810 }
0x2ad5   :  { %v5408_v55 = vpop.eup %5407 }
0x2ad6   :  { %v5410_v18 = vpop.eup %5409  ;;  %v3776_v19 = vmul.f32 %v5408_v55, %v4588_v29 }
0x2ad7   :  { %v3775_v20 = vmul.f32 %v5410_v18, %v4587_v28 }
0x2ad8   :  { %3786 = vperm.xlu1 %5273, %v3776_v19  }
0x2ad9   :  { %3781 = vperm.xlu0 %5274, %v3775_v20  }
0x2ada   :  { %v5412_v26 = vpop.eup %5411 }
0x2adb   :  { %v5414_v37 = vpop.eup %5413  ;;  %v3778_v31 = vmul.f32 %v5412_v26, %v4590_v54  ;;  %v4607_v26 = vld [vmem:[%s7033_s9 + $0xe0] sm:$0xff] }
0x2adc   :  { %v3777_v7 = vmul.f32 %v5414_v37, %v4589_v48  ;;  %v4608_v37 = vld [vmem:[%s7033_s9 + $0xe8] sm:$0xff] }
0x2add   :  { %3796 = vperm.xlu0 %5274, %v3778_v31  }
0x2ade   :  { %3791 = vperm.xlu1 %5273, %v3777_v7  }
0x2ae1   :  { %3820 = vperm.xlu0 %5274, %v4594_v24  }
0x2ae2   :  { %3815 = vperm.xlu1 %5273, %v4593_v10  }
0x2b57   :  { %v3787_v40 = vpop.permute.xlu1 %3786 }
0x2b58   :  { %v3800_v30 = vmul.f32 %v3787_v40, %v6811_v52  ;;  %v3782_v43 = vpop.permute.xlu0 %3781 }
0x2b59   :  { %v3799_v45 = vmul.f32 %v3782_v43, %v6813_v21 }
0x2b5a   :  { %v3824_v42 = vadd.f32 %v3811_v62, %v3800_v30 }
0x2b5b   :  { %v3823_v34 = vadd.f32 %v3806_v33, %v3799_v45 }
0x2b5c   :  { %v3828_v35 = vmax.f32 %v3824_v42, 0.0  ;;  %v3797_v63 = vpop.permute.xlu0 %3796 }
0x2b5d   :  { %v3827_v17 = vmax.f32 %v3823_v34, 0.0  ;;  %v3792_v36 = vpop.permute.xlu1 %3791  ;;  %v3802_v44 = vmul.f32 %v3797_v63, %v6820_v56  ;;  %v4596_v56 = vld [vmem:[%s7032_s7 + $0xe8] sm:$0xff] }
0x2b5e   :  { %v6862_v41 = vadd.f32 %v3828_v35, %v6715_v61  ;;  %v3801_v38 = vmul.f32 %v3792_v36, %v6822_v1  ;;  %v4597_v1 = vld [vmem:[%s7032_s7 + $0xf0] sm:$0xff]  ;;  %v4604_v34 = vld [vmem:[%s7034_s8 + $0xe8] sm:$0xff]  ;;  %v4603_v35 = vld [vmem:[%s7034_s8 + $0xe0] sm:$0xff] }
0x2b5f   :  { %v6865_v39 = vadd.f32 %v3827_v17, %v6717_v0 }
0x2b60   :  { %v3821_v52 = vpop.permute.xlu0 %3820 }
0x2b61   :  { %v3816_v46 = vpop.permute.xlu1 %3815  ;;  %v3826_v25 = vadd.f32 %v3821_v52, %v3802_v44  ;;  %v5243_v21 = vpack.c.bf16 %v6862_v41, %v6865_v39  ;;  %v4605_v52 = vld [vmem:[%s7034_s8 + $0xf0] sm:$0xff] }
0x2b62   :  { %v3825_v47 = vadd.f32 %v3816_v46, %v3801_v38  ;;  %v4606_v38 = vld [vmem:[%s7034_s8 + $0xf8] sm:$0xff] }
0x2b63   :  { %v3830_v50 = vmax.f32 %v3826_v25, 0.0  ;;  %5244 = vmatprep.subr.bf16.mxu0 %v5243_v21 }
0x2b64   :  { %v3829_v49 = vmax.f32 %v3825_v47, 0.0  ;;  %5246 = vmatpush3.bf16.msra.mxu0 %v5243_v21 }
0x2b65   :  { %v6872_v61 = vadd.f32 %v3830_v50, %v6721_v8  ;;  %v4598_v8 = vld [vmem:[%s7032_s7 + $0xf8] sm:$0xff] }
0x2b66   :  { %v6875_v0 = vadd.f32 %v3829_v49, %v6723_v3  ;;  %v4610_v50 = vld [vmem:[%s7033_s9 + $0xf8] sm:$0xff]  ;;  %v4609_v49 = vld [vmem:[%s7033_s9 + $0xf0] sm:$0xff] }
0x2b68   :  { %v5247_v51 = vpack.c.bf16 %v6872_v61, %v6875_v0 }
0x2b6a   :  { %5248 = vmatprep.subr.bf16.mxu0 %v5247_v51 }
0x2b6b   :  { %5250 = vmatpush3.bf16.msra.mxu0 %v5247_v51  ;;  %v4611_v51 = vld [vmem:[%s7035_s10 + $0xe0] sm:$0xff] }
0x2b6c   :  { %5074 = vmatprep.mubr.msk.f32.mxu1 %vm236_vm1, %v4611_v51 }
0x2b6e   :  { %5061 = vmatmul.mubr.msk.f32.vlgmr.msra.gmra.mrb[34].mxu0 %vm236_vm1, %v4596_v56 }
0x2b6f   :  { %5063 = vmatprep.mubr.msk.f32.mxu0 %vm236_vm1, %v4597_v1 }
0x2b72   :  { %5064 = vmatmul.mubr.msk.f32.gmra.mrb[36].mxu0 %vm236_vm1, %v4598_v8 }
0x2c41   :  { %v5062_v3 = vpop.f32.mrb[34].mxu0 }
0x2c42   :  { %v3918_v5 = vpop.f32.mrb[35].mxu0  ;;  %v3950_v57 = vsel %vm3509_vm4, %v5062_v3, 0.0 }
0x2c43   :  { %3951 = vadd.xlane.f32.xlu0 %v3950_v57  ;;  %v3947_v58 = vsel %vm3509_vm4, %v3918_v5, 0.0 }
0x2c44   :  { %3948 = vadd.xlane.f32.xlu1 %v3947_v58 }
0x2c45   :  { %v5065_v59 = vpop.f32.mrb[36].mxu0 }
0x2c46   :  { %v3928_v53 = vpop.f32.mrb[37].mxu0  ;;  %v3956_v60 = vsel %vm3509_vm4, %v5065_v59, 0.0 }
0x2c47   :  { %v3953_v4 = vsel %vm3509_vm4, %v3928_v53, 0.0 }
0x2c48   :  { %3957 = vadd.xlane.f32.xlu1 %v3956_v60  ;;  %3954 = vadd.xlane.f32.xlu0 %v3953_v4 }
0x2cd0   :  { %v3952_v2 = vpop.xlane.xlu0 %3951 }
0x2cd1   :  { %v3960_v9 = vmul.f32 0.25, %v3952_v2  ;;  %v3949_v12 = vpop.xlane.xlu1 %3948 }
0x2cd2   :  { %v3959_v22 = vmul.f32 0.25, %v3949_v12 }
0x2cd3   :  { %v6895_v11 = vsub.f32 %v5062_v3, %v3960_v9 }
0x2cd4   :  { %v6897_v6 = vsub.f32 %v3918_v5, %v3959_v22 }
0x2cd5   :  { %v3958_v14 = vpop.xlane.xlu1 %3957  ;;  %v3955_v13 = vpop.xlane.xlu0 %3954  ;;  %v3968_v23 = vmul.f32 %v6895_v11, %v6895_v11 }
0x2cd6   :  { %v3962_v15 = vmul.f32 0.25, %v3958_v14  ;;  %v3961_v27 = vmul.f32 0.25, %v3955_v13  ;;  %v3967_v32 = vmul.f32 %v6897_v6, %v6897_v6 }
0x2cd7   :  { %v3974_v29 = vsel %vm3509_vm4, %v3968_v23, 0.0 }
0x2cd8   :  { %v6904_v28 = vsub.f32 %v5065_v59, %v3962_v15  ;;  %v6906_v55 = vsub.f32 %v3928_v53, %v3961_v27  ;;  %3975 = vadd.xlane.f32.xlu1 %v3974_v29  ;;  %v3971_v18 = vsel %vm3509_vm4, %v3967_v32, 0.0  ;;  %v4612_v32 = vld [vmem:[%s7035_s10 + $0xe8] sm:$0xff]  ;;  %v4613_v29 = vld [vmem:[%s7035_s10 + $0xf0] sm:$0xff] }
0x2cd9   :  { %3972 = vadd.xlane.f32.xlu0 %v3971_v18 }
0x2cda   :  { %v3970_v19 = vmul.f32 %v6904_v28, %v6904_v28  ;;  %v3969_v20 = vmul.f32 %v6906_v55, %v6906_v55 }
0x2cdc   :  { %v3980_v54 = vsel %vm3509_vm4, %v3970_v19, 0.0  ;;  %v3977_v48 = vsel %vm3509_vm4, %v3969_v20, 0.0 }
0x2cdd   :  { %3981 = vadd.xlane.f32.xlu1 %v3980_v54  ;;  %3978 = vadd.xlane.f32.xlu0 %v3977_v48 }
0x2cee   :  { %4025 = vperm.xlu1 %5273, %v4607_v26  }
0x2cf3   :  { %4030 = vperm.xlu0 %5274, %v4608_v37  }
0x2d65   :  { %v3976_v31 = vpop.xlane.xlu1 %3975 }
0x2d66   :  { %v3984_v7 = vmul.f32 0.25, %v3976_v31  ;;  %v3973_v24 = vpop.xlane.xlu0 %3972 }
0x2d67   :  { %v3983_v10 = vmul.f32 0.25, %v3973_v24 }
0x2d68   :  { %v3988_v16 = vadd.f32 1e-05, %v3984_v7 }
0x2d69   :  { %v3987_v33 = vadd.f32 1e-05, %v3983_v10 }
0x2d6a   :  { %5415 = vrsqrt.f32 %v3988_v16  ;;  %v3982_v62 = vpop.xlane.xlu1 %3981  ;;  %v3979_v40 = vpop.xlane.xlu0 %3978 }
0x2d6b   :  { %5417 = vrsqrt.f32 %v3987_v33  ;;  %v3986_v30 = vmul.f32 0.25, %v3982_v62  ;;  %v3985_v43 = vmul.f32 0.25, %v3979_v40 }
0x2d6d   :  { %v3990_v45 = vadd.f32 1e-05, %v3986_v30  ;;  %v3989_v42 = vadd.f32 1e-05, %v3985_v43 }
0x2d6e   :  { %v4026_v56 = vpop.permute.xlu1 %4025 }
0x2d6f   :  { %5419 = vrsqrt.f32 %v3990_v45 }
0x2d70   :  { %5421 = vrsqrt.f32 %v3989_v42 }
0x2d72   :  { %v4031_v1 = vpop.permute.xlu0 %4030 }
0x2d74   :  { %v5416_v63 = vpop.eup %5415 }
0x2d75   :  { %v5418_v17 = vpop.eup %5417  ;;  %v3996_v36 = vmul.f32 %v5416_v63, %v4604_v34 }
0x2d76   :  { %v3995_v44 = vmul.f32 %v5418_v17, %v4603_v35 }
0x2d77   :  { %4006 = vperm.xlu1 %5273, %v3996_v36  }
0x2d78   :  { %4001 = vperm.xlu0 %5274, %v3995_v44  }
0x2d79   :  { %v5420_v46 = vpop.eup %5419 }
0x2d7a   :  { %v5422_v25 = vpop.eup %5421  ;;  %v3998_v21 = vmul.f32 %v5420_v46, %v4606_v38  ;;  %v4623_v46 = vld [vmem:[%s7036_s12 + $0xe0] sm:$0xff] }
0x2d7b   :  { %v3997_v47 = vmul.f32 %v5422_v25, %v4605_v52  ;;  %v4624_v25 = vld [vmem:[%s7036_s12 + $0xe8] sm:$0xff] }
0x2d7c   :  { %4016 = vperm.xlu0 %5274, %v3998_v21  }
0x2d7d   :  { %4011 = vperm.xlu1 %5273, %v3997_v47  }
0x2d80   :  { %4040 = vperm.xlu0 %5274, %v4610_v50  }
0x2d81   :  { %4035 = vperm.xlu1 %5273, %v4609_v49  }
0x2df6   :  { %v4007_v8 = vpop.permute.xlu1 %4006 }
0x2df7   :  { %v4020_v3 = vmul.f32 %v4007_v8, %v6895_v11  ;;  %v4002_v5 = vpop.permute.xlu0 %4001 }
0x2df8   :  { %v4019_v57 = vmul.f32 %v4002_v5, %v6897_v6 }
0x2df9   :  { %v4044_v58 = vadd.f32 %v4031_v1, %v4020_v3 }
0x2dfa   :  { %v4043_v59 = vadd.f32 %v4026_v56, %v4019_v57 }
0x2dfb   :  { %v4048_v53 = vmax.f32 %v4044_v58, 0.0  ;;  %v4017_v60 = vpop.permute.xlu0 %4016 }
0x2dfc   :  { %v4047_v4 = vmax.f32 %v4043_v59, 0.0  ;;  %v4012_v2 = vpop.permute.xlu1 %4011  ;;  %v4022_v9 = vmul.f32 %v4017_v60, %v6904_v28  ;;  %v4614_v28 = vld [vmem:[%s7035_s10 + $0xf8] sm:$0xff]  ;;  %v4620_v59 = vld [vmem:[%s7037_s11 + $0xe8] sm:$0xff] }
0x2dfd   :  { %v4021_v22 = vmul.f32 %v4012_v2, %v6906_v55 }
0x2dfe   :  { %v5251_v12 = vpack.c.bf16 %v4048_v53, %v4047_v4  ;;  %v4619_v53 = vld [vmem:[%s7037_s11 + $0xe0] sm:$0xff] }
0x2dff   :  { %v4041_v14 = vpop.permute.xlu0 %4040 }
0x2e00   :  { %v4036_v13 = vpop.permute.xlu1 %4035  ;;  %v4046_v23 = vadd.f32 %v4041_v14, %v4022_v9  ;;  %5252 = vmatprep.subr.bf16.mxu1 %v5251_v12 }
0x2e01   :  { %v4045_v15 = vadd.f32 %v4036_v13, %v4021_v22  ;;  %5254 = vmatpush3.bf16.msra.mxu1 %v5251_v12  ;;  %v4622_v12 = vld [vmem:[%s7037_s11 + $0xf8] sm:$0xff]  ;;  %v4621_v22 = vld [vmem:[%s7037_s11 + $0xf0] sm:$0xff]  ;;  %s5436_s11 = smov 126  }
0x2e02   :  { %v4050_v11 = vmax.f32 %v4046_v23, 0.0 }
0x2e03   :  { %v4049_v27 = vmax.f32 %v4045_v15, 0.0 }
0x2e05   :  { %v5255_v6 = vpack.c.bf16 %v4050_v11, %v4049_v27  ;;  %v4626_v11 = vld [vmem:[%s7036_s12 + $0xf8] sm:$0xff]  ;;  %v4625_v27 = vld [vmem:[%s7036_s12 + $0xf0] sm:$0xff] }
0x2e07   :  { %5256 = vmatprep.subr.bf16.mxu1 %v5255_v6 }
0x2e08   :  { %5258 = vmatpush3.bf16.msra.mxu1 %v5255_v6 }
0x2e0b   :  { %5075 = vmatmul.mubr.msk.f32.vlgmr.msra.gmra.mrb[36].mxu1 %vm236_vm1, %v4612_v32 }
0x2e0c   :  { %5077 = vmatprep.mubr.msk.f32.mxu1 %vm236_vm1, %v4613_v29 }
0x2e0f   :  { %5078 = vmatmul.mubr.msk.f32.gmra.mrb[38].mxu1 %vm236_vm1, %v4614_v28 }
0x2ede   :  { %v5076_v55 = vpop.f32.mrb[36].mxu1 }
0x2edf   :  { %v4134_v18 = vpop.f32.mrb[37].mxu1  ;;  %v4166_v19 = vsel %vm3509_vm4, %v5076_v55, 0.0 }
0x2ee0   :  { %4167 = vadd.xlane.f32.xlu0 %v4166_v19  ;;  %v4163_v20 = vsel %vm3509_vm4, %v4134_v18, 0.0  ;;  %v5435_v19 = vmov 0.0|0.0  }
0x2ee1   :  { %4164 = vadd.xlane.f32.xlu1 %v4163_v20  ;;  %5259 = vmatprep.subr.bf16.mxu0 %v5435_v19 }
0x2ee2   :  { %v5079_v54 = vpop.f32.mrb[38].mxu1 }
0x2ee3   :  { %v4144_v48 = vpop.f32.mrb[39].mxu1  ;;  %v4172_v26 = vsel %vm3509_vm4, %v5079_v54, 0.0 }
0x2ee4   :  { %v4169_v37 = vsel %vm3509_vm4, %v4144_v48, 0.0 }
0x2ee5   :  { %4173 = vadd.xlane.f32.xlu1 %v4172_v26  ;;  %4170 = vadd.xlane.f32.xlu0 %v4169_v37 }
0x2f6d   :  { %v4168_v31 = vpop.xlane.xlu0 %4167 }
0x2f6e   :  { %v4176_v7 = vmul.f32 0.25, %v4168_v31  ;;  %v4165_v24 = vpop.xlane.xlu1 %4164 }
0x2f6f   :  { %v4175_v10 = vmul.f32 0.25, %v4165_v24 }
0x2f70   :  { %v6963_v16 = vsub.f32 %v5076_v55, %v4176_v7 }
0x2f71   :  { %v6965_v33 = vsub.f32 %v4134_v18, %v4175_v10 }
0x2f72   :  { %v4174_v62 = vpop.xlane.xlu1 %4173  ;;  %v4171_v40 = vpop.xlane.xlu0 %4170  ;;  %v4184_v30 = vmul.f32 %v6963_v16, %v6963_v16 }
0x2f73   :  { %v4178_v43 = vmul.f32 0.25, %v4174_v62  ;;  %v4177_v45 = vmul.f32 0.25, %v4171_v40  ;;  %v4183_v42 = vmul.f32 %v6965_v33, %v6965_v33 }
0x2f74   :  { %v4190_v34 = vsel %vm3509_vm4, %v4184_v30, 0.0 }
0x2f75   :  { %v6972_v35 = vsub.f32 %v5079_v54, %v4178_v43  ;;  %v6974_v63 = vsub.f32 %v4144_v48, %v4177_v45  ;;  %4191 = vadd.xlane.f32.xlu1 %v4190_v34  ;;  %v4187_v17 = vsel %vm3509_vm4, %v4183_v42, 0.0  ;;  %v5438_v43 = vmov 0.0   ;;  %v4296_v34 = vld [vmem:[%s7038_s14] sm:$0x7] }
0x2f76   :  { %4188 = vadd.xlane.f32.xlu0 %v4187_v17  ;;  %5088 = vmatprep.mubr.msk.f32.mxu0 %vm5437_vm5, %v5438_v43 }
0x2f77   :  { %v4186_v36 = vmul.f32 %v6972_v35, %v6972_v35  ;;  %v4185_v44 = vmul.f32 %v6974_v63, %v6974_v63 }
0x2f79   :  { %v4196_v38 = vsel %vm3509_vm4, %v4186_v36, 0.0  ;;  %v4193_v52 = vsel %vm3509_vm4, %v4185_v44, 0.0 }
0x2f7a   :  { %4197 = vadd.xlane.f32.xlu1 %v4196_v38  ;;  %4194 = vadd.xlane.f32.xlu0 %v4193_v52 }
0x2f8b   :  { %4241 = vperm.xlu1 %5273, %v4623_v46  }
0x2f90   :  { %4246 = vperm.xlu0 %5274, %v4624_v25  }
0x3002   :  { %v4192_v21 = vpop.xlane.xlu1 %4191 }
0x3003   :  { %v4200_v47 = vmul.f32 0.25, %v4192_v21  ;;  %v4189_v50 = vpop.xlane.xlu0 %4188 }
0x3004   :  { %v4199_v49 = vmul.f32 0.25, %v4189_v50 }
0x3005   :  { %v4204_v51 = vadd.f32 1e-05, %v4200_v47 }
0x3006   :  { %v4203_v56 = vadd.f32 1e-05, %v4199_v49  ;;  %v4295_v49 = vld [vmem:[%s7039_s13] sm:$0x7] }
0x3007   :  { %5423 = vrsqrt.f32 %v4204_v51  ;;  %v4198_v1 = vpop.xlane.xlu1 %4197  ;;  %v4195_v8 = vpop.xlane.xlu0 %4194 }
0x3008   :  { %5425 = vrsqrt.f32 %v4203_v56  ;;  %v4202_v3 = vmul.f32 0.25, %v4198_v1  ;;  %v4201_v5 = vmul.f32 0.25, %v4195_v8 }
0x300a   :  { %v4206_v57 = vadd.f32 1e-05, %v4202_v3  ;;  %v4205_v58 = vadd.f32 1e-05, %v4201_v5 }
0x300b   :  { %v4242_v6 = vpop.permute.xlu1 %4241 }
0x300c   :  { %5427 = vrsqrt.f32 %v4206_v57 }
0x300d   :  { %5429 = vrsqrt.f32 %v4205_v58 }
0x300f   :  { %v4247_v32 = vpop.permute.xlu0 %4246 }
0x3011   :  { %v5424_v60 = vpop.eup %5423 }
0x3012   :  { %v5426_v4 = vpop.eup %5425  ;;  %v4212_v2 = vmul.f32 %v5424_v60, %v4620_v59 }
0x3013   :  { %v4211_v9 = vmul.f32 %v5426_v4, %v4619_v53 }
0x3014   :  { %4222 = vperm.xlu1 %5273, %v4212_v2  }
0x3015   :  { %4217 = vperm.xlu0 %5274, %v4211_v9  }
0x3016   :  { %v5428_v14 = vpop.eup %5427 }
0x3017   :  { %v5430_v13 = vpop.eup %5429  ;;  %v4214_v23 = vmul.f32 %v5428_v14, %v4622_v12 }
0x3018   :  { %v4213_v15 = vmul.f32 %v5430_v13, %v4621_v22 }
0x3019   :  { %4232 = vperm.xlu0 %5274, %v4214_v23  }
0x301a   :  { %4227 = vperm.xlu1 %5273, %v4213_v15  }
0x301d   :  { %4256 = vperm.xlu0 %5274, %v4626_v11  }
0x301e   :  { %4251 = vperm.xlu1 %5273, %v4625_v27  }
0x3093   :  { %v4223_v29 = vpop.permute.xlu1 %4222 }
0x3094   :  { %v4236_v28 = vmul.f32 %v4223_v29, %v6963_v16  ;;  %v4218_v55 = vpop.permute.xlu0 %4217 }
0x3095   :  { %v4235_v18 = vmul.f32 %v4218_v55, %v6965_v33 }
0x3096   :  { %v4260_v20 = vadd.f32 %v4247_v32, %v4236_v28 }
0x3097   :  { %v4259_v54 = vadd.f32 %v4242_v6, %v4235_v18 }
0x3098   :  { %v4264_v48 = vmax.f32 %v4260_v20, 0.0  ;;  %v4233_v26 = vpop.permute.xlu0 %4232 }
0x3099   :  { %v4263_v37 = vmax.f32 %v4259_v54, 0.0  ;;  %v4228_v31 = vpop.permute.xlu1 %4227  ;;  %v4238_v10 = vmul.f32 %v4233_v26, %v6972_v35 }
0x309a   :  { %v4268_v7 = vadd.f32 %v4264_v48, %v6862_v41  ;;  %v4237_v62 = vmul.f32 %v4228_v31, %v6974_v63 }
0x309b   :  { %v4267_v24 = vadd.f32 %v4263_v37, %v6865_v39 }
0x309c   :  { %4277 = vrot.lane.b32.xlu0 %v4268_v7, %s5436_s11  ;;  %v4257_v16 = vpop.permute.xlu0 %4256 }
0x309d   :  { %v4252_v33 = vpop.permute.xlu1 %4251  ;;  %v4262_v40 = vadd.f32 %v4257_v16, %v4238_v10  ;;  %4275 = vrot.lane.b32.xlu1 %v4267_v24, %s5436_s11 }
0x309e   :  { %v4261_v30 = vadd.f32 %v4252_v33, %v4237_v62 }
0x309f   :  { %v4266_v45 = vmax.f32 %v4262_v40, 0.0 }
0x30a0   :  { %v4265_v42 = vmax.f32 %v4261_v30, 0.0 }
0x30a1   :  { %v4270_v41 = vadd.f32 %v4266_v45, %v6872_v61 }
0x30a2   :  { %v4269_v39 = vadd.f32 %v4265_v42, %v6875_v0 }
0x30a3   :  { %4281 = vrot.lane.b32.xlu0 %v4270_v41, %s5436_s11 }
0x30a4   :  { %4279 = vrot.lane.b32.xlu1 %v4269_v39, %s5436_s11 }
0x30a8   :  { %4299 = vperm.xlu1 %5273, %v4296_v34  }
0x310e   :  { %v4278_v35 = vpop.permute.xlu0 %4277 }
0x310f   :  { %v4288_v63 = vadd.f32 %v4278_v35, %v4268_v7  ;;  %v4276_v17 = vpop.permute.xlu1 %4275 }
0x3110   :  { %v4287_v36 = vadd.f32 %v4276_v17, %v4267_v24 }
0x3111   :  { %v4292_v44 = vmul.f32 0.5, %v4288_v63 }
0x3112   :  { %v4291_v38 = vmul.f32 0.5, %v4287_v36 }
0x3114   :  { %v5260_v52 = vpack.c.bf16 %v4292_v44, %v4291_v38 }
0x3115   :  { %v4282_v46 = vpop.permute.xlu0 %4281 }
0x3116   :  { %v4280_v25 = vpop.permute.xlu1 %4279  ;;  %v4290_v21 = vadd.f32 %v4282_v46, %v4270_v41  ;;  %5261 = vmatpush3.bf16.msra.mxu0 %v5260_v52 }
0x3117   :  { %v4289_v61 = vadd.f32 %v4280_v25, %v4269_v39  ;;  %5262 = vmatprep.subr.bf16.mxu0 %v5435_v19 }
0x3118   :  { %v4294_v0 = vmul.f32 0.5, %v4290_v21 }
0x3119   :  { %v4293_v47 = vmul.f32 0.5, %v4289_v61 }
0x311b   :  { %v5263_v50 = vpack.c.bf16 %v4294_v0, %v4293_v47 }
0x311d   :  { %5264 = vmatpush3.bf16.msra.mxu0 %v5263_v50 }
0x3120   :  { %5089 = vmatmul.mubr.msk.f32.vlgmr.msra.gmra.mrb[38].mxu0 %vm236_vm1, %v4295_v49 }
0x3127   :  { %v4300_v51 = vpop.permute.xlu1 %4299 }
0x31f3   :  { %v4371_v56 = vpop.f32.mrb[38].mxu0 }
0x31f4   :  { %v4372_v1 = vadd.f32 %v4371_v56, %v4300_v51  ;;  %v5090_v8 = vpop.f32.mrb[39].mxu0 }
0x31f6   :  { %4376 = vst.msk [vmem:[%s7040_s15] sm:$0x7] %vm4375_vm6, %v4372_v1 }

</bundles_post_ra>
